<compile_context>
chip_gen: v7x
topology: tpu7x:2x2x1
jax: 0.10.0
libtpu: 0.0.40
codegen_flags: <defaults>
</compile_context>

<pallas_src>
import numpy as np
import jax
import jax.numpy as jnp
from jax.experimental import pallas as pl
from jax.experimental.pallas import tpu as pltpu

# ---- scaled-down hyper-parameters consistent with VocoderNetwork.__init__ ----
R = 16            # receptive_field (power of two)
M = 8             # mgc_size
U = 4             # upsample_size
F = 16            # filter_size
HID = 32          # pre_output width (256 in the original)
NUM_BLOCKS = 2
L = R.bit_length() - 1        # log2(R) CondConv layers per WaveNet block
T0 = R // 2                   # time steps after layer 0
SLAB = 128                    # lane-aligned stride for per-(block,layer) conditioning slabs
OUT_LANES = 128               # lane-dense output slab width (mean | logv | newx | zero pad)
SQRT_HALF = 0.70710678118
assert 3 * F <= SLAB


def _bitrev_order(n):
    bits = max(n.bit_length() - 1, 0)
    if bits == 0:
        return [0] * n
    return [int(format(j, '0{}b'.format(bits))[::-1], 2) for j in range(n)]


BREV = _bitrev_order(T0)      # storage position j holds conv-output time BREV[j]


def _fullspec(shape):
    nd = len(shape)
    return pl.BlockSpec(tuple(shape), lambda i, _nd=nd: (0,) * _nd)


# ---------------------------------------------------------------------------
# The fused Pallas kernel
# ---------------------------------------------------------------------------
def _vocoder_kernel(mgc_ref, sig_ref, eps_ref,
                    ckW_ref, ckB_ref, cpW_ref, cpB_ref,
                    l0W_ref, convW_ref, preW_ref, preB_ref, headW_ref, headB_ref,
                    out_ref, prev_ref):
    n = mgc_ref.shape[0]
    Bn = n * U

    # --- conditioning = Tanh(Linear(mgc)), reshaped to (Bn, M) rows b = frame*U + u ---
    cflat = jnp.tanh(jnp.dot(mgc_ref[...], ckW_ref[...],
                             preferred_element_type=jnp.float32) + ckB_ref[...])     # (n, M*U)
    cond = jnp.stack([cflat[:, u * M:(u + 1) * M] for u in range(U)], axis=1)
    cond = cond.reshape(Bn, M)                                                        # (Bn, M)

    # --- every block/layer's cond_input/cond_gate projection (+ folded conv biases)
    #     in ONE lane-dense matmul; slab k = block*L + layer lives at lanes [k*SLAB, k*SLAB+3F) ---
    condproj = (jnp.dot(cond, cpW_ref[...], preferred_element_type=jnp.float32)
                + cpB_ref[...])                                                       # (Bn, NB*L*SLAB)

    # prev_x column lives in VMEM scratch; the sig[:R] prefix never changes across blocks.
    prev_ref[...] = sig_ref[...]

    for s in range(NUM_BLOCKS):
        # --- sliding windows, built in-kernel, stored in bit-reversed time order so each
        #     layer's even/odd tap split is simply the first/second contiguous half ---
        win_e = jnp.stack(
            [prev_ref[2 * BREV[j]:2 * BREV[j] + Bn, :] for j in range(T0)], axis=0)   # (T0, Bn, 1)
        win_o = jnp.stack(
            [prev_ref[2 * BREV[j] + 1:2 * BREV[j] + 1 + Bn, :] for j in range(T0)], axis=0)

        # --- layer 0 (cin == 1): broadcast multiplies on the VPU, no zero-padded matmul ---
        base = (s * L) * SLAB
        csl = condproj[:, base:base + 3 * F]                                          # (Bn, 3F)
        z = win_e * l0W_ref[s, 0] + win_o * l0W_ref[s, 1] + csl                       # (T0, Bn, 3F)
        h = (jnp.tanh(z[..., :F]) * jax.nn.sigmoid(z[..., F:2 * F])
             + z[..., 2 * F:]) * SQRT_HALF                                            # (T0, Bn, F)

        # --- layers 1..L-1: one fused {even,odd} x {input,gate,residual} matmul per layer ---
        T = T0
        for l in range(1, L):
            T2 = T // 2
            lhs = jnp.concatenate([h[:T2], h[T2:]], axis=-1).reshape(T2 * Bn, 2 * F)  # (T2*Bn, 2F)
            z = jnp.dot(lhs, convW_ref[s, l - 1], preferred_element_type=jnp.float32)
            base = (s * L + l) * SLAB
            z = z.reshape(T2, Bn, 3 * F) + condproj[:, base:base + 3 * F]
            h = (jnp.tanh(z[..., :F]) * jax.nn.sigmoid(z[..., F:2 * F])
                 + z[..., 2 * F:]) * SQRT_HALF
            T = T2

        # --- heads: relu(pre) -> fused (mean|logvar) matmul -> reparameterize ---
        feat = h.reshape(Bn, F)                                                       # T == 1
        pre = jnp.maximum(
            jnp.dot(feat, preW_ref[s], preferred_element_type=jnp.float32) + preB_ref[s], 0.0)
        head = jnp.dot(pre, headW_ref[s], preferred_element_type=jnp.float32) + headB_ref[s]
        mean = head[:, 0:1]
        logv = head[:, 1:2]
        newx = eps_ref[s] * jnp.exp(0.5 * logv) + mean                                # (Bn, 1)

        # single lane-dense store per block: lanes 0/1/2 = mean / logvar / new_x
        out_ref[s] = jnp.concatenate(
            [mean, logv, newx, jnp.zeros((Bn, OUT_LANES - 3), jnp.float32)], axis=-1)

        if s + 1 < NUM_BLOCKS:
            prev_ref[R:, :] = newx          # next block's prev_x = [sig[:R], new_x]


def vocoder_forward_pallas(mgc, sig, packed, eps_list):
    n = mgc.shape[0]
    Bn = n * U
    sig_col = sig.reshape(R + Bn, 1)
    eps = jnp.stack(list(eps_list), axis=0)                        # (NUM_BLOCKS, Bn, 1)
    args = (mgc, sig_col, eps,
            packed['cond_Wk'], packed['cond_bk'], packed['condW_all'], packed['condB_all'],
            packed['l0W'], packed['convW'], packed['preW'], packed['preB'],
            packed['headW'], packed['headB'])
    out = pl.pallas_call(
        _vocoder_kernel,
        grid=(1,),
        in_specs=[_fullspec(a.shape) for a in args],
        out_specs=_fullspec((NUM_BLOCKS, Bn, OUT_LANES)),
        out_shape=jax.ShapeDtypeStruct((NUM_BLOCKS, Bn, OUT_LANES), jnp.float32),
        scratch_shapes=[pltpu.VMEM((R + Bn, 1), jnp.float32)],
        compiler_params=pltpu.CompilerParams(dimension_semantics=("arbitrary",)),
    )(*args)
    mean = out[NUM_BLOCKS - 1, :, 0:1]
    stdev = out[NUM_BLOCKS - 1, :, 1:2]                            # log-variance (as in the module)
    new_tail = [out[s, -R:, 2:3] for s in range(NUM_BLOCKS)]
    return sig[R:], mean, stdev, new_tail


# ---------------------------------------------------------------------------
# Parameter initialization (deterministic, torch layouts)
# ---------------------------------------------------------------------------
class KeyGen:
    def __init__(self, key):
        self.key = key
        self.i = 0

    def __call__(self):
        self.i += 1
        return jax.random.fold_in(self.key, self.i)


def _xavier(key, shape, fan_in, fan_out):
    std = (2.0 / (fan_in + fan_out)) ** 0.5
    return std * jax.random.normal(key, shape, jnp.float32)


def init_params_torch(seed=0):
    kg = KeyGen(jax.random.PRNGKey(seed))
    p = {
        'cond_W': _xavier(kg(), (M * U, M), M, M * U),            # torch Linear (out, in)
        'cond_b': 0.05 * jax.random.normal(kg(), (M * U,), jnp.float32),
        'stacks': [],
    }
    for _s in range(NUM_BLOCKS):
        layers = []
        for l in range(L):
            cin = 1 if l == 0 else F
            lyr = {}
            for nm in ('i', 'g', 'r'):
                lyr['W' + nm] = _xavier(kg(), (F, cin, 2), cin * 2, F * 2)   # conv1d (out, in, k)
                lyr['b' + nm] = 0.05 * jax.random.normal(kg(), (F,), jnp.float32)
            lyr['Wci'] = _xavier(kg(), (F, M), M, F)
            lyr['bci'] = 0.05 * jax.random.normal(kg(), (F,), jnp.float32)
            lyr['Wcg'] = _xavier(kg(), (F, M), M, F)
            lyr['bcg'] = 0.05 * jax.random.normal(kg(), (F,), jnp.float32)
            layers.append(lyr)
        st = {
            'layers': layers,
            'preW': _xavier(kg(), (HID, F), F, HID),
            'preB': 0.05 * jax.random.normal(kg(), (HID,), jnp.float32),
            'meanW': _xavier(kg(), (1, HID), HID, 1),
            'meanB': 0.05 * jax.random.normal(kg(), (1,), jnp.float32),
            'stdW': _xavier(kg(), (1, HID), HID, 1),
            'stdB': 0.05 * jax.random.normal(kg(), (1,), jnp.float32),
        }
        p['stacks'].append(st)
    return p


# ---------------------------------------------------------------------------
# Pack torch-layout params into the fused kernel layouts
# ---------------------------------------------------------------------------
def pack_params(pt):
    P = NUM_BLOCKS * L * SLAB
    condW_all = np.zeros((M, P), np.float32)
    condB_all = np.zeros((1, P), np.float32)
    l0W = np.zeros((NUM_BLOCKS, 2, 1, 3 * F), np.float32)
    convW = np.zeros((NUM_BLOCKS, max(L - 1, 1), 2 * F, 3 * F), np.float32)
    preW = np.zeros((NUM_BLOCKS, F, HID), np.float32)
    preB = np.zeros((NUM_BLOCKS, 1, HID), np.float32)
    headW = np.zeros((NUM_BLOCKS, HID, 2), np.float32)
    headB = np.zeros((NUM_BLOCKS, 1, 2), np.float32)

    for s, st in enumerate(pt['stacks']):
        for l, lyr in enumerate(st['layers']):
            off = (s * L + l) * SLAB
            Wci = np.asarray(lyr['Wci']); Wcg = np.asarray(lyr['Wcg'])
            # cond projections into the i/g thirds; conv biases folded into all three thirds
            condW_all[:, off:off + F] = Wci.T
            condW_all[:, off + F:off + 2 * F] = Wcg.T
            condB_all[0, off:off + F] = np.asarray(lyr['bci']) + np.asarray(lyr['bi'])
            condB_all[0, off + F:off + 2 * F] = np.asarray(lyr['bcg']) + np.asarray(lyr['bg'])
            condB_all[0, off + 2 * F:off + 3 * F] = np.asarray(lyr['br'])

            Wi = np.asarray(lyr['Wi']); Wg = np.asarray(lyr['Wg']); Wr = np.asarray(lyr['Wr'])
            if l == 0:
                # cin == 1: per-tap (1, 3F) rows for the broadcast-multiply path
                for k in range(2):
                    l0W[s, k, 0] = np.concatenate([Wi[:, 0, k], Wg[:, 0, k], Wr[:, 0, k]])
            else:
                # fused weight: rows [even-tap channels | odd-tap channels], cols [i | g | r]
                blocks = [np.concatenate([W[:, :, 0].T, W[:, :, 1].T], axis=0)
                          for W in (Wi, Wg, Wr)]                               # each (2F, F)
                convW[s, l - 1] = np.concatenate(blocks, axis=1)               # (2F, 3F)

        preW[s] = np.asarray(st['preW']).T
        preB[s, 0] = np.asarray(st['preB'])
        headW[s] = np.concatenate([np.asarray(st['meanW']).T, np.asarray(st['stdW']).T], axis=1)
        headB[s, 0] = np.concatenate([np.asarray(st['meanB']), np.asarray(st['stdB'])])

    return {
        'cond_Wk': jnp.asarray(pt['cond_W']).T,            # (M, M*U)
        'cond_bk': jnp.asarray(pt['cond_b'])[None, :],     # (1, M*U)
        'condW_all': jnp.asarray(condW_all), 'condB_all': jnp.asarray(condB_all),
        'l0W': jnp.asarray(l0W), 'convW': jnp.asarray(convW),
        'preW': jnp.asarray(preW), 'preB': jnp.asarray(preB),
        'headW': jnp.asarray(headW), 'headB': jnp.asarray(headB),
    }


# ---------------------------------------------------------------------------
# Pure-JAX reference (mirrors the PyTorch NCL math) for verification
# ---------------------------------------------------------------------------
def _cond_conv_ref(x, cond, lyr):
    def conv(W, b):
        xe = x[:, :, 0::2]
        xo = x[:, :, 1::2]
        return (jnp.einsum('bct,oc->bot', xe, W[:, :, 0])
                + jnp.einsum('bct,oc->bot', xo, W[:, :, 1])
                + b[None, :, None])
    inp = conv(lyr['Wi'], lyr['bi'])
    gate = conv(lyr['Wg'], lyr['bg'])
    res = conv(lyr['Wr'], lyr['br'])
    ic = cond @ lyr['Wci'].T + lyr['bci']
    gc = cond @ lyr['Wcg'].T + lyr['bcg']
    it = jnp.tanh(inp + ic[:, :, None])
    gt = jax.nn.sigmoid(gate + gc[:, :, None])
    return (it * gt + res) * SQRT_HALF


def vocoder_forward_ref(mgc, sig, pt, eps_list):
    condv = jnp.tanh(mgc @ pt['cond_W'].T + pt['cond_b'])
    cond = condv.reshape(mgc.shape[0] * U, M)
    B = sig.shape[0] - R
    prev_x = sig
    new_tail = []
    mean = logv = None
    for s in range(NUM_BLOCKS):
        x = jnp.stack([prev_x[b:b + R] for b in range(B)], axis=0)   # (B, R)
        h = x[:, None, :]                                            # (B, 1, R)  NCL
        st = pt['stacks'][s]
        for l in range(L):
            h = _cond_conv_ref(h, cond, st['layers'][l])
        feat = h[:, :, 0]
        pre = jax.nn.relu(feat @ st['preW'].T + st['preB'])
        mean = pre @ st['meanW'].T + st['meanB']
        logv = pre @ st['stdW'].T + st['stdB']
        newx = eps_list[s] * jnp.exp(0.5 * logv) + mean
        new_tail.append(newx[-R:])
        prev_x = jnp.concatenate([sig[:R], newx[:, 0]])
    return sig[R:], mean, logv, new_tail


# ---------------------------------------------------------------------------
if __name__ == "__main__":
    key = jax.random.PRNGKey(0)
    k_mgc, k_sig = jax.random.split(key)

    n_frames = 4                                    # len(mgc)
    sig_len = R + n_frames * U                      # len(signal) = RECEPTIVE_FIELD + N*UPSAMPLE
    mgc = 0.5 * jax.random.normal(k_mgc, (n_frames, M), jnp.float32)
    signal = 0.5 * jax.random.normal(k_sig, (sig_len,), jnp.float32)

    Bn = sig_len - R
    eps_list = [jax.random.normal(jax.random.fold_in(jax.random.PRNGKey(123), s), (Bn, 1),
                                  jnp.float32) for s in range(NUM_BLOCKS)]

    params_t = init_params_torch(seed=0)
    packed = pack_params(params_t)

    out_sig, mean, stdev, new_tail = vocoder_forward_pallas(mgc, signal, packed, eps_list)
    jax.block_until_ready((out_sig, mean, stdev, new_tail))

    with jax.default_matmul_precision("highest"):
        r_sig, r_mean, r_stdev, r_tail = vocoder_forward_ref(mgc, signal, params_t, eps_list)
        jax.block_until_ready((r_sig, r_mean, r_stdev, r_tail))

    tol = dict(atol=2e-3, rtol=2e-3)
    ok = (jnp.allclose(out_sig, r_sig, **tol)
          and jnp.allclose(mean, r_mean, **tol)
          and jnp.allclose(stdev, r_stdev, **tol)
          and all(jnp.allclose(a, b, **tol) for a, b in zip(new_tail, r_tail)))
    if not ok:
        raise AssertionError("Pallas kernel output mismatch vs reference")
    print("KERNEL_OK")
</pallas_src>

<mosaic_0001>
module attributes {stable_mosaic.version = 11 : i64} {
  func.func @_vocoder_kernel(%arg0: i32, %arg1: memref<4x8xf32, #tpu.memory_space<vmem>>, %arg2: memref<32x1xf32, #tpu.memory_space<vmem>>, %arg3: memref<2x16x1xf32, #tpu.memory_space<vmem>>, %arg4: memref<8x32xf32, #tpu.memory_space<vmem>>, %arg5: memref<1x32xf32, #tpu.memory_space<vmem>>, %arg6: memref<8x1024xf32, #tpu.memory_space<vmem>>, %arg7: memref<1x1024xf32, #tpu.memory_space<vmem>>, %arg8: memref<2x2x1x48xf32, #tpu.memory_space<vmem>>, %arg9: memref<2x3x32x48xf32, #tpu.memory_space<vmem>>, %arg10: memref<2x16x32xf32, #tpu.memory_space<vmem>>, %arg11: memref<2x1x32xf32, #tpu.memory_space<vmem>>, %arg12: memref<2x32x2xf32, #tpu.memory_space<vmem>>, %arg13: memref<2x1x2xf32, #tpu.memory_space<vmem>>, %arg14: memref<2x16x128xf32, #tpu.memory_space<vmem>>, %arg15: memref<32x1xf32, #tpu.memory_space<vmem>>) attributes {dimension_semantics = [#tpu.dimension_semantics<arbitrary>], iteration_bounds = array<i64: 1>, scalar_prefetch = 0 : i64, scratch_operands = 1 : i64, tpu.core_type = #tpu.core_type<tc>, window_params = [{pipeline_mode = #tpu.pipeline_mode<synchronous>, transform_indices = @transform_0, window_bounds = array<i64: 4, 8>}, {pipeline_mode = #tpu.pipeline_mode<synchronous>, transform_indices = @transform_1, window_bounds = array<i64: 32, 1>}, {pipeline_mode = #tpu.pipeline_mode<synchronous>, transform_indices = @transform_2, window_bounds = array<i64: 2, 16, 1>}, {pipeline_mode = #tpu.pipeline_mode<synchronous>, transform_indices = @transform_3, window_bounds = array<i64: 8, 32>}, {pipeline_mode = #tpu.pipeline_mode<synchronous>, transform_indices = @transform_4, window_bounds = array<i64: 1, 32>}, {pipeline_mode = #tpu.pipeline_mode<synchronous>, transform_indices = @transform_5, window_bounds = array<i64: 8, 1024>}, {pipeline_mode = #tpu.pipeline_mode<synchronous>, transform_indices = @transform_6, window_bounds = array<i64: 1, 1024>}, {pipeline_mode = #tpu.pipeline_mode<synchronous>, transform_indices = @transform_7, window_bounds = array<i64: 2, 2, 1, 48>}, {pipeline_mode = #tpu.pipeline_mode<synchronous>, transform_indices = @transform_8, window_bounds = array<i64: 2, 3, 32, 48>}, {pipeline_mode = #tpu.pipeline_mode<synchronous>, transform_indices = @transform_9, window_bounds = array<i64: 2, 16, 32>}, {pipeline_mode = #tpu.pipeline_mode<synchronous>, transform_indices = @transform_10, window_bounds = array<i64: 2, 1, 32>}, {pipeline_mode = #tpu.pipeline_mode<synchronous>, transform_indices = @transform_11, window_bounds = array<i64: 2, 32, 2>}, {pipeline_mode = #tpu.pipeline_mode<synchronous>, transform_indices = @transform_12, window_bounds = array<i64: 2, 1, 2>}, {pipeline_mode = #tpu.pipeline_mode<synchronous>, transform_indices = @transform_13, window_bounds = array<i64: 2, 16, 128>}]} {
    %c0 = arith.constant 0 : index
    %c0_0 = arith.constant 0 : index
    %0 = vector.load %arg1[%c0, %c0_0] : memref<4x8xf32, #tpu.memory_space<vmem>>, vector<4x8xf32>
    %c0_1 = arith.constant 0 : index
    %c0_2 = arith.constant 0 : index
    %1 = vector.load %arg4[%c0_1, %c0_2] : memref<8x32xf32, #tpu.memory_space<vmem>>, vector<8x32xf32>
    %cst = arith.constant dense<0.000000e+00> : vector<4x32xf32>
    %2 = tpu.matmul %0, %1, %cst {dimension_numbers = #tpu.dot_dimension_numbers<[1], [0], [0], [1], [0, 0, 1, 1], [], []>} : vector<4x8xf32>, vector<8x32xf32>, vector<4x32xf32> -> vector<4x32xf32>
    %c0_3 = arith.constant 0 : index
    %c0_4 = arith.constant 0 : index
    %3 = vector.load %arg5[%c0_3, %c0_4] : memref<1x32xf32, #tpu.memory_space<vmem>>, vector<1x32xf32>
    %4 = vector.broadcast %3 : vector<1x32xf32> to vector<4x32xf32>
    %5 = arith.addf %2, %4 : vector<4x32xf32>
    %6 = math.tanh %5 : vector<4x32xf32>
    %7 = vector.extract_strided_slice %6 {offsets = [0, 0], sizes = [4, 8], strides = [1, 1]} : vector<4x32xf32> to vector<4x8xf32>
    %8 = vector.extract_strided_slice %6 {offsets = [0, 8], sizes = [4, 8], strides = [1, 1]} : vector<4x32xf32> to vector<4x8xf32>
    %9 = vector.extract_strided_slice %6 {offsets = [0, 16], sizes = [4, 8], strides = [1, 1]} : vector<4x32xf32> to vector<4x8xf32>
    %10 = vector.extract_strided_slice %6 {offsets = [0, 24], sizes = [4, 8], strides = [1, 1]} : vector<4x32xf32> to vector<4x8xf32>
    %11 = vector.shape_cast %7 : vector<4x8xf32> to vector<4x1x8xf32>
    %12 = vector.shape_cast %8 : vector<4x8xf32> to vector<4x1x8xf32>
    %13 = vector.shape_cast %9 : vector<4x8xf32> to vector<4x1x8xf32>
    %14 = vector.shape_cast %10 : vector<4x8xf32> to vector<4x1x8xf32>
    %15 = tpu.concatenate %11, %12, %13, %14 in 1 : vector<4x1x8xf32>, vector<4x1x8xf32>, vector<4x1x8xf32>, vector<4x1x8xf32> -> vector<4x4x8xf32>
    %16 = vector.shape_cast %15 : vector<4x4x8xf32> to vector<16x8xf32>
    %c0_5 = arith.constant 0 : index
    %c0_6 = arith.constant 0 : index
    %17 = vector.load %arg6[%c0_5, %c0_6] : memref<8x1024xf32, #tpu.memory_space<vmem>>, vector<8x1024xf32>
    %cst_7 = arith.constant dense<0.000000e+00> : vector<16x1024xf32>
    %18 = tpu.matmul %16, %17, %cst_7 {dimension_numbers = #tpu.dot_dimension_numbers<[1], [0], [0], [1], [0, 0, 1, 1], [], []>} : vector<16x8xf32>, vector<8x1024xf32>, vector<16x1024xf32> -> vector<16x1024xf32>
    %c0_8 = arith.constant 0 : index
    %c0_9 = arith.constant 0 : index
    %19 = vector.load %arg7[%c0_8, %c0_9] : memref<1x1024xf32, #tpu.memory_space<vmem>>, vector<1x1024xf32>
    %20 = vector.broadcast %19 : vector<1x1024xf32> to vector<16x1024xf32>
    %21 = arith.addf %18, %20 : vector<16x1024xf32>
    %c0_10 = arith.constant 0 : index
    %c0_11 = arith.constant 0 : index
    %22 = vector.load %arg2[%c0_10, %c0_11] : memref<32x1xf32, #tpu.memory_space<vmem>>, vector<32x1xf32>
    %c0_12 = arith.constant 0 : index
    %c0_13 = arith.constant 0 : index
    %23 = vector.load %arg15[%c0_12, %c0_13] : memref<32x1xf32, #tpu.memory_space<vmem>>, vector<32x1xf32>
    tpu.vector_store %arg15[%c0_12, %c0_13], %22 {strides = array<i32>} : memref<32x1xf32, #tpu.memory_space<vmem>>, vector<32x1xf32>,
    %c0_14 = arith.constant 0 : index
    %c0_15 = arith.constant 0 : index
    %24 = vector.load %arg15[%c0_14, %c0_15] : memref<32x1xf32, #tpu.memory_space<vmem>>, vector<16x1xf32>
    %c8 = arith.constant 8 : index
    %c0_16 = arith.constant 0 : index
    %25 = vector.load %arg15[%c8, %c0_16] : memref<32x1xf32, #tpu.memory_space<vmem>>, vector<16x1xf32>
    %c4 = arith.constant 4 : index
    %c0_17 = arith.constant 0 : index
    %26 = vector.load %arg15[%c4, %c0_17] : memref<32x1xf32, #tpu.memory_space<vmem>>, vector<16x1xf32>
    %c12 = arith.constant 12 : index
    %c0_18 = arith.constant 0 : index
    %27 = vector.load %arg15[%c12, %c0_18] : memref<32x1xf32, #tpu.memory_space<vmem>>, vector<16x1xf32>
    %c2 = arith.constant 2 : index
    %c0_19 = arith.constant 0 : index
    %28 = vector.load %arg15[%c2, %c0_19] : memref<32x1xf32, #tpu.memory_space<vmem>>, vector<16x1xf32>
    %c10 = arith.constant 10 : index
    %c0_20 = arith.constant 0 : index
    %29 = vector.load %arg15[%c10, %c0_20] : memref<32x1xf32, #tpu.memory_space<vmem>>, vector<16x1xf32>
    %c6 = arith.constant 6 : index
    %c0_21 = arith.constant 0 : index
    %30 = vector.load %arg15[%c6, %c0_21] : memref<32x1xf32, #tpu.memory_space<vmem>>, vector<16x1xf32>
    %c14 = arith.constant 14 : index
    %c0_22 = arith.constant 0 : index
    %31 = vector.load %arg15[%c14, %c0_22] : memref<32x1xf32, #tpu.memory_space<vmem>>, vector<16x1xf32>
    %32 = vector.shape_cast %24 : vector<16x1xf32> to vector<1x16x1xf32>
    %33 = vector.shape_cast %25 : vector<16x1xf32> to vector<1x16x1xf32>
    %34 = vector.shape_cast %26 : vector<16x1xf32> to vector<1x16x1xf32>
    %35 = vector.shape_cast %27 : vector<16x1xf32> to vector<1x16x1xf32>
    %36 = vector.shape_cast %28 : vector<16x1xf32> to vector<1x16x1xf32>
    %37 = vector.shape_cast %29 : vector<16x1xf32> to vector<1x16x1xf32>
    %38 = vector.shape_cast %30 : vector<16x1xf32> to vector<1x16x1xf32>
    %39 = vector.shape_cast %31 : vector<16x1xf32> to vector<1x16x1xf32>
    %40 = tpu.concatenate %32, %33, %34, %35, %36, %37, %38, %39 in 0 : vector<1x16x1xf32>, vector<1x16x1xf32>, vector<1x16x1xf32>, vector<1x16x1xf32>, vector<1x16x1xf32>, vector<1x16x1xf32>, vector<1x16x1xf32>, vector<1x16x1xf32> -> vector<8x16x1xf32>
    %c1 = arith.constant 1 : index
    %c0_23 = arith.constant 0 : index
    %41 = vector.load %arg15[%c1, %c0_23] : memref<32x1xf32, #tpu.memory_space<vmem>>, vector<16x1xf32>
    %c9 = arith.constant 9 : index
    %c0_24 = arith.constant 0 : index
    %42 = vector.load %arg15[%c9, %c0_24] : memref<32x1xf32, #tpu.memory_space<vmem>>, vector<16x1xf32>
    %c5 = arith.constant 5 : index
    %c0_25 = arith.constant 0 : index
    %43 = vector.load %arg15[%c5, %c0_25] : memref<32x1xf32, #tpu.memory_space<vmem>>, vector<16x1xf32>
    %c13 = arith.constant 13 : index
    %c0_26 = arith.constant 0 : index
    %44 = vector.load %arg15[%c13, %c0_26] : memref<32x1xf32, #tpu.memory_space<vmem>>, vector<16x1xf32>
    %c3 = arith.constant 3 : index
    %c0_27 = arith.constant 0 : index
    %45 = vector.load %arg15[%c3, %c0_27] : memref<32x1xf32, #tpu.memory_space<vmem>>, vector<16x1xf32>
    %c11 = arith.constant 11 : index
    %c0_28 = arith.constant 0 : index
    %46 = vector.load %arg15[%c11, %c0_28] : memref<32x1xf32, #tpu.memory_space<vmem>>, vector<16x1xf32>
    %c7 = arith.constant 7 : index
    %c0_29 = arith.constant 0 : index
    %47 = vector.load %arg15[%c7, %c0_29] : memref<32x1xf32, #tpu.memory_space<vmem>>, vector<16x1xf32>
    %c15 = arith.constant 15 : index
    %c0_30 = arith.constant 0 : index
    %48 = vector.load %arg15[%c15, %c0_30] : memref<32x1xf32, #tpu.memory_space<vmem>>, vector<16x1xf32>
    %49 = vector.shape_cast %41 : vector<16x1xf32> to vector<1x16x1xf32>
    %50 = vector.shape_cast %42 : vector<16x1xf32> to vector<1x16x1xf32>
    %51 = vector.shape_cast %43 : vector<16x1xf32> to vector<1x16x1xf32>
    %52 = vector.shape_cast %44 : vector<16x1xf32> to vector<1x16x1xf32>
    %53 = vector.shape_cast %45 : vector<16x1xf32> to vector<1x16x1xf32>
    %54 = vector.shape_cast %46 : vector<16x1xf32> to vector<1x16x1xf32>
    %55 = vector.shape_cast %47 : vector<16x1xf32> to vector<1x16x1xf32>
    %56 = vector.shape_cast %48 : vector<16x1xf32> to vector<1x16x1xf32>
    %57 = tpu.concatenate %49, %50, %51, %52, %53, %54, %55, %56 in 0 : vector<1x16x1xf32>, vector<1x16x1xf32>, vector<1x16x1xf32>, vector<1x16x1xf32>, vector<1x16x1xf32>, vector<1x16x1xf32>, vector<1x16x1xf32>, vector<1x16x1xf32> -> vector<8x16x1xf32>
    %58 = vector.extract_strided_slice %21 {offsets = [0, 0], sizes = [16, 48], strides = [1, 1]} : vector<16x1024xf32> to vector<16x48xf32>
    %c0_31 = arith.constant 0 : index
    %c0_32 = arith.constant 0 : index
    %c0_33 = arith.constant 0 : index
    %c0_34 = arith.constant 0 : index
    %59 = vector.load %arg8[%c0_31, %c0_32, %c0_33, %c0_34] : memref<2x2x1x48xf32, #tpu.memory_space<vmem>>, vector<1x1x1x48xf32>
    %60 = vector.shape_cast %59 : vector<1x1x1x48xf32> to vector<1x48xf32>
    %61 = vector.shape_cast %60 : vector<1x48xf32> to vector<1x1x48xf32>
    %62 = vector.broadcast %40 : vector<8x16x1xf32> to vector<8x16x48xf32>
    %63 = vector.broadcast %61 : vector<1x1x48xf32> to vector<8x16x48xf32>
    %64 = arith.mulf %62, %63 : vector<8x16x48xf32>
    %c0_35 = arith.constant 0 : index
    %c1_36 = arith.constant 1 : index
    %c0_37 = arith.constant 0 : index
    %c0_38 = arith.constant 0 : index
    %65 = vector.load %arg8[%c0_35, %c1_36, %c0_37, %c0_38] : memref<2x2x1x48xf32, #tpu.memory_space<vmem>>, vector<1x1x1x48xf32>
    %66 = vector.shape_cast %65 : vector<1x1x1x48xf32> to vector<1x48xf32>
    %67 = vector.shape_cast %66 : vector<1x48xf32> to vector<1x1x48xf32>
    %68 = vector.broadcast %57 : vector<8x16x1xf32> to vector<8x16x48xf32>
    %69 = vector.broadcast %67 : vector<1x1x48xf32> to vector<8x16x48xf32>
    %70 = arith.mulf %68, %69 : vector<8x16x48xf32>
    %71 = arith.addf %64, %70 : vector<8x16x48xf32>
    %72 = vector.shape_cast %58 : vector<16x48xf32> to vector<1x16x48xf32>
    %73 = vector.broadcast %72 : vector<1x16x48xf32> to vector<8x16x48xf32>
    %74 = arith.addf %71, %73 : vector<8x16x48xf32>
    %75 = vector.extract_strided_slice %74 {offsets = [0, 0, 0], sizes = [8, 16, 16], strides = [1, 1, 1]} : vector<8x16x48xf32> to vector<8x16x16xf32>
    %76 = math.tanh %75 : vector<8x16x16xf32>
    %77 = vector.extract_strided_slice %74 {offsets = [0, 0, 16], sizes = [8, 16, 16], strides = [1, 1, 1]} : vector<8x16x48xf32> to vector<8x16x16xf32>
    %78 = arith.negf %77 : vector<8x16x16xf32>
    %79 = math.exp %78 : vector<8x16x16xf32>
    %cst_39 = arith.constant 1.000000e+00 : f32
    %80 = vector.broadcast %cst_39 : f32 to vector<8x16x16xf32>
    %81 = arith.addf %80, %79 : vector<8x16x16xf32>
    %82 = arith.divf %80, %81 : vector<8x16x16xf32>
    %83 = arith.mulf %76, %82 : vector<8x16x16xf32>
    %84 = vector.extract_strided_slice %74 {offsets = [0, 0, 32], sizes = [8, 16, 16], strides = [1, 1, 1]} : vector<8x16x48xf32> to vector<8x16x16xf32>
    %85 = arith.addf %83, %84 : vector<8x16x16xf32>
    %cst_40 = arith.constant 0.707106769 : f32
    %86 = vector.broadcast %cst_40 : f32 to vector<8x16x16xf32>
    %87 = arith.mulf %85, %86 : vector<8x16x16xf32>
    %88 = vector.extract_strided_slice %87 {offsets = [0, 0, 0], sizes = [4, 16, 16], strides = [1, 1, 1]} : vector<8x16x16xf32> to vector<4x16x16xf32>
    %89 = vector.extract_strided_slice %87 {offsets = [4, 0, 0], sizes = [4, 16, 16], strides = [1, 1, 1]} : vector<8x16x16xf32> to vector<4x16x16xf32>
    %90 = tpu.concatenate %88, %89 in 2 : vector<4x16x16xf32>, vector<4x16x16xf32> -> vector<4x16x32xf32>
    %91 = vector.shape_cast %90 : vector<4x16x32xf32> to vector<64x32xf32>
    %c0_41 = arith.constant 0 : index
    %c0_42 = arith.constant 0 : index
    %c0_43 = arith.constant 0 : index
    %c0_44 = arith.constant 0 : index
    %92 = vector.load %arg9[%c0_41, %c0_42, %c0_43, %c0_44] : memref<2x3x32x48xf32, #tpu.memory_space<vmem>>, vector<1x1x32x48xf32>
    %93 = vector.shape_cast %92 : vector<1x1x32x48xf32> to vector<32x48xf32>
    %cst_45 = arith.constant dense<0.000000e+00> : vector<64x48xf32>
    %94 = tpu.matmul %91, %93, %cst_45 {dimension_numbers = #tpu.dot_dimension_numbers<[1], [0], [0], [1], [0, 0, 1, 1], [], []>} : vector<64x32xf32>, vector<32x48xf32>, vector<64x48xf32> -> vector<64x48xf32>
    %95 = vector.shape_cast %94 : vector<64x48xf32> to vector<4x16x48xf32>
    %96 = vector.extract_strided_slice %21 {offsets = [0, 128], sizes = [16, 48], strides = [1, 1]} : vector<16x1024xf32> to vector<16x48xf32>
    %97 = vector.shape_cast %96 : vector<16x48xf32> to vector<1x16x48xf32>
    %98 = vector.broadcast %97 : vector<1x16x48xf32> to vector<4x16x48xf32>
    %99 = arith.addf %95, %98 : vector<4x16x48xf32>
    %100 = vector.extract_strided_slice %99 {offsets = [0, 0, 0], sizes = [4, 16, 16], strides = [1, 1, 1]} : vector<4x16x48xf32> to vector<4x16x16xf32>
    %101 = math.tanh %100 : vector<4x16x16xf32>
    %102 = vector.extract_strided_slice %99 {offsets = [0, 0, 16], sizes = [4, 16, 16], strides = [1, 1, 1]} : vector<4x16x48xf32> to vector<4x16x16xf32>
    %103 = arith.negf %102 : vector<4x16x16xf32>
    %104 = math.exp %103 : vector<4x16x16xf32>
    %cst_46 = arith.constant 1.000000e+00 : f32
    %105 = vector.broadcast %cst_46 : f32 to vector<4x16x16xf32>
    %106 = arith.addf %105, %104 : vector<4x16x16xf32>
    %107 = arith.divf %105, %106 : vector<4x16x16xf32>
    %108 = arith.mulf %101, %107 : vector<4x16x16xf32>
    %109 = vector.extract_strided_slice %99 {offsets = [0, 0, 32], sizes = [4, 16, 16], strides = [1, 1, 1]} : vector<4x16x48xf32> to vector<4x16x16xf32>
    %110 = arith.addf %108, %109 : vector<4x16x16xf32>
    %cst_47 = arith.constant 0.707106769 : f32
    %111 = vector.broadcast %cst_47 : f32 to vector<4x16x16xf32>
    %112 = arith.mulf %110, %111 : vector<4x16x16xf32>
    %113 = vector.extract_strided_slice %112 {offsets = [0, 0, 0], sizes = [2, 16, 16], strides = [1, 1, 1]} : vector<4x16x16xf32> to vector<2x16x16xf32>
    %114 = vector.extract_strided_slice %112 {offsets = [2, 0, 0], sizes = [2, 16, 16], strides = [1, 1, 1]} : vector<4x16x16xf32> to vector<2x16x16xf32>
    %115 = tpu.concatenate %113, %114 in 2 : vector<2x16x16xf32>, vector<2x16x16xf32> -> vector<2x16x32xf32>
    %116 = vector.shape_cast %115 : vector<2x16x32xf32> to vector<32x32xf32>
    %c0_48 = arith.constant 0 : index
    %c1_49 = arith.constant 1 : index
    %c0_50 = arith.constant 0 : index
    %c0_51 = arith.constant 0 : index
    %117 = vector.load %arg9[%c0_48, %c1_49, %c0_50, %c0_51] : memref<2x3x32x48xf32, #tpu.memory_space<vmem>>, vector<1x1x32x48xf32>
    %118 = vector.shape_cast %117 : vector<1x1x32x48xf32> to vector<32x48xf32>
    %cst_52 = arith.constant dense<0.000000e+00> : vector<32x48xf32>
    %119 = tpu.matmul %116, %118, %cst_52 {dimension_numbers = #tpu.dot_dimension_numbers<[1], [0], [0], [1], [0, 0, 1, 1], [], []>} : vector<32x32xf32>, vector<32x48xf32>, vector<32x48xf32> -> vector<32x48xf32>
    %120 = vector.shape_cast %119 : vector<32x48xf32> to vector<2x16x48xf32>
    %121 = vector.extract_strided_slice %21 {offsets = [0, 256], sizes = [16, 48], strides = [1, 1]} : vector<16x1024xf32> to vector<16x48xf32>
    %122 = vector.shape_cast %121 : vector<16x48xf32> to vector<1x16x48xf32>
    %123 = vector.broadcast %122 : vector<1x16x48xf32> to vector<2x16x48xf32>
    %124 = arith.addf %120, %123 : vector<2x16x48xf32>
    %125 = vector.extract_strided_slice %124 {offsets = [0, 0, 0], sizes = [2, 16, 16], strides = [1, 1, 1]} : vector<2x16x48xf32> to vector<2x16x16xf32>
    %126 = math.tanh %125 : vector<2x16x16xf32>
    %127 = vector.extract_strided_slice %124 {offsets = [0, 0, 16], sizes = [2, 16, 16], strides = [1, 1, 1]} : vector<2x16x48xf32> to vector<2x16x16xf32>
    %128 = arith.negf %127 : vector<2x16x16xf32>
    %129 = math.exp %128 : vector<2x16x16xf32>
    %cst_53 = arith.constant 1.000000e+00 : f32
    %130 = vector.broadcast %cst_53 : f32 to vector<2x16x16xf32>
    %131 = arith.addf %130, %129 : vector<2x16x16xf32>
    %132 = arith.divf %130, %131 : vector<2x16x16xf32>
    %133 = arith.mulf %126, %132 : vector<2x16x16xf32>
    %134 = vector.extract_strided_slice %124 {offsets = [0, 0, 32], sizes = [2, 16, 16], strides = [1, 1, 1]} : vector<2x16x48xf32> to vector<2x16x16xf32>
    %135 = arith.addf %133, %134 : vector<2x16x16xf32>
    %cst_54 = arith.constant 0.707106769 : f32
    %136 = vector.broadcast %cst_54 : f32 to vector<2x16x16xf32>
    %137 = arith.mulf %135, %136 : vector<2x16x16xf32>
    %138 = vector.extract_strided_slice %137 {offsets = [0, 0, 0], sizes = [1, 16, 16], strides = [1, 1, 1]} : vector<2x16x16xf32> to vector<1x16x16xf32>
    %139 = vector.extract_strided_slice %137 {offsets = [1, 0, 0], sizes = [1, 16, 16], strides = [1, 1, 1]} : vector<2x16x16xf32> to vector<1x16x16xf32>
    %140 = tpu.concatenate %138, %139 in 2 : vector<1x16x16xf32>, vector<1x16x16xf32> -> vector<1x16x32xf32>
    %141 = vector.shape_cast %140 : vector<1x16x32xf32> to vector<16x32xf32>
    %c0_55 = arith.constant 0 : index
    %c2_56 = arith.constant 2 : index
    %c0_57 = arith.constant 0 : index
    %c0_58 = arith.constant 0 : index
    %142 = vector.load %arg9[%c0_55, %c2_56, %c0_57, %c0_58] : memref<2x3x32x48xf32, #tpu.memory_space<vmem>>, vector<1x1x32x48xf32>
    %143 = vector.shape_cast %142 : vector<1x1x32x48xf32> to vector<32x48xf32>
    %cst_59 = arith.constant dense<0.000000e+00> : vector<16x48xf32>
    %144 = tpu.matmul %141, %143, %cst_59 {dimension_numbers = #tpu.dot_dimension_numbers<[1], [0], [0], [1], [0, 0, 1, 1], [], []>} : vector<16x32xf32>, vector<32x48xf32>, vector<16x48xf32> -> vector<16x48xf32>
    %145 = vector.shape_cast %144 : vector<16x48xf32> to vector<1x16x48xf32>
    %146 = vector.extract_strided_slice %21 {offsets = [0, 384], sizes = [16, 48], strides = [1, 1]} : vector<16x1024xf32> to vector<16x48xf32>
    %147 = vector.shape_cast %146 : vector<16x48xf32> to vector<1x16x48xf32>
    %148 = arith.addf %145, %147 : vector<1x16x48xf32>
    %149 = vector.extract_strided_slice %148 {offsets = [0, 0, 0], sizes = [1, 16, 16], strides = [1, 1, 1]} : vector<1x16x48xf32> to vector<1x16x16xf32>
    %150 = math.tanh %149 : vector<1x16x16xf32>
    %151 = vector.extract_strided_slice %148 {offsets = [0, 0, 16], sizes = [1, 16, 16], strides = [1, 1, 1]} : vector<1x16x48xf32> to vector<1x16x16xf32>
    %152 = arith.negf %151 : vector<1x16x16xf32>
    %153 = math.exp %152 : vector<1x16x16xf32>
    %cst_60 = arith.constant 1.000000e+00 : f32
    %154 = vector.broadcast %cst_60 : f32 to vector<1x16x16xf32>
    %155 = arith.addf %154, %153 : vector<1x16x16xf32>
    %156 = arith.divf %154, %155 : vector<1x16x16xf32>
    %157 = arith.mulf %150, %156 : vector<1x16x16xf32>
    %158 = vector.extract_strided_slice %148 {offsets = [0, 0, 32], sizes = [1, 16, 16], strides = [1, 1, 1]} : vector<1x16x48xf32> to vector<1x16x16xf32>
    %159 = arith.addf %157, %158 : vector<1x16x16xf32>
    %cst_61 = arith.constant 0.707106769 : f32
    %160 = vector.broadcast %cst_61 : f32 to vector<1x16x16xf32>
    %161 = arith.mulf %159, %160 : vector<1x16x16xf32>
    %162 = vector.shape_cast %161 : vector<1x16x16xf32> to vector<16x16xf32>
    %c0_62 = arith.constant 0 : index
    %c0_63 = arith.constant 0 : index
    %c0_64 = arith.constant 0 : index
    %163 = vector.load %arg10[%c0_62, %c0_63, %c0_64] : memref<2x16x32xf32, #tpu.memory_space<vmem>>, vector<1x16x32xf32>
    %164 = vector.shape_cast %163 : vector<1x16x32xf32> to vector<16x32xf32>
    %cst_65 = arith.constant dense<0.000000e+00> : vector<16x32xf32>
    %165 = tpu.matmul %162, %164, %cst_65 {dimension_numbers = #tpu.dot_dimension_numbers<[1], [0], [0], [1], [0, 0, 1, 1], [], []>} : vector<16x16xf32>, vector<16x32xf32>, vector<16x32xf32> -> vector<16x32xf32>
    %c0_66 = arith.constant 0 : index
    %c0_67 = arith.constant 0 : index
    %c0_68 = arith.constant 0 : index
    %166 = vector.load %arg11[%c0_66, %c0_67, %c0_68] : memref<2x1x32xf32, #tpu.memory_space<vmem>>, vector<1x1x32xf32>
    %167 = vector.shape_cast %166 : vector<1x1x32xf32> to vector<1x32xf32>
    %168 = vector.broadcast %167 : vector<1x32xf32> to vector<16x32xf32>
    %169 = arith.addf %165, %168 : vector<16x32xf32>
    %cst_69 = arith.constant 0.000000e+00 : f32
    %170 = vector.broadcast %cst_69 : f32 to vector<16x32xf32>
    %171 = arith.maximumf %169, %170 : vector<16x32xf32>
    %c0_70 = arith.constant 0 : index
    %c0_71 = arith.constant 0 : index
    %c0_72 = arith.constant 0 : index
    %172 = vector.load %arg12[%c0_70, %c0_71, %c0_72] : memref<2x32x2xf32, #tpu.memory_space<vmem>>, vector<1x32x2xf32>
    %173 = vector.shape_cast %172 : vector<1x32x2xf32> to vector<32x2xf32>
    %cst_73 = arith.constant dense<0.000000e+00> : vector<16x2xf32>
    %174 = tpu.matmul %171, %173, %cst_73 {dimension_numbers = #tpu.dot_dimension_numbers<[1], [0], [0], [1], [0, 0, 1, 1], [], []>} : vector<16x32xf32>, vector<32x2xf32>, vector<16x2xf32> -> vector<16x2xf32>
    %c0_74 = arith.constant 0 : index
    %c0_75 = arith.constant 0 : index
    %c0_76 = arith.constant 0 : index
    %175 = vector.load %arg13[%c0_74, %c0_75, %c0_76] : memref<2x1x2xf32, #tpu.memory_space<vmem>>, vector<1x1x2xf32>
    %176 = vector.shape_cast %175 : vector<1x1x2xf32> to vector<1x2xf32>
    %177 = vector.broadcast %176 : vector<1x2xf32> to vector<16x2xf32>
    %178 = arith.addf %174, %177 : vector<16x2xf32>
    %179 = vector.extract_strided_slice %178 {offsets = [0, 0], sizes = [16, 1], strides = [1, 1]} : vector<16x2xf32> to vector<16x1xf32>
    %180 = vector.extract_strided_slice %178 {offsets = [0, 1], sizes = [16, 1], strides = [1, 1]} : vector<16x2xf32> to vector<16x1xf32>
    %c0_77 = arith.constant 0 : index
    %c0_78 = arith.constant 0 : index
    %c0_79 = arith.constant 0 : index
    %181 = vector.load %arg3[%c0_77, %c0_78, %c0_79] : memref<2x16x1xf32, #tpu.memory_space<vmem>>, vector<1x16x1xf32>
    %182 = vector.shape_cast %181 : vector<1x16x1xf32> to vector<16x1xf32>
    %cst_80 = arith.constant 5.000000e-01 : f32
    %183 = vector.broadcast %cst_80 : f32 to vector<16x1xf32>
    %184 = arith.mulf %183, %180 : vector<16x1xf32>
    %185 = math.exp %184 : vector<16x1xf32>
    %186 = arith.mulf %182, %185 : vector<16x1xf32>
    %187 = arith.addf %186, %179 : vector<16x1xf32>
    %cst_81 = arith.constant 0.000000e+00 : f32
    %188 = vector.broadcast %cst_81 : f32 to vector<16x125xf32>
    %189 = tpu.concatenate %179, %180, %187, %188 in 1 : vector<16x1xf32>, vector<16x1xf32>, vector<16x1xf32>, vector<16x125xf32> -> vector<16x128xf32>
    %c0_82 = arith.constant 0 : index
    %c0_83 = arith.constant 0 : index
    %c0_84 = arith.constant 0 : index
    %190 = vector.load %arg14[%c0_82, %c0_83, %c0_84] : memref<2x16x128xf32, #tpu.memory_space<vmem>>, vector<1x16x128xf32>
    %191 = vector.shape_cast %190 : vector<1x16x128xf32> to vector<16x128xf32>
    %192 = vector.shape_cast %189 : vector<16x128xf32> to vector<1x16x128xf32>
    tpu.vector_store %arg14[%c0_82, %c0_83, %c0_84], %192 {strides = array<i32>} : memref<2x16x128xf32, #tpu.memory_space<vmem>>, vector<1x16x128xf32>,
    %c16 = arith.constant 16 : index
    %c0_85 = arith.constant 0 : index
    %193 = vector.load %arg15[%c16, %c0_85] : memref<32x1xf32, #tpu.memory_space<vmem>>, vector<16x1xf32>
    tpu.vector_store %arg15[%c16, %c0_85], %187 {strides = array<i32>} : memref<32x1xf32, #tpu.memory_space<vmem>>, vector<16x1xf32>,
    %c0_86 = arith.constant 0 : index
    %c0_87 = arith.constant 0 : index
    %194 = vector.load %arg15[%c0_86, %c0_87] : memref<32x1xf32, #tpu.memory_space<vmem>>, vector<16x1xf32>
    %c8_88 = arith.constant 8 : index
    %c0_89 = arith.constant 0 : index
    %195 = vector.load %arg15[%c8_88, %c0_89] : memref<32x1xf32, #tpu.memory_space<vmem>>, vector<16x1xf32>
    %c4_90 = arith.constant 4 : index
    %c0_91 = arith.constant 0 : index
    %196 = vector.load %arg15[%c4_90, %c0_91] : memref<32x1xf32, #tpu.memory_space<vmem>>, vector<16x1xf32>
    %c12_92 = arith.constant 12 : index
    %c0_93 = arith.constant 0 : index
    %197 = vector.load %arg15[%c12_92, %c0_93] : memref<32x1xf32, #tpu.memory_space<vmem>>, vector<16x1xf32>
    %c2_94 = arith.constant 2 : index
    %c0_95 = arith.constant 0 : index
    %198 = vector.load %arg15[%c2_94, %c0_95] : memref<32x1xf32, #tpu.memory_space<vmem>>, vector<16x1xf32>
    %c10_96 = arith.constant 10 : index
    %c0_97 = arith.constant 0 : index
    %199 = vector.load %arg15[%c10_96, %c0_97] : memref<32x1xf32, #tpu.memory_space<vmem>>, vector<16x1xf32>
    %c6_98 = arith.constant 6 : index
    %c0_99 = arith.constant 0 : index
    %200 = vector.load %arg15[%c6_98, %c0_99] : memref<32x1xf32, #tpu.memory_space<vmem>>, vector<16x1xf32>
    %c14_100 = arith.constant 14 : index
    %c0_101 = arith.constant 0 : index
    %201 = vector.load %arg15[%c14_100, %c0_101] : memref<32x1xf32, #tpu.memory_space<vmem>>, vector<16x1xf32>
    %202 = vector.shape_cast %194 : vector<16x1xf32> to vector<1x16x1xf32>
    %203 = vector.shape_cast %195 : vector<16x1xf32> to vector<1x16x1xf32>
    %204 = vector.shape_cast %196 : vector<16x1xf32> to vector<1x16x1xf32>
    %205 = vector.shape_cast %197 : vector<16x1xf32> to vector<1x16x1xf32>
    %206 = vector.shape_cast %198 : vector<16x1xf32> to vector<1x16x1xf32>
    %207 = vector.shape_cast %199 : vector<16x1xf32> to vector<1x16x1xf32>
    %208 = vector.shape_cast %200 : vector<16x1xf32> to vector<1x16x1xf32>
    %209 = vector.shape_cast %201 : vector<16x1xf32> to vector<1x16x1xf32>
    %210 = tpu.concatenate %202, %203, %204, %205, %206, %207, %208, %209 in 0 : vector<1x16x1xf32>, vector<1x16x1xf32>, vector<1x16x1xf32>, vector<1x16x1xf32>, vector<1x16x1xf32>, vector<1x16x1xf32>, vector<1x16x1xf32>, vector<1x16x1xf32> -> vector<8x16x1xf32>
    %c1_102 = arith.constant 1 : index
    %c0_103 = arith.constant 0 : index
    %211 = vector.load %arg15[%c1_102, %c0_103] : memref<32x1xf32, #tpu.memory_space<vmem>>, vector<16x1xf32>
    %c9_104 = arith.constant 9 : index
    %c0_105 = arith.constant 0 : index
    %212 = vector.load %arg15[%c9_104, %c0_105] : memref<32x1xf32, #tpu.memory_space<vmem>>, vector<16x1xf32>
    %c5_106 = arith.constant 5 : index
    %c0_107 = arith.constant 0 : index
    %213 = vector.load %arg15[%c5_106, %c0_107] : memref<32x1xf32, #tpu.memory_space<vmem>>, vector<16x1xf32>
    %c13_108 = arith.constant 13 : index
    %c0_109 = arith.constant 0 : index
    %214 = vector.load %arg15[%c13_108, %c0_109] : memref<32x1xf32, #tpu.memory_space<vmem>>, vector<16x1xf32>
    %c3_110 = arith.constant 3 : index
    %c0_111 = arith.constant 0 : index
    %215 = vector.load %arg15[%c3_110, %c0_111] : memref<32x1xf32, #tpu.memory_space<vmem>>, vector<16x1xf32>
    %c11_112 = arith.constant 11 : index
    %c0_113 = arith.constant 0 : index
    %216 = vector.load %arg15[%c11_112, %c0_113] : memref<32x1xf32, #tpu.memory_space<vmem>>, vector<16x1xf32>
    %c7_114 = arith.constant 7 : index
    %c0_115 = arith.constant 0 : index
    %217 = vector.load %arg15[%c7_114, %c0_115] : memref<32x1xf32, #tpu.memory_space<vmem>>, vector<16x1xf32>
    %c15_116 = arith.constant 15 : index
    %c0_117 = arith.constant 0 : index
    %218 = vector.load %arg15[%c15_116, %c0_117] : memref<32x1xf32, #tpu.memory_space<vmem>>, vector<16x1xf32>
    %219 = vector.shape_cast %211 : vector<16x1xf32> to vector<1x16x1xf32>
    %220 = vector.shape_cast %212 : vector<16x1xf32> to vector<1x16x1xf32>
    %221 = vector.shape_cast %213 : vector<16x1xf32> to vector<1x16x1xf32>
    %222 = vector.shape_cast %214 : vector<16x1xf32> to vector<1x16x1xf32>
    %223 = vector.shape_cast %215 : vector<16x1xf32> to vector<1x16x1xf32>
    %224 = vector.shape_cast %216 : vector<16x1xf32> to vector<1x16x1xf32>
    %225 = vector.shape_cast %217 : vector<16x1xf32> to vector<1x16x1xf32>
    %226 = vector.shape_cast %218 : vector<16x1xf32> to vector<1x16x1xf32>
    %227 = tpu.concatenate %219, %220, %221, %222, %223, %224, %225, %226 in 0 : vector<1x16x1xf32>, vector<1x16x1xf32>, vector<1x16x1xf32>, vector<1x16x1xf32>, vector<1x16x1xf32>, vector<1x16x1xf32>, vector<1x16x1xf32>, vector<1x16x1xf32> -> vector<8x16x1xf32>
    %228 = vector.extract_strided_slice %21 {offsets = [0, 512], sizes = [16, 48], strides = [1, 1]} : vector<16x1024xf32> to vector<16x48xf32>
    %c1_118 = arith.constant 1 : index
    %c0_119 = arith.constant 0 : index
    %c0_120 = arith.constant 0 : index
    %c0_121 = arith.constant 0 : index
    %229 = vector.load %arg8[%c1_118, %c0_119, %c0_120, %c0_121] : memref<2x2x1x48xf32, #tpu.memory_space<vmem>>, vector<1x1x1x48xf32>
    %230 = vector.shape_cast %229 : vector<1x1x1x48xf32> to vector<1x48xf32>
    %231 = vector.shape_cast %230 : vector<1x48xf32> to vector<1x1x48xf32>
    %232 = vector.broadcast %210 : vector<8x16x1xf32> to vector<8x16x48xf32>
    %233 = vector.broadcast %231 : vector<1x1x48xf32> to vector<8x16x48xf32>
    %234 = arith.mulf %232, %233 : vector<8x16x48xf32>
    %c1_122 = arith.constant 1 : index
    %c1_123 = arith.constant 1 : index
    %c0_124 = arith.constant 0 : index
    %c0_125 = arith.constant 0 : index
    %235 = vector.load %arg8[%c1_122, %c1_123, %c0_124, %c0_125] : memref<2x2x1x48xf32, #tpu.memory_space<vmem>>, vector<1x1x1x48xf32>
    %236 = vector.shape_cast %235 : vector<1x1x1x48xf32> to vector<1x48xf32>
    %237 = vector.shape_cast %236 : vector<1x48xf32> to vector<1x1x48xf32>
    %238 = vector.broadcast %227 : vector<8x16x1xf32> to vector<8x16x48xf32>
    %239 = vector.broadcast %237 : vector<1x1x48xf32> to vector<8x16x48xf32>
    %240 = arith.mulf %238, %239 : vector<8x16x48xf32>
    %241 = arith.addf %234, %240 : vector<8x16x48xf32>
    %242 = vector.shape_cast %228 : vector<16x48xf32> to vector<1x16x48xf32>
    %243 = vector.broadcast %242 : vector<1x16x48xf32> to vector<8x16x48xf32>
    %244 = arith.addf %241, %243 : vector<8x16x48xf32>
    %245 = vector.extract_strided_slice %244 {offsets = [0, 0, 0], sizes = [8, 16, 16], strides = [1, 1, 1]} : vector<8x16x48xf32> to vector<8x16x16xf32>
    %246 = math.tanh %245 : vector<8x16x16xf32>
    %247 = vector.extract_strided_slice %244 {offsets = [0, 0, 16], sizes = [8, 16, 16], strides = [1, 1, 1]} : vector<8x16x48xf32> to vector<8x16x16xf32>
    %248 = arith.negf %247 : vector<8x16x16xf32>
    %249 = math.exp %248 : vector<8x16x16xf32>
    %cst_126 = arith.constant 1.000000e+00 : f32
    %250 = vector.broadcast %cst_126 : f32 to vector<8x16x16xf32>
    %251 = arith.addf %250, %249 : vector<8x16x16xf32>
    %252 = arith.divf %250, %251 : vector<8x16x16xf32>
    %253 = arith.mulf %246, %252 : vector<8x16x16xf32>
    %254 = vector.extract_strided_slice %244 {offsets = [0, 0, 32], sizes = [8, 16, 16], strides = [1, 1, 1]} : vector<8x16x48xf32> to vector<8x16x16xf32>
    %255 = arith.addf %253, %254 : vector<8x16x16xf32>
    %cst_127 = arith.constant 0.707106769 : f32
    %256 = vector.broadcast %cst_127 : f32 to vector<8x16x16xf32>
    %257 = arith.mulf %255, %256 : vector<8x16x16xf32>
    %258 = vector.extract_strided_slice %257 {offsets = [0, 0, 0], sizes = [4, 16, 16], strides = [1, 1, 1]} : vector<8x16x16xf32> to vector<4x16x16xf32>
    %259 = vector.extract_strided_slice %257 {offsets = [4, 0, 0], sizes = [4, 16, 16], strides = [1, 1, 1]} : vector<8x16x16xf32> to vector<4x16x16xf32>
    %260 = tpu.concatenate %258, %259 in 2 : vector<4x16x16xf32>, vector<4x16x16xf32> -> vector<4x16x32xf32>
    %261 = vector.shape_cast %260 : vector<4x16x32xf32> to vector<64x32xf32>
    %c1_128 = arith.constant 1 : index
    %c0_129 = arith.constant 0 : index
    %c0_130 = arith.constant 0 : index
    %c0_131 = arith.constant 0 : index
    %262 = vector.load %arg9[%c1_128, %c0_129, %c0_130, %c0_131] : memref<2x3x32x48xf32, #tpu.memory_space<vmem>>, vector<1x1x32x48xf32>
    %263 = vector.shape_cast %262 : vector<1x1x32x48xf32> to vector<32x48xf32>
    %cst_132 = arith.constant dense<0.000000e+00> : vector<64x48xf32>
    %264 = tpu.matmul %261, %263, %cst_132 {dimension_numbers = #tpu.dot_dimension_numbers<[1], [0], [0], [1], [0, 0, 1, 1], [], []>} : vector<64x32xf32>, vector<32x48xf32>, vector<64x48xf32> -> vector<64x48xf32>
    %265 = vector.shape_cast %264 : vector<64x48xf32> to vector<4x16x48xf32>
    %266 = vector.extract_strided_slice %21 {offsets = [0, 640], sizes = [16, 48], strides = [1, 1]} : vector<16x1024xf32> to vector<16x48xf32>
    %267 = vector.shape_cast %266 : vector<16x48xf32> to vector<1x16x48xf32>
    %268 = vector.broadcast %267 : vector<1x16x48xf32> to vector<4x16x48xf32>
    %269 = arith.addf %265, %268 : vector<4x16x48xf32>
    %270 = vector.extract_strided_slice %269 {offsets = [0, 0, 0], sizes = [4, 16, 16], strides = [1, 1, 1]} : vector<4x16x48xf32> to vector<4x16x16xf32>
    %271 = math.tanh %270 : vector<4x16x16xf32>
    %272 = vector.extract_strided_slice %269 {offsets = [0, 0, 16], sizes = [4, 16, 16], strides = [1, 1, 1]} : vector<4x16x48xf32> to vector<4x16x16xf32>
    %273 = arith.negf %272 : vector<4x16x16xf32>
    %274 = math.exp %273 : vector<4x16x16xf32>
    %cst_133 = arith.constant 1.000000e+00 : f32
    %275 = vector.broadcast %cst_133 : f32 to vector<4x16x16xf32>
    %276 = arith.addf %275, %274 : vector<4x16x16xf32>
    %277 = arith.divf %275, %276 : vector<4x16x16xf32>
    %278 = arith.mulf %271, %277 : vector<4x16x16xf32>
    %279 = vector.extract_strided_slice %269 {offsets = [0, 0, 32], sizes = [4, 16, 16], strides = [1, 1, 1]} : vector<4x16x48xf32> to vector<4x16x16xf32>
    %280 = arith.addf %278, %279 : vector<4x16x16xf32>
    %cst_134 = arith.constant 0.707106769 : f32
    %281 = vector.broadcast %cst_134 : f32 to vector<4x16x16xf32>
    %282 = arith.mulf %280, %281 : vector<4x16x16xf32>
    %283 = vector.extract_strided_slice %282 {offsets = [0, 0, 0], sizes = [2, 16, 16], strides = [1, 1, 1]} : vector<4x16x16xf32> to vector<2x16x16xf32>
    %284 = vector.extract_strided_slice %282 {offsets = [2, 0, 0], sizes = [2, 16, 16], strides = [1, 1, 1]} : vector<4x16x16xf32> to vector<2x16x16xf32>
    %285 = tpu.concatenate %283, %284 in 2 : vector<2x16x16xf32>, vector<2x16x16xf32> -> vector<2x16x32xf32>
    %286 = vector.shape_cast %285 : vector<2x16x32xf32> to vector<32x32xf32>
    %c1_135 = arith.constant 1 : index
    %c1_136 = arith.constant 1 : index
    %c0_137 = arith.constant 0 : index
    %c0_138 = arith.constant 0 : index
    %287 = vector.load %arg9[%c1_135, %c1_136, %c0_137, %c0_138] : memref<2x3x32x48xf32, #tpu.memory_space<vmem>>, vector<1x1x32x48xf32>
    %288 = vector.shape_cast %287 : vector<1x1x32x48xf32> to vector<32x48xf32>
    %cst_139 = arith.constant dense<0.000000e+00> : vector<32x48xf32>
    %289 = tpu.matmul %286, %288, %cst_139 {dimension_numbers = #tpu.dot_dimension_numbers<[1], [0], [0], [1], [0, 0, 1, 1], [], []>} : vector<32x32xf32>, vector<32x48xf32>, vector<32x48xf32> -> vector<32x48xf32>
    %290 = vector.shape_cast %289 : vector<32x48xf32> to vector<2x16x48xf32>
    %291 = vector.extract_strided_slice %21 {offsets = [0, 768], sizes = [16, 48], strides = [1, 1]} : vector<16x1024xf32> to vector<16x48xf32>
    %292 = vector.shape_cast %291 : vector<16x48xf32> to vector<1x16x48xf32>
    %293 = vector.broadcast %292 : vector<1x16x48xf32> to vector<2x16x48xf32>
    %294 = arith.addf %290, %293 : vector<2x16x48xf32>
    %295 = vector.extract_strided_slice %294 {offsets = [0, 0, 0], sizes = [2, 16, 16], strides = [1, 1, 1]} : vector<2x16x48xf32> to vector<2x16x16xf32>
    %296 = math.tanh %295 : vector<2x16x16xf32>
    %297 = vector.extract_strided_slice %294 {offsets = [0, 0, 16], sizes = [2, 16, 16], strides = [1, 1, 1]} : vector<2x16x48xf32> to vector<2x16x16xf32>
    %298 = arith.negf %297 : vector<2x16x16xf32>
    %299 = math.exp %298 : vector<2x16x16xf32>
    %cst_140 = arith.constant 1.000000e+00 : f32
    %300 = vector.broadcast %cst_140 : f32 to vector<2x16x16xf32>
    %301 = arith.addf %300, %299 : vector<2x16x16xf32>
    %302 = arith.divf %300, %301 : vector<2x16x16xf32>
    %303 = arith.mulf %296, %302 : vector<2x16x16xf32>
    %304 = vector.extract_strided_slice %294 {offsets = [0, 0, 32], sizes = [2, 16, 16], strides = [1, 1, 1]} : vector<2x16x48xf32> to vector<2x16x16xf32>
    %305 = arith.addf %303, %304 : vector<2x16x16xf32>
    %cst_141 = arith.constant 0.707106769 : f32
    %306 = vector.broadcast %cst_141 : f32 to vector<2x16x16xf32>
    %307 = arith.mulf %305, %306 : vector<2x16x16xf32>
    %308 = vector.extract_strided_slice %307 {offsets = [0, 0, 0], sizes = [1, 16, 16], strides = [1, 1, 1]} : vector<2x16x16xf32> to vector<1x16x16xf32>
    %309 = vector.extract_strided_slice %307 {offsets = [1, 0, 0], sizes = [1, 16, 16], strides = [1, 1, 1]} : vector<2x16x16xf32> to vector<1x16x16xf32>
    %310 = tpu.concatenate %308, %309 in 2 : vector<1x16x16xf32>, vector<1x16x16xf32> -> vector<1x16x32xf32>
    %311 = vector.shape_cast %310 : vector<1x16x32xf32> to vector<16x32xf32>
    %c1_142 = arith.constant 1 : index
    %c2_143 = arith.constant 2 : index
    %c0_144 = arith.constant 0 : index
    %c0_145 = arith.constant 0 : index
    %312 = vector.load %arg9[%c1_142, %c2_143, %c0_144, %c0_145] : memref<2x3x32x48xf32, #tpu.memory_space<vmem>>, vector<1x1x32x48xf32>
    %313 = vector.shape_cast %312 : vector<1x1x32x48xf32> to vector<32x48xf32>
    %cst_146 = arith.constant dense<0.000000e+00> : vector<16x48xf32>
    %314 = tpu.matmul %311, %313, %cst_146 {dimension_numbers = #tpu.dot_dimension_numbers<[1], [0], [0], [1], [0, 0, 1, 1], [], []>} : vector<16x32xf32>, vector<32x48xf32>, vector<16x48xf32> -> vector<16x48xf32>
    %315 = vector.shape_cast %314 : vector<16x48xf32> to vector<1x16x48xf32>
    %316 = vector.extract_strided_slice %21 {offsets = [0, 896], sizes = [16, 48], strides = [1, 1]} : vector<16x1024xf32> to vector<16x48xf32>
    %317 = vector.shape_cast %316 : vector<16x48xf32> to vector<1x16x48xf32>
    %318 = arith.addf %315, %317 : vector<1x16x48xf32>
    %319 = vector.extract_strided_slice %318 {offsets = [0, 0, 0], sizes = [1, 16, 16], strides = [1, 1, 1]} : vector<1x16x48xf32> to vector<1x16x16xf32>
    %320 = math.tanh %319 : vector<1x16x16xf32>
    %321 = vector.extract_strided_slice %318 {offsets = [0, 0, 16], sizes = [1, 16, 16], strides = [1, 1, 1]} : vector<1x16x48xf32> to vector<1x16x16xf32>
    %322 = arith.negf %321 : vector<1x16x16xf32>
    %323 = math.exp %322 : vector<1x16x16xf32>
    %cst_147 = arith.constant 1.000000e+00 : f32
    %324 = vector.broadcast %cst_147 : f32 to vector<1x16x16xf32>
    %325 = arith.addf %324, %323 : vector<1x16x16xf32>
    %326 = arith.divf %324, %325 : vector<1x16x16xf32>
    %327 = arith.mulf %320, %326 : vector<1x16x16xf32>
    %328 = vector.extract_strided_slice %318 {offsets = [0, 0, 32], sizes = [1, 16, 16], strides = [1, 1, 1]} : vector<1x16x48xf32> to vector<1x16x16xf32>
    %329 = arith.addf %327, %328 : vector<1x16x16xf32>
    %cst_148 = arith.constant 0.707106769 : f32
    %330 = vector.broadcast %cst_148 : f32 to vector<1x16x16xf32>
    %331 = arith.mulf %329, %330 : vector<1x16x16xf32>
    %332 = vector.shape_cast %331 : vector<1x16x16xf32> to vector<16x16xf32>
    %c1_149 = arith.constant 1 : index
    %c0_150 = arith.constant 0 : index
    %c0_151 = arith.constant 0 : index
    %333 = vector.load %arg10[%c1_149, %c0_150, %c0_151] : memref<2x16x32xf32, #tpu.memory_space<vmem>>, vector<1x16x32xf32>
    %334 = vector.shape_cast %333 : vector<1x16x32xf32> to vector<16x32xf32>
    %cst_152 = arith.constant dense<0.000000e+00> : vector<16x32xf32>
    %335 = tpu.matmul %332, %334, %cst_152 {dimension_numbers = #tpu.dot_dimension_numbers<[1], [0], [0], [1], [0, 0, 1, 1], [], []>} : vector<16x16xf32>, vector<16x32xf32>, vector<16x32xf32> -> vector<16x32xf32>
    %c1_153 = arith.constant 1 : index
    %c0_154 = arith.constant 0 : index
    %c0_155 = arith.constant 0 : index
    %336 = vector.load %arg11[%c1_153, %c0_154, %c0_155] : memref<2x1x32xf32, #tpu.memory_space<vmem>>, vector<1x1x32xf32>
    %337 = vector.shape_cast %336 : vector<1x1x32xf32> to vector<1x32xf32>
    %338 = vector.broadcast %337 : vector<1x32xf32> to vector<16x32xf32>
    %339 = arith.addf %335, %338 : vector<16x32xf32>
    %cst_156 = arith.constant 0.000000e+00 : f32
    %340 = vector.broadcast %cst_156 : f32 to vector<16x32xf32>
    %341 = arith.maximumf %339, %340 : vector<16x32xf32>
    %c1_157 = arith.constant 1 : index
    %c0_158 = arith.constant 0 : index
    %c0_159 = arith.constant 0 : index
    %342 = vector.load %arg12[%c1_157, %c0_158, %c0_159] : memref<2x32x2xf32, #tpu.memory_space<vmem>>, vector<1x32x2xf32>
    %343 = vector.shape_cast %342 : vector<1x32x2xf32> to vector<32x2xf32>
    %cst_160 = arith.constant dense<0.000000e+00> : vector<16x2xf32>
    %344 = tpu.matmul %341, %343, %cst_160 {dimension_numbers = #tpu.dot_dimension_numbers<[1], [0], [0], [1], [0, 0, 1, 1], [], []>} : vector<16x32xf32>, vector<32x2xf32>, vector<16x2xf32> -> vector<16x2xf32>
    %c1_161 = arith.constant 1 : index
    %c0_162 = arith.constant 0 : index
    %c0_163 = arith.constant 0 : index
    %345 = vector.load %arg13[%c1_161, %c0_162, %c0_163] : memref<2x1x2xf32, #tpu.memory_space<vmem>>, vector<1x1x2xf32>
    %346 = vector.shape_cast %345 : vector<1x1x2xf32> to vector<1x2xf32>
    %347 = vector.broadcast %346 : vector<1x2xf32> to vector<16x2xf32>
    %348 = arith.addf %344, %347 : vector<16x2xf32>
    %349 = vector.extract_strided_slice %348 {offsets = [0, 0], sizes = [16, 1], strides = [1, 1]} : vector<16x2xf32> to vector<16x1xf32>
    %350 = vector.extract_strided_slice %348 {offsets = [0, 1], sizes = [16, 1], strides = [1, 1]} : vector<16x2xf32> to vector<16x1xf32>
    %c1_164 = arith.constant 1 : index
    %c0_165 = arith.constant 0 : index
    %c0_166 = arith.constant 0 : index
    %351 = vector.load %arg3[%c1_164, %c0_165, %c0_166] : memref<2x16x1xf32, #tpu.memory_space<vmem>>, vector<1x16x1xf32>
    %352 = vector.shape_cast %351 : vector<1x16x1xf32> to vector<16x1xf32>
    %cst_167 = arith.constant 5.000000e-01 : f32
    %353 = vector.broadcast %cst_167 : f32 to vector<16x1xf32>
    %354 = arith.mulf %353, %350 : vector<16x1xf32>
    %355 = math.exp %354 : vector<16x1xf32>
    %356 = arith.mulf %352, %355 : vector<16x1xf32>
    %357 = arith.addf %356, %349 : vector<16x1xf32>
    %cst_168 = arith.constant 0.000000e+00 : f32
    %358 = vector.broadcast %cst_168 : f32 to vector<16x125xf32>
    %359 = tpu.concatenate %349, %350, %357, %358 in 1 : vector<16x1xf32>, vector<16x1xf32>, vector<16x1xf32>, vector<16x125xf32> -> vector<16x128xf32>
    %c1_169 = arith.constant 1 : index
    %c0_170 = arith.constant 0 : index
    %c0_171 = arith.constant 0 : index
    %360 = vector.load %arg14[%c1_169, %c0_170, %c0_171] : memref<2x16x128xf32, #tpu.memory_space<vmem>>, vector<1x16x128xf32>
    %361 = vector.shape_cast %360 : vector<1x16x128xf32> to vector<16x128xf32>
    %362 = vector.shape_cast %359 : vector<16x128xf32> to vector<1x16x128xf32>
    tpu.vector_store %arg14[%c1_169, %c0_170, %c0_171], %362 {strides = array<i32>} : memref<2x16x128xf32, #tpu.memory_space<vmem>>, vector<1x16x128xf32>,
    return
  }
  func.func @transform_0(%arg0: i32) -> (i32, i32) {
    %c0_i32 = arith.constant 0 : i32
    %c0_i32_0 = arith.constant 0 : i32
    %c0_i32_1 = arith.constant 0 : i32
    return %c0_i32, %c0_i32_0 : i32, i32
  }
  func.func @transform_1(%arg0: i32) -> (i32, i32) {
    %c0_i32 = arith.constant 0 : i32
    %c0_i32_0 = arith.constant 0 : i32
    %c0_i32_1 = arith.constant 0 : i32
    return %c0_i32, %c0_i32_0 : i32, i32
  }
  func.func @transform_2(%arg0: i32) -> (i32, i32, i32) {
    %c0_i32 = arith.constant 0 : i32
    %c0_i32_0 = arith.constant 0 : i32
    %c0_i32_1 = arith.constant 0 : i32
    %c0_i32_2 = arith.constant 0 : i32
    return %c0_i32, %c0_i32_0, %c0_i32_1 : i32, i32, i32
  }
  func.func @transform_3(%arg0: i32) -> (i32, i32) {
    %c0_i32 = arith.constant 0 : i32
    %c0_i32_0 = arith.constant 0 : i32
    %c0_i32_1 = arith.constant 0 : i32
    return %c0_i32, %c0_i32_0 : i32, i32
  }
  func.func @transform_4(%arg0: i32) -> (i32, i32) {
    %c0_i32 = arith.constant 0 : i32
    %c0_i32_0 = arith.constant 0 : i32
    %c0_i32_1 = arith.constant 0 : i32
    return %c0_i32, %c0_i32_0 : i32, i32
  }
  func.func @transform_5(%arg0: i32) -> (i32, i32) {
    %c0_i32 = arith.constant 0 : i32
    %c0_i32_0 = arith.constant 0 : i32
    %c0_i32_1 = arith.constant 0 : i32
    return %c0_i32, %c0_i32_0 : i32, i32
  }
  func.func @transform_6(%arg0: i32) -> (i32, i32) {
    %c0_i32 = arith.constant 0 : i32
    %c0_i32_0 = arith.constant 0 : i32
    %c0_i32_1 = arith.constant 0 : i32
    return %c0_i32, %c0_i32_0 : i32, i32
  }
  func.func @transform_7(%arg0: i32) -> (i32, i32, i32, i32) {
    %c0_i32 = arith.constant 0 : i32
    %c0_i32_0 = arith.constant 0 : i32
    %c0_i32_1 = arith.constant 0 : i32
    %c0_i32_2 = arith.constant 0 : i32
    %c0_i32_3 = arith.constant 0 : i32
    return %c0_i32, %c0_i32_0, %c0_i32_1, %c0_i32_2 : i32, i32, i32, i32
  }
  func.func @transform_8(%arg0: i32) -> (i32, i32, i32, i32) {
    %c0_i32 = arith.constant 0 : i32
    %c0_i32_0 = arith.constant 0 : i32
    %c0_i32_1 = arith.constant 0 : i32
    %c0_i32_2 = arith.constant 0 : i32
    %c0_i32_3 = arith.constant 0 : i32
    return %c0_i32, %c0_i32_0, %c0_i32_1, %c0_i32_2 : i32, i32, i32, i32
  }
  func.func @transform_9(%arg0: i32) -> (i32, i32, i32) {
    %c0_i32 = arith.constant 0 : i32
    %c0_i32_0 = arith.constant 0 : i32
    %c0_i32_1 = arith.constant 0 : i32
    %c0_i32_2 = arith.constant 0 : i32
    return %c0_i32, %c0_i32_0, %c0_i32_1 : i32, i32, i32
  }
  func.func @transform_10(%arg0: i32) -> (i32, i32, i32) {
    %c0_i32 = arith.constant 0 : i32
    %c0_i32_0 = arith.constant 0 : i32
    %c0_i32_1 = arith.constant 0 : i32
    %c0_i32_2 = arith.constant 0 : i32
    return %c0_i32, %c0_i32_0, %c0_i32_1 : i32, i32, i32
  }
  func.func @transform_11(%arg0: i32) -> (i32, i32, i32) {
    %c0_i32 = arith.constant 0 : i32
    %c0_i32_0 = arith.constant 0 : i32
    %c0_i32_1 = arith.constant 0 : i32
    %c0_i32_2 = arith.constant 0 : i32
    return %c0_i32, %c0_i32_0, %c0_i32_1 : i32, i32, i32
  }
  func.func @transform_12(%arg0: i32) -> (i32, i32, i32) {
    %c0_i32 = arith.constant 0 : i32
    %c0_i32_0 = arith.constant 0 : i32
    %c0_i32_1 = arith.constant 0 : i32
    %c0_i32_2 = arith.constant 0 : i32
    return %c0_i32, %c0_i32_0, %c0_i32_1 : i32, i32, i32
  }
  func.func @transform_13(%arg0: i32) -> (i32, i32, i32) {
    %c0_i32 = arith.constant 0 : i32
    %c0_i32_0 = arith.constant 0 : i32
    %c0_i32_1 = arith.constant 0 : i32
    %c0_i32_2 = arith.constant 0 : i32
    return %c0_i32, %c0_i32_0, %c0_i32_1 : i32, i32, i32
  }
}

</mosaic_0001>

<bundles_post_ra>
// kernel: tpu_custom_call.1
= control target key start
LH: loop header
LB: loop body
LE: loop exit
PB: predicated region body
PF: predicated region fallthrough
CT: control target
= control target key end

     0   :  { %18 = vsyncpa [#allocation4], 0  ;;  %s5329_s0 = inlined_call_operand.vmem [shape: f32[4,8], index: 0, kind: input, shape index: {}]   ;;  %s5330_s1 = inlined_call_operand.vmem [shape: f32[32,1], index: 1, kind: input, shape index: {}]   ;;  %s5331_s2 = inlined_call_operand.vmem [shape: f32[2,16,1], index: 2, kind: input, shape index: {}]   ;;  %s5332_s3 = inlined_call_operand.vmem [shape: f32[8,32], index: 3, kind: input, shape index: {}]   ;;  %s5333_s4 = inlined_call_operand.vmem [shape: f32[1,32], index: 4, kind: input, shape index: {}]   ;;  %s5334_s5 = inlined_call_operand.vmem [shape: f32[8,1024], index: 5, kind: input, shape index: {}]   ;;  %s5335_s6 = inlined_call_operand.vmem [shape: f32[1,1024], index: 6, kind: input, shape index: {}]   ;;  %s5336_s7 = inlined_call_operand.vmem [shape: f32[2,2,1,48], index: 7, kind: input, shape index: {}]   ;;  %s5337_s8 = inlined_call_operand.hbm [shape: f32[2,3,32,48], index: 8, kind: input, shape index: {}]   ;;  %s5338_s9 = inlined_call_operand.vmem [shape: f32[2,16,32], index: 9, kind: input, shape index: {}]   ;;  %s5339_s10 = inlined_call_operand.vmem [shape: f32[2,1,32], index: 10, kind: input, shape index: {}]   ;;  %s5340_s11 = inlined_call_operand.vmem [shape: f32[2,32,2], index: 11, kind: input, shape index: {}]   ;;  %s5341_s12 = inlined_call_operand.vmem [shape: f32[2,1,2], index: 12, kind: input, shape index: {}]   ;;  %s5342_s13 = inlined_call_operand.hbm [shape: f32[2,16,128], index: 13, kind: output, shape index: {}]  }
   0x1   :  { %19 = vsyncpa [#allocation5], 0  ;;  %s4324_s25 = smov [#allocation3]   ;;  %s4276_s29 = scalar_lea.hbm %s5337_s8, 3072 }
   0x2   :  { %s41_s26 = sshll.u32 %s4324_s25, 4  ;;  %p4277_p0 = scmp.ne.s32.totalorder %s5337_s8, %s4276_s29  ;;  %s42_s26 = int_to_ptr.vmem [resolvable:$true] %s41_s26 }
   0x3   :  { %p4280_p1 = scmp.lt.u32.totalorder %s4276_s29, %s5337_s8 }
   0x5   :  { %p4282_p2 = pnand %p4280_p1, %p4277_p0 }
   0x7   :  { %4285 = shalt.err (!%p4282_p2)
}
   0x8   :  { %s4286_s17 = scalar_lea.vmem %s42_s26, 3072  ;;  %p4291_p4 = scmp.lt.s32.totalorder %s42_s26, %s42_s26 }
   0x9   :  { %p4287_p3 = scmp.ne.s32.totalorder %s42_s26, %s4286_s17  ;;  %p4292_p5 = scmp.lt.s32.totalorder %s4286_s17, %s4286_s17 }
   0xb   :  { %p4293_p6 = por %p4292_p5, %p4291_p4 }
   0xd   :  { %p4294_p7 = pnand %p4293_p6, %p4287_p3 }
   0xf   :  { %4297 = shalt.err (!%p4294_p7)
}
  0x10   :  { %s4325_s18 = smov 128   ;;  %s4326_s19 = smov 8  }
  0x11   :  { %47 = dma.hbm_to_vmem [thread:$0]  %s5337_s8, 3072, %s42_s26, [#allocation4], %s4325_s18, %s4325_s18, %s4326_s19  }
  0x12   :  { %4320 = dma.done.wait [#allocation4], 3072  }
  0x13   :  { %4321 = vsyncadd [#allocation4], 4294964224  ;;  %v4327_v0 = vmov 0.0   ;;  %vm4328_vm0 = vmmov 0   ;;  %vm68_vm1 = vcmask 64512   ;;  %v60_v1 = vld [vmem:[%s5332_s3] sm:$0xff]  ;;  %v147_v9 = vlaneseq }
  0x14   :  { %3684 = vmatprep.subr.mxu0 %v4327_v0  ;;  %3686 = vmatprep.mubr.msk.f32.mxu0 %vm4328_vm0, %v4327_v0  ;;  %v59_v2 = vld [vmem:[%s5329_s0] sm:$0xf]  ;;  %v4329_v7 = vmov 1966171168   ;;  %v240_v18 = vld [vmem:[%s5334_s5 + $0x8] sm:$0xff]  ;;  %v242_v19 = vld [vmem:[%s5334_s5 + $0x18] sm:$0xff] }
  0x15   :  { %363 = vmatprep.mubr.f32.mxu1 %v4327_v0  ;;  %3685 = vmatpush3.msra.mxu0 %v60_v1  ;;  %v3483_v3 = vld [vmem:[%s5333_s4] ss:$0 sm:$0xff]  ;;  %v145_v8 = vunpack.c.l.s4 %v4329_v7  ;;  %v4438_v11 = vshrl.u32 %v147_v9, 7  ;;  %v241_v23 = vld [vmem:[%s5334_s5 + $0x10] sm:$0xff]  ;;  %s4330_s15 = smov 112   ;;  %s4331_s16 = smov 120  }
  0x16   :  { %3687 = vmatmul.mubr.msk.f32.vlgmr.msra.gmra.mrb[0].mxu0 %vm68_vm1, %v59_v2  ;;  %299 = vmatprep.subr.mxu1 %v240_v18  ;;  %v239_v22 = vld [vmem:[%s5334_s5] sm:$0xff]  ;;  %s4332_s17 = smov 104   ;;  %v608_v26 = vld [vmem:[%s5330_s1 + $0x8] sm:$0xff]  ;;  %vm611_vm2 = vcmask 7168   ;;  %v609_v29 = vld [vmem:[%s5330_s1 + $0x10] sm:$0xff]  ;;  %v4333_v34 = vmov 0  }
  0x17   :  { %440 = vmatprep.mubr.f32.mxu0 %v4327_v0  ;;  %v146_v10 = vunpack.c.0.s8 %v145_v8  ;;  %v4442_v15 = vsub.s32 0, %v4438_v11  ;;  %376 = vmatprep.subr.mxu0 %v242_v19  ;;  %v607_v25 = vld [vmem:[%s5330_s1] sm:$0xff]  ;;  %613 = vst.msk [vmem:[#allocation2 + $0x8] sm:$0xff] %vm611_vm2, %v608_v26  ;;  %v244_v32 = vld [vmem:[%s5334_s5 + $0x28] sm:$0xff]  ;;  %v246_v33 = vld [vmem:[%s5334_s5 + $0x38] sm:$0xff]  ;;  %vm224_vm3 = vcmask 1040384  }
  0x18   :  { %300 = vmatpush1.msra.mxu1 %v239_v22  ;;  %377 = vmatpush1.msra.mxu0 %v241_v23  ;;  %612 = vst.msk [vmem:[#allocation2] sm:$0xff] %vm611_vm2, %v607_v25  ;;  %614 = vst.msk [vmem:[#allocation2 + $0x10] sm:$0xff] %vm611_vm2, %v609_v29  ;;  %v610_v35 = vld [vmem:[%s5330_s1 + $0x18] sm:$0xff]  ;;  %vm229_vm4 = vcmask 1041408   ;;  %vm234_vm5 = vcmask 1042432   ;;  %s4334_s22 = smov 96  }
  0x19   :  { %v149_v12 = vsub.s32 %v146_v10, %v4438_v11  ;;  %453 = vmatprep.subr.mxu1 %v244_v32  ;;  %530 = vmatprep.subr.mxu0 %v246_v33  ;;  %615 = vst.msk [vmem:[#allocation2 + $0x18] sm:$0xff] %vm611_vm2, %v610_v35  ;;  %s4335_s23 = smov 16   ;;  %vm1191_vm6 = vcmask 130048   ;;  %vm1204_vm7 = vcmask 261120   ;;  %s4336_s24 = smov 127   ;;  %vm2030_vm8 = vcmask 15360  }
  0x1a   :  { %3903 = vset.pattern.permute.xlu1 %v4333_v34  ;;  %3902 = vset.pattern.permute.xlu0 %v4333_v34  ;;  %vm2033_vm9 = vcmask 23552  }
  0x1e   :  { %v617_v51 = vld [vmem:[#allocation2 + $0x8] sm:$0xff] }
  0x1f   :  { %v622_v36 = vld [vmem:[#allocation2 + $0x2] sm:$0xff]  ;;  %v635_v38 = vld [vmem:[#allocation2 + $0xb] sm:$0xff] }
  0x20   :  { %v634_v37 = vld [vmem:[#allocation2 + $0x3] sm:$0xff]  ;;  %v636_v40 = vld [vmem:[#allocation2 + $0x13] sm:$0xff] }
  0x21   :  { %v623_v39 = vld [vmem:[#allocation2 + $0xa] sm:$0xff]  ;;  %v624_v41 = vld [vmem:[#allocation2 + $0x12] sm:$0xff]  ;;  %v628_v48 = vld [vmem:[#allocation2 + $0x1] sm:$0xff] }
  0x22   :  { %v637_v42 = vld [vmem:[#allocation2 + $0x7] sm:$0xff]  ;;  %v638_v44 = vld [vmem:[#allocation2 + $0xf] sm:$0xff]  ;;  %v639_v46 = vld [vmem:[#allocation2 + $0x17] sm:$0xff] }
  0x23   :  { %v625_v43 = vld [vmem:[#allocation2 + $0x6] sm:$0xff]  ;;  %v626_v45 = vld [vmem:[#allocation2 + $0xe] sm:$0xff]  ;;  %v627_v47 = vld [vmem:[#allocation2 + $0x16] sm:$0xff] }
  0x24   :  { %v616_v49 = vld [vmem:[#allocation2] sm:$0xff]  ;;  %v629_v50 = vld [vmem:[#allocation2 + $0x9] sm:$0xff]  ;;  %v630_v52 = vld [vmem:[#allocation2 + $0x11] sm:$0xff] }
  0x25   :  { %v618_v53 = vld [vmem:[#allocation2 + $0x10] sm:$0xff]  ;;  %v631_v54 = vld [vmem:[#allocation2 + $0x5] sm:$0xff] }
  0x26   :  { %v619_v55 = vld [vmem:[#allocation2 + $0x4] sm:$0xff]  ;;  %v632_v56 = vld [vmem:[#allocation2 + $0xd] sm:$0xff]  ;;  %v633_v58 = vld [vmem:[#allocation2 + $0x15] sm:$0xff] }
  0x27   :  { %v620_v57 = vld [vmem:[#allocation2 + $0xc] sm:$0xff]  ;;  %v621_v59 = vld [vmem:[#allocation2 + $0x14] sm:$0xff] }
  0xe9   :  { %v138_v4 = vpop.f32.mrb[0].mxu0 }
  0xea   :  { %v139_v5 = vadd.f32 %v3483_v3, %v138_v4  ;;  %v3688_v6 = vpop.f32.mrb[1].mxu0 }
  0xec   :  { %3904 = vtanh.f32 %v139_v5 }
  0xf6   :  { %v3905_v13 = vpop.eup %3904 }
  0xf7   :  { %v150_v14 = vrot.slane %v3905_v13, %v149_v12  ;;  %v243_v13 = vld [vmem:[%s5334_s5 + $0x20] sm:$0xff] }
  0xf9   :  { %v4444_v16 = vrot.slane %v150_v14, %v149_v12  ;;  %v151_v17 = vcombine.high %v150_v14, %v150_v14  ;;  %v245_v14 = vld [vmem:[%s5334_s5 + $0x30] sm:$0xff] }
  0xfb   :  { %v175_v20 = vrot.slane %v4444_v16, %v4442_v15  ;;  %v4454_v21 = vrot.slane %v151_v17, %v149_v12  ;;  %v4474_v27 = vcombine.high %v4444_v16, %v4444_v16 }
  0xfd   :  { %200 = vrot.lane.b32.xlu1 %v175_v20, %s4330_s15  ;;  %188 = vrot.lane.b32.xlu0 %v175_v20, %s4331_s16  ;;  %v179_v24 = vrot.slane %v4454_v21, %v4442_v15  ;;  %v4478_v28 = vcombine.high %v4454_v21, %v4454_v21  ;;  %v183_v30 = vrot.slane %v4474_v27, %v4442_v15 }
  0xff   :  { %v187_v31 = vrot.slane %v4478_v28, %v4442_v15 }
 0x101   :  { %212 = vrot.lane.b32.xlu0 %v175_v20, %s4332_s17  ;;  %202 = vrot.lane.b32.xlu1 %v179_v24, %s4330_s15 }
 0x105   :  { %214 = vrot.lane.b32.xlu1 %v179_v24, %s4332_s17  ;;  %190 = vrot.lane.b32.xlu0 %v179_v24, %s4331_s16 }
 0x109   :  { %192 = vrot.lane.b32.xlu0 %v183_v30, %s4331_s16  ;;  %194 = vrot.lane.b32.xlu1 %v187_v31, %s4331_s16 }
 0x10d   :  { %204 = vrot.lane.b32.xlu0 %v183_v30, %s4330_s15  ;;  %206 = vrot.lane.b32.xlu1 %v187_v31, %s4330_s15 }
 0x111   :  { %216 = vrot.lane.b32.xlu0 %v183_v30, %s4332_s17  ;;  %218 = vrot.lane.b32.xlu1 %v187_v31, %s4332_s17 }
 0x115   :  { %681 = vperm.xlu0 %3902, %v622_v36   ;;  %781 = vperm.xlu1 %3903, %v634_v37  }
 0x119   :  { %786 = vperm.xlu0 %3902, %v635_v38   ;;  %686 = vperm.xlu1 %3903, %v623_v39  }
 0x11d   :  { %790 = vperm.xlu0 %3902, %v635_v38   ;;  %690 = vperm.xlu1 %3903, %v623_v39  }
 0x121   :  { %795 = vperm.xlu0 %3902, %v636_v40   ;;  %695 = vperm.xlu1 %3903, %v624_v41  }
 0x125   :  { %800 = vperm.xlu0 %3902, %v637_v42   ;;  %700 = vperm.xlu1 %3903, %v625_v43  }
 0x129   :  { %805 = vperm.xlu0 %3902, %v638_v44   ;;  %705 = vperm.xlu1 %3903, %v626_v45  }
 0x12d   :  { %809 = vperm.xlu0 %3902, %v638_v44   ;;  %709 = vperm.xlu1 %3903, %v626_v45   ;;  %v4541_v44 = vld [vmem:[%s5336_s7] ss:$0 sm:$0xff]  ;;  %v4546_v45 = vld [vmem:[%s5336_s7 + $0x1] ss:$0 sm:$0xff] }
 0x131   :  { %814 = vperm.xlu0 %3902, %v639_v46   ;;  %714 = vperm.xlu1 %3903, %v627_v47  }
 0x135   :  { %743 = vperm.xlu0 %3902, %v628_v48   ;;  %643 = vperm.xlu1 %3903, %v616_v49   ;;  %v4555_v48 = vld [vmem:[%s5335_s6] sm:$0xff] }
 0x139   :  { %748 = vperm.xlu0 %3902, %v629_v50   ;;  %648 = vperm.xlu1 %3903, %v617_v51  }
 0x13d   :  { %752 = vperm.xlu0 %3902, %v629_v50   ;;  %652 = vperm.xlu1 %3903, %v617_v51  }
 0x141   :  { %757 = vperm.xlu0 %3902, %v630_v52   ;;  %657 = vperm.xlu1 %3903, %v618_v53  }
 0x145   :  { %762 = vperm.xlu0 %3902, %v631_v54   ;;  %662 = vperm.xlu1 %3903, %v619_v55   ;;  %v252_v55 = vrot.slane %v4555_v48, %v4442_v15 }
 0x149   :  { %767 = vperm.xlu0 %3902, %v632_v56   ;;  %667 = vperm.xlu1 %3903, %v620_v57  }
 0x14d   :  { %771 = vperm.xlu0 %3902, %v632_v56   ;;  %671 = vperm.xlu1 %3903, %v620_v57  }
 0x151   :  { %776 = vperm.xlu0 %3902, %v633_v58   ;;  %676 = vperm.xlu1 %3903, %v621_v59  }
 0x16f   :  { %v201_v60 = vpop.permute.xlu1 %200  ;;  %v189_v61 = vpop.permute.xlu0 %188 }
 0x170   :  { %v225_v1 = vsel %vm224_vm3, %v4444_v16, %v189_v61 }
 0x171   :  { %v230_v5 = vsel %vm229_vm4, %v225_v1, %v201_v60 }
 0x173   :  { %v213_v62 = vpop.permute.xlu0 %212  ;;  %v203_v63 = vpop.permute.xlu1 %202 }
 0x174   :  { %v235_v7 = vsel %vm234_vm5, %v230_v5, %v213_v62 }
 0x177   :  { %v215_v2 = vpop.permute.xlu1 %214  ;;  %v191_v3 = vpop.permute.xlu0 %190 }
 0x178   :  { %v226_v4 = vsel %vm224_vm3, %v4454_v21, %v191_v3 }
 0x179   :  { %v231_v6 = vsel %vm229_vm4, %v226_v4, %v203_v63 }
 0x17a   :  { %v236_v8 = vsel %vm234_vm5, %v231_v6, %v215_v2 }
 0x17b   :  { %v293_v9 = vcombine.low %v235_v7, %v236_v8  ;;  %v193_v10 = vpop.permute.xlu0 %192  ;;  %v195_v12 = vpop.permute.xlu1 %194 }
 0x17c   :  { %v227_v18 = vsel %vm224_vm3, %v4474_v27, %v193_v10  ;;  %v228_v19 = vsel %vm224_vm3, %v4478_v28, %v195_v12 }
 0x17d   :  { %3485 = vmatmul.mubr.msk.f32.vlgmr.msra.gmra.mrb[0].mxu1 %vm68_vm1, %v293_v9  ;;  %3487 = vmatmul.mubr.msk.f32.vlgmr.msra.gmra.mrb[2].mxu0 %vm68_vm1, %v293_v9 }
 0x17e   :  { %369 = vmatprep.mubr.f32.mxu1 %v4327_v0  ;;  %446 = vmatprep.mubr.f32.mxu0 %v4327_v0 }
 0x17f   :  { %v205_v16 = vpop.permute.xlu0 %204  ;;  %v207_v17 = vpop.permute.xlu1 %206  ;;  %454 = vmatpush1.msra.mxu1 %v243_v13  ;;  %531 = vmatpush1.msra.mxu0 %v245_v14 }
 0x180   :  { %v232_v20 = vsel %vm229_vm4, %v227_v18, %v205_v16  ;;  %v233_v21 = vsel %vm229_vm4, %v228_v19, %v207_v17 }
 0x183   :  { %v217_v22 = vpop.permute.xlu0 %216  ;;  %v219_v23 = vpop.permute.xlu1 %218 }
 0x184   :  { %v237_v24 = vsel %vm234_vm5, %v232_v20, %v217_v22  ;;  %v238_v25 = vsel %vm234_vm5, %v233_v21, %v219_v23 }
 0x185   :  { %v294_v26 = vcombine.low %v237_v24, %v238_v25 }
 0x187   :  { %3486 = vmatmul.mubr.msk.f32.gmra.mrb[2].mxu1 %vm68_vm1, %v294_v26  ;;  %3488 = vmatmul.mubr.msk.f32.gmra.mrb[4].mxu0 %vm68_vm1, %v294_v26 }
 0x188   :  { %517 = vmatprep.mubr.f32.mxu1 %v4327_v0  ;;  %594 = vmatprep.mubr.f32.mxu0 %v4327_v0 }
 0x18b   :  { %3489 = vmatmul.mubr.msk.f32.vlgmr.msra.gmra.mrb[4].mxu1 %vm68_vm1, %v293_v9  ;;  %3491 = vmatmul.mubr.msk.f32.vlgmr.msra.gmra.mrb[6].mxu0 %vm68_vm1, %v293_v9 }
 0x18c   :  { %523 = vmatprep.mubr.f32.mxu1 %v4327_v0  ;;  %600 = vmatprep.mubr.f32.mxu0 %v4327_v0 }
 0x18f   :  { %3490 = vmatmul.mubr.msk.f32.gmra.mrb[6].mxu1 %vm68_vm1, %v294_v26  ;;  %3492 = vmatmul.mubr.msk.f32.gmra.mrb[8].mxu0 %vm68_vm1, %v294_v26 }
 0x194   :  { %v682_v27 = vpop.permute.xlu0 %681  ;;  %v782_v28 = vpop.permute.xlu1 %781 }
 0x195   :  { %v731_v49 = vmul.f32 %v4541_v44, %v682_v27  ;;  %v831_v50 = vmul.f32 %v4546_v45, %v782_v28 }
 0x197   :  { %v847_v58 = vadd.f32 %v831_v50, %v731_v49 }
 0x198   :  { %v787_v29 = vpop.permute.xlu0 %786  ;;  %v687_v30 = vpop.permute.xlu1 %686 }
 0x199   :  { %v832_v10 = vmul.f32 %v4546_v45, %v787_v29  ;;  %v732_v12 = vmul.f32 %v4541_v44, %v687_v30 }
 0x19b   :  { %v848_v24 = vadd.f32 %v832_v10, %v732_v12 }
 0x19c   :  { %v791_v31 = vpop.permute.xlu0 %790  ;;  %v691_v32 = vpop.permute.xlu1 %690 }
 0x19d   :  { %v833_v51 = vmul.f32 %v4546_v45, %v791_v31  ;;  %v733_v52 = vmul.f32 %v4541_v44, %v691_v32 }
 0x19f   :  { %v849_v59 = vadd.f32 %v833_v51, %v733_v52 }
 0x1a0   :  { %v796_v33 = vpop.permute.xlu0 %795  ;;  %v696_v34 = vpop.permute.xlu1 %695 }
 0x1a1   :  { %v834_v13 = vmul.f32 %v4546_v45, %v796_v33  ;;  %v734_v14 = vmul.f32 %v4541_v44, %v696_v34 }
 0x1a3   :  { %v850_v27 = vadd.f32 %v834_v13, %v734_v14 }
 0x1a4   :  { %v801_v35 = vpop.permute.xlu0 %800  ;;  %v701_v36 = vpop.permute.xlu1 %700 }
 0x1a5   :  { %v835_v53 = vmul.f32 %v4546_v45, %v801_v35  ;;  %v735_v54 = vmul.f32 %v4541_v44, %v701_v36 }
 0x1a7   :  { %v851_v62 = vadd.f32 %v835_v53, %v735_v54 }
 0x1a8   :  { %v806_v37 = vpop.permute.xlu0 %805  ;;  %v706_v38 = vpop.permute.xlu1 %705 }
 0x1a9   :  { %v836_v20 = vmul.f32 %v4546_v45, %v806_v37  ;;  %v736_v21 = vmul.f32 %v4541_v44, %v706_v38  ;;  %v267_v38 = vsub.s32 4, %v4438_v11 }
 0x1ab   :  { %v852_v32 = vadd.f32 %v836_v20, %v736_v21 }
 0x1ac   :  { %v810_v39 = vpop.permute.xlu0 %809  ;;  %v710_v40 = vpop.permute.xlu1 %709 }
 0x1ad   :  { %v837_v63 = vmul.f32 %v4546_v45, %v810_v39  ;;  %v737_v1 = vmul.f32 %v4541_v44, %v710_v40 }
 0x1af   :  { %v853_v7 = vadd.f32 %v837_v63, %v737_v1 }
 0x1b0   :  { %v815_v41 = vpop.permute.xlu0 %814  ;;  %v715_v0 = vpop.permute.xlu1 %714 }
 0x1b1   :  { %v838_v33 = vmul.f32 %v4546_v45, %v815_v41  ;;  %v738_v34 = vmul.f32 %v4541_v44, %v715_v0 }
 0x1b3   :  { %v854_v52 = vadd.f32 %v838_v33, %v738_v34 }
 0x1b4   :  { %v744_v42 = vpop.permute.xlu0 %743  ;;  %v644_v43 = vpop.permute.xlu1 %643 }
 0x1b5   :  { %v823_v22 = vmul.f32 %v4546_v45, %v744_v42  ;;  %v723_v23 = vmul.f32 %v4541_v44, %v644_v43 }
 0x1b7   :  { %v839_v35 = vadd.f32 %v823_v22, %v723_v23 }
 0x1b8   :  { %v4548_v46 = vpop.permute.xlu0 %748  ;;  %v4550_v47 = vpop.permute.xlu1 %648 }
 0x1b9   :  { %v824_v22 = vmul.f32 %v4546_v45, %v4548_v46  ;;  %v724_v23 = vmul.f32 %v4541_v44, %v4550_v47 }
 0x1bb   :  { %v840_v34 = vadd.f32 %v824_v22, %v724_v23 }
 0x1bc   :  { %v4565_v56 = vpop.permute.xlu0 %752  ;;  %v4567_v57 = vpop.permute.xlu1 %652 }
 0x1c0   :  { %v4596_v16 = vpop.permute.xlu0 %757  ;;  %v4598_v17 = vpop.permute.xlu1 %657 }
 0x1c1   :  { %v826_v46 = vmul.f32 %v4546_v45, %v4596_v16  ;;  %v726_v47 = vmul.f32 %v4541_v44, %v4598_v17 }
 0x1c3   :  { %v842_v16 = vadd.f32 %v826_v46, %v726_v47 }
 0x1c4   :  { %v763_v36 = vpop.permute.xlu0 %762  ;;  %v663_v37 = vpop.permute.xlu1 %662 }
 0x1c8   :  { %v768_v12 = vpop.permute.xlu0 %767  ;;  %v668_v13 = vpop.permute.xlu1 %667 }
 0x1c9   :  { %v728_v17 = vmul.f32 %v4541_v44, %v668_v13 }
 0x250   :  { %v365_v60 = vpop.f32.mrb[0].mxu1  ;;  %v4569_v61 = vpop.f32.mrb[2].mxu0 }
 0x251   :  { %v4573_v2 = vadd.f32 %v365_v60, %v252_v55  ;;  %v4575_v3 = vpop.f32.mrb[1].mxu1  ;;  %v4577_v4 = vpop.f32.mrb[3].mxu0 }
 0x253   :  { %v4580_v15 = vadd.f32 %v847_v58, %v4573_v2  ;;  %v4583_v5 = vadd.f32 %v849_v59, %v4573_v2  ;;  %v4586_v6 = vadd.f32 %v851_v62, %v4573_v2  ;;  %v4602_v19 = vadd.f32 %v853_v7, %v4573_v2 }
 0x254   :  { %v4645_v51 = vadd.f32 %v839_v35, %v4573_v2  ;;  %v725_v58 = vmul.f32 %v4541_v44, %v4567_v57  ;;  %v4653_v59 = vrot.slane %v4555_v48, %v267_v38 }
 0x255   :  { %1095 = vrot.lane.b32.xlu1 %v4580_v15, %s4334_s22  ;;  %v3504_v8 = vmul.f32 -1.442695, %v4580_v15  ;;  %v3506_v9 = vmul.f32 -1.442695, %v4583_v5  ;;  %v3508_v18 = vmul.f32 -1.442695, %v4586_v6 }
 0x256   :  { %v3510_v31 = vmul.f32 -1.442695, %v4602_v19  ;;  %v3496_v10 = vmul.f32 -1.442695, %v4645_v51 }
 0x257   :  { %3906 = vpow2.f32 %v3504_v8 }
 0x258   :  { %3908 = vpow2.f32 %v3506_v9 }
 0x259   :  { %1099 = vrot.lane.b32.xlu1 %v4583_v5, %s4334_s22  ;;  %3910 = vpow2.f32 %v3508_v18 }
 0x25a   :  { %v371_v25 = vpop.f32.mrb[2].mxu1  ;;  %v4610_v26 = vpop.f32.mrb[4].mxu0  ;;  %3912 = vpow2.f32 %v3510_v31 }
 0x25b   :  { %v4612_v28 = vadd.f32 %v371_v25, %v252_v55  ;;  %v4614_v29 = vpop.f32.mrb[3].mxu1  ;;  %v4616_v30 = vpop.f32.mrb[5].mxu0  ;;  %v825_v55 = vmul.f32 %v4546_v45, %v4565_v56 }
 0x25c   :  { %v772_v31 = vpop.permute.xlu0 %771 }
 0x25d   :  { %1103 = vrot.lane.b32.xlu1 %v4586_v6, %s4334_s22  ;;  %v4625_v39 = vadd.f32 %v848_v24, %v4612_v28  ;;  %v4628_v40 = vadd.f32 %v850_v27, %v4612_v28  ;;  %v4635_v41 = vadd.f32 %v852_v32, %v4612_v28  ;;  %v4659_v8 = vadd.f32 %v854_v52, %v4612_v28  ;;  %v672_v32 = vpop.permute.xlu1 %671 }
 0x25e   :  { %v4630_v42 = vpop.f32.mrb[4].mxu1  ;;  %v4632_v43 = vpop.f32.mrb[6].mxu0  ;;  %v841_v20 = vadd.f32 %v825_v55, %v725_v58  ;;  %v4689_v55 = vadd.f32 %v840_v34, %v4612_v28 }
 0x25f   :  { %v4637_v0 = vpop.f32.mrb[5].mxu1  ;;  %1097 = vrot.lane.b32.xlu0 %v4625_v39, %s4334_s22  ;;  %v3505_v49 = vmul.f32 -1.442695, %v4625_v39  ;;  %v4642_v50 = vpop.f32.mrb[7].mxu0  ;;  %v3507_v53 = vmul.f32 -1.442695, %v4628_v40 }
 0x260   :  { %v3509_v7 = vmul.f32 -1.442695, %v4635_v41  ;;  %v3511_v21 = vmul.f32 -1.442695, %v4659_v8  ;;  %v4679_v24 = vadd.f32 %v841_v20, %v4573_v2 }
 0x261   :  { %v3907_v54 = vpop.eup %3906  ;;  %3914 = vpow2.f32 %v3505_v49 }
 0x262   :  { %v3909_v60 = vpop.eup %3908  ;;  %v943_v62 = vadd.f32 1.0, %v3907_v54  ;;  %v525_v63 = vpop.f32.mrb[6].mxu1  ;;  %3916 = vpow2.f32 %v3507_v53  ;;  %v3498_v35 = vmul.f32 -1.442695, %v4679_v24  ;;  %v827_v53 = vmul.f32 %v4546_v45, %v763_v36 }
 0x263   :  { %v4655_v1 = vpop.f32.mrb[8].mxu0  ;;  %v4662_v56 = vadd.f32 %v525_v63, %v4653_v59  ;;  %v4664_v9 = vpop.f32.mrb[7].mxu1  ;;  %1101 = vrot.lane.b32.xlu0 %v4628_v40, %s4334_s22  ;;  %v945_v14 = vadd.f32 1.0, %v3909_v60  ;;  %v727_v54 = vmul.f32 %v4541_v44, %v663_v37 }
 0x264   :  { %v4668_v57 = vpop.f32.mrb[9].mxu0  ;;  %3918 = vrcp.f32 %v943_v62  ;;  %v3911_v18 = vpop.eup %3910  ;;  %v828_v62 = vmul.f32 %v4546_v45, %v768_v12 }
 0x265   :  { %3920 = vpow2.f32 %v3509_v7  ;;  %v947_v25 = vadd.f32 1.0, %v3911_v18  ;;  %v3913_v27 = vpop.eup %3912  ;;  %v777_v7 = vpop.permute.xlu0 %776  ;;  %v843_v37 = vadd.f32 %v827_v53, %v727_v54  ;;  %v4696_v18 = vadd.f32 %v842_v16, %v4612_v28 }
 0x266   :  { %3922 = vpow2.f32 %v3496_v10  ;;  %v949_v52 = vadd.f32 1.0, %v3913_v27  ;;  %v677_v10 = vpop.permute.xlu1 %676  ;;  %v844_v12 = vadd.f32 %v828_v62, %v728_v17  ;;  %v830_v13 = vmul.f32 %v4546_v45, %v777_v7 }
 0x267   :  { %1105 = vrot.lane.b32.xlu0 %v4635_v41, %s4334_s22  ;;  %3924 = vrcp.f32 %v945_v14  ;;  %v3497_v14 = vmul.f32 -1.442695, %v4689_v55  ;;  %v730_v22 = vmul.f32 %v4541_v44, %v677_v10  ;;  %v4702_v23 = vadd.f32 %v843_v37, %v4573_v2 }
 0x268   :  { %3926 = vpow2.f32 %v3511_v21  ;;  %v4706_v34 = vadd.f32 %v844_v12, %v4612_v28  ;;  %v729_v54 = vmul.f32 %v4541_v44, %v672_v32 }
 0x269   :  { %3928 = vrcp.f32 %v947_v25 }
 0x26b   :  { %v3915_v33 = vpop.eup %3914 }
 0x26c   :  { %v3917_v38 = vpop.eup %3916  ;;  %v944_v49 = vadd.f32 1.0, %v3915_v33  ;;  %v3499_v33 = vmul.f32 -1.442695, %v4696_v18 }
 0x26d   :  { %v946_v60 = vadd.f32 1.0, %v3917_v38  ;;  %v3500_v38 = vmul.f32 -1.442695, %v4702_v23 }
 0x26e   :  { %v3919_v58 = vpop.eup %3918  ;;  %3930 = vrcp.f32 %v944_v49 }
 0x26f   :  { %1015 = vrot.lane.b32.xlu1 %v3919_v58, %s4330_s15  ;;  %3932 = vpow2.f32 %v3498_v35  ;;  %v3921_v63 = vpop.eup %3920  ;;  %v846_v35 = vadd.f32 %v830_v13, %v730_v22  ;;  %v3501_v58 = vmul.f32 -1.442695, %v4706_v34 }
 0x270   :  { %3934 = vrcp.f32 %v949_v52  ;;  %v3923_v36 = vpop.eup %3922  ;;  %v948_v21 = vadd.f32 1.0, %v3921_v63  ;;  %v829_v52 = vmul.f32 %v4546_v45, %v772_v31 }
 0x271   :  { %v3925_v20 = vpop.eup %3924  ;;  %3936 = vrcp.f32 %v946_v60  ;;  %v935_v27 = vadd.f32 1.0, %v3923_v36  ;;  %v4715_v60 = vadd.f32 %v846_v35, %v4612_v28 }
 0x272   :  { %v3927_v25 = vpop.eup %3926  ;;  %3938 = vpow2.f32 %v3497_v14  ;;  %v845_v45 = vadd.f32 %v829_v52, %v729_v54 }
 0x273   :  { %1019 = vrot.lane.b32.xlu1 %v3925_v20, %s4330_s15  ;;  %v3929_v46 = vpop.eup %3928  ;;  %3940 = vrcp.f32 %v948_v21  ;;  %v950_v47 = vadd.f32 1.0, %v3927_v25  ;;  %v3503_v44 = vmul.f32 -1.442695, %v4715_v60 }
 0x274   :  { %3942 = vrcp.f32 %v935_v27  ;;  %v4723_v28 = vadd.f32 %v845_v45, %v4573_v2 }
 0x275   :  { %3944 = vpow2.f32 %v3499_v33 }
 0x276   :  { %3946 = vrcp.f32 %v950_v47  ;;  %v3502_v36 = vmul.f32 -1.442695, %v4723_v28 }
 0x277   :  { %1023 = vrot.lane.b32.xlu1 %v3929_v46, %s4330_s15  ;;  %3948 = vpow2.f32 %v3500_v38 }
 0x278   :  { %v3931_v49 = vpop.eup %3930  ;;  %3950 = vpow2.f32 %v3501_v58 }
 0x279   :  { %v3933_v53 = vpop.eup %3932  ;;  %1017 = vrot.lane.b32.xlu0 %v3931_v49, %s4330_s15 }
 0x27a   :  { %v3935_v16 = vpop.eup %3934  ;;  %v937_v17 = vadd.f32 1.0, %v3933_v53 }
 0x27b   :  { %1027 = vrot.lane.b32.xlu1 %v3935_v16, %s4330_s15  ;;  %v3937_v62 = vpop.eup %3936 }
 0x27c   :  { %v3939_v31 = vpop.eup %3938  ;;  %3952 = vrcp.f32 %v937_v17  ;;  %v1201_v17 = vld [vmem:[#allocation3 + $0x8] sm:$0xff] }
 0x27d   :  { %1021 = vrot.lane.b32.xlu0 %v3937_v62, %s4330_s15  ;;  %v3941_v32 = vpop.eup %3940  ;;  %3954 = vpow2.f32 %v3503_v44  ;;  %v936_v7 = vadd.f32 1.0, %v3939_v31  ;;  %v1200_v62 = vld [vmem:[#allocation3] sm:$0xff] }
 0x27e   :  { %v3943_v63 = vpop.eup %3942  ;;  %v3815_v45 = vpack.c.bf16 %v1201_v17, %v1200_v62 }
 0x27f   :  { %1107 = vrot.lane.b32.xlu1 %v4602_v19, %s4334_s22  ;;  %v3945_v10 = vpop.eup %3944  ;;  %3956 = vrcp.f32 %v936_v7  ;;  %v1202_v7 = vld [vmem:[#allocation3 + $0x10] sm:$0xff] }
 0x280   :  { %v3947_v37 = vpop.eup %3946  ;;  %v938_v20 = vadd.f32 1.0, %v3945_v10  ;;  %3958 = vpow2.f32 %v3502_v36  ;;  %3816 = vmatprep.subr.bf16.mxu1 %v3815_v45 }
 0x281   :  { %1025 = vrot.lane.b32.xlu0 %v3941_v32, %s4330_s15  ;;  %v3949_v14 = vpop.eup %3948  ;;  %3818 = vmatpush3.bf16.msra.mxu1 %v3815_v45 }
 0x282   :  { %v3951_v2 = vpop.eup %3950  ;;  %v939_v21 = vadd.f32 1.0, %v3949_v14  ;;  %3960 = vrcp.f32 %v938_v20 }
 0x283   :  { %999 = vrot.lane.b32.xlu1 %v3943_v63, %s4330_s15  ;;  %v940_v13 = vadd.f32 1.0, %v3951_v2 }
 0x284   :  { %3962 = vrcp.f32 %v939_v21 }
 0x285   :  { %1029 = vrot.lane.b32.xlu0 %v3947_v37, %s4330_s15  ;;  %3964 = vrcp.f32 %v940_v13 }
 0x286   :  { %v3953_v12 = vpop.eup %3952 }
 0x287   :  { %1079 = vrot.lane.b32.xlu1 %v4645_v51, %s4334_s22  ;;  %v3955_v22 = vpop.eup %3954 }
 0x288   :  { %v942_v25 = vadd.f32 1.0, %v3955_v22 }
 0x289   :  { %1109 = vrot.lane.b32.xlu0 %v4659_v8, %s4334_s22  ;;  %v3957_v27 = vpop.eup %3956 }
 0x28a   :  { %v3959_v33 = vpop.eup %3958  ;;  %3966 = vrcp.f32 %v942_v25 }
 0x28b   :  { %1003 = vrot.lane.b32.xlu1 %v3953_v12, %s4330_s15  ;;  %v941_v47 = vadd.f32 1.0, %v3959_v33 }
 0x28c   :  { %v3961_v46 = vpop.eup %3960 }
 0x28d   :  { %1081 = vrot.lane.b32.xlu0 %v4689_v55, %s4334_s22  ;;  %3968 = vrcp.f32 %v941_v47 }
 0x28e   :  { %v3963_v35 = vpop.eup %3962  ;;  %3970 = vtanh.f32 %v4580_v15  ;;  %v1203_v15 = vld [vmem:[#allocation3 + $0x18] sm:$0xff] }
 0x28f   :  { %1083 = vrot.lane.b32.xlu1 %v4679_v24, %s4334_s22  ;;  %v3965_v38 = vpop.eup %3964  ;;  %3972 = vtanh.f32 %v4583_v5  ;;  %v3819_v10 = vpack.c.bf16 %v1203_v15, %v1202_v7 }
 0x290   :  { %3974 = vtanh.f32 %v4586_v6 }
 0x291   :  { %1001 = vrot.lane.b32.xlu0 %v3957_v27, %s4330_s15  ;;  %3976 = vtanh.f32 %v4625_v39  ;;  %3820 = vmatprep.subr.bf16.mxu1 %v3819_v10 }
 0x292   :  { %3978 = vtanh.f32 %v4628_v40  ;;  %3822 = vmatpush3.bf16.msra.mxu1 %v3819_v10 }
 0x293   :  { %1085 = vrot.lane.b32.xlu1 %v4696_v18, %s4334_s22  ;;  %3980 = vtanh.f32 %v4602_v19 }
 0x294   :  { %v3967_v49 = vpop.eup %3966  ;;  %3982 = vtanh.f32 %v4635_v41 }
 0x295   :  { %1005 = vrot.lane.b32.xlu0 %v3961_v46, %s4330_s15  ;;  %3984 = vtanh.f32 %v4659_v8 }
 0x296   :  { %3986 = vtanh.f32 %v4645_v51 }
 0x297   :  { %1007 = vrot.lane.b32.xlu1 %v3963_v35, %s4330_s15  ;;  %v3969_v52 = vpop.eup %3968  ;;  %3988 = vtanh.f32 %v4689_v55 }
 0x298   :  { %v3971_v44 = vpop.eup %3970  ;;  %3990 = vtanh.f32 %v4679_v24 }
 0x299   :  { %1009 = vrot.lane.b32.xlu0 %v3965_v38, %s4330_s15  ;;  %v3973_v36 = vpop.eup %3972  ;;  %3992 = vtanh.f32 %v4696_v18 }
 0x29a   :  { %v3975_v2 = vpop.eup %3974  ;;  %3994 = vtanh.f32 %v4702_v23 }
 0x29b   :  { %1087 = vrot.lane.b32.xlu1 %v4702_v23, %s4334_s22  ;;  %v3977_v13 = vpop.eup %3976  ;;  %3996 = vtanh.f32 %v4706_v34 }
 0x29c   :  { %v3979_v33 = vpop.eup %3978  ;;  %3998 = vtanh.f32 %v4723_v28 }
 0x29d   :  { %1013 = vrot.lane.b32.xlu0 %v3967_v49, %s4330_s15  ;;  %v3981_v35 = vpop.eup %3980  ;;  %4000 = vtanh.f32 %v4715_v60 }
 0x29f   :  { %1089 = vrot.lane.b32.xlu1 %v4706_v34, %s4334_s22 }
 0x2a3   :  { %1011 = vrot.lane.b32.xlu1 %v3969_v52, %s4330_s15 }
 0x2a7   :  { %1091 = vrot.lane.b32.xlu1 %v4723_v28, %s4334_s22 }
 0x2ab   :  { %1093 = vrot.lane.b32.xlu1 %v4715_v60, %s4334_s22 }
 0x2c7   :  { %v1096_v53 = vpop.permute.xlu1 %1095 }
 0x2cb   :  { %v1100_v54 = vpop.permute.xlu1 %1099 }
 0x2cf   :  { %v1104_v16 = vpop.permute.xlu1 %1103 }
 0x2d1   :  { %v1098_v58 = vpop.permute.xlu0 %1097 }
 0x2d5   :  { %v1102_v31 = vpop.permute.xlu0 %1101 }
 0x2d9   :  { %v1106_v20 = vpop.permute.xlu0 %1105 }
 0x2e1   :  { %v1016_v32 = vpop.permute.xlu1 %1015 }
 0x2e2   :  { %v1055_v63 = vmul.f32 %v3971_v44, %v1016_v32 }
 0x2e4   :  { %v1135_v5 = vadd.f32 %v1096_v53, %v1055_v63 }
 0x2e5   :  { %v1020_v37 = vpop.permute.xlu1 %1019 }
 0x2e6   :  { %v1057_v6 = vmul.f32 %v3973_v36, %v1020_v37  ;;  %v1151_v14 = vmul.f32 0.70710677, %v1135_v5 }
 0x2e8   :  { %v1137_v39 = vadd.f32 %v1100_v54, %v1057_v6  ;;  %1167 = vrot.lane.b32.xlu0 %v1151_v14, %s4335_s23 }
 0x2e9   :  { %v1024_v21 = vpop.permute.xlu1 %1023 }
 0x2ea   :  { %v1059_v40 = vmul.f32 %v3975_v2, %v1024_v21  ;;  %v1153_v12 = vmul.f32 0.70710677, %v1137_v39 }
 0x2eb   :  { %v1018_v22 = vpop.permute.xlu0 %1017 }
 0x2ec   :  { %v1139_v25 = vadd.f32 %v1104_v16, %v1059_v40  ;;  %v1056_v27 = vmul.f32 %v3977_v13, %v1018_v22  ;;  %1171 = vrot.lane.b32.xlu0 %v1153_v12, %s4335_s23  ;;  %v3983_v16 = vpop.eup %3982 }
 0x2ed   :  { %v1028_v19 = vpop.permute.xlu1 %1027  ;;  %v3985_v8 = vpop.eup %3984 }
 0x2ee   :  { %v1136_v46 = vadd.f32 %v1098_v58, %v1056_v27  ;;  %v1155_v47 = vmul.f32 0.70710677, %v1139_v25  ;;  %v1061_v49 = vmul.f32 %v3981_v35, %v1028_v19  ;;  %v3987_v22 = vpop.eup %3986 }
 0x2ef   :  { %v1022_v38 = vpop.permute.xlu0 %1021  ;;  %v3989_v35 = vpop.eup %3988 }
 0x2f0   :  { %v1058_v52 = vmul.f32 %v3979_v33, %v1022_v38  ;;  %1175 = vrot.lane.b32.xlu0 %v1155_v47, %s4335_s23  ;;  %v1152_v62 = vmul.f32 0.70710677, %v1136_v46  ;;  %v3991_v38 = vpop.eup %3990 }
 0x2f1   :  { %v1108_v41 = vpop.permute.xlu1 %1107 }
 0x2f2   :  { %v1138_v53 = vadd.f32 %v1102_v31, %v1058_v52  ;;  %v1141_v54 = vadd.f32 %v1108_v41, %v1061_v49  ;;  %v3993_v49 = vpop.eup %3992 }
 0x2f3   :  { %v1026_v17 = vpop.permute.xlu0 %1025 }
 0x2f4   :  { %v1157_v45 = vmul.f32 0.70710677, %v1141_v54  ;;  %v1060_v44 = vmul.f32 %v3983_v16, %v1026_v17  ;;  %1169 = vrot.lane.b32.xlu0 %v1152_v62, %s4335_s23  ;;  %v1154_v32 = vmul.f32 0.70710677, %v1138_v53  ;;  %v3995_v62 = vpop.eup %3994 }
 0x2f5   :  { %v1000_v36 = vpop.permute.xlu1 %999 }
 0x2f6   :  { %v1140_v58 = vadd.f32 %v1106_v20, %v1060_v44  ;;  %1179 = vrot.lane.b32.xlu1 %v1157_v45, %s4335_s23  ;;  %v1047_v25 = vmul.f32 %v3987_v22, %v1000_v36  ;;  %v3997_v44 = vpop.eup %3996 }
 0x2f7   :  { %v1030_v63 = vpop.permute.xlu0 %1029 }
 0x2f8   :  { %1173 = vrot.lane.b32.xlu0 %v1154_v32, %s4335_s23  ;;  %v1062_v7 = vmul.f32 %v3985_v8, %v1030_v63  ;;  %v1156_v15 = vmul.f32 0.70710677, %v1140_v58  ;;  %v3999_v63 = vpop.eup %3998 }
 0x2f9   :  { %v1080_v37 = vpop.permute.xlu1 %1079  ;;  %v4001_v36 = vpop.eup %4000 }
 0x2fa   :  { %v1127_v27 = vadd.f32 %v1080_v37, %v1047_v25 }
 0x2fb   :  { %v1110_v5 = vpop.permute.xlu0 %1109 }
 0x2fc   :  { %v1142_v31 = vadd.f32 %v1110_v5, %v1062_v7  ;;  %1177 = vrot.lane.b32.xlu0 %v1156_v15, %s4335_s23  ;;  %v1143_v46 = vmul.f32 0.70710677, %v1127_v27 }
 0x2fd   :  { %v1004_v6 = vpop.permute.xlu1 %1003 }
 0x2fe   :  { %v1158_v10 = vmul.f32 0.70710677, %v1142_v31  ;;  %v1049_v52 = vmul.f32 %v3991_v38, %v1004_v6 }
 0x2ff   :  { %v1082_v14 = vpop.permute.xlu0 %1081 }
 0x300   :  { %1181 = vrot.lane.b32.xlu0 %v1158_v10, %s4335_s23 }
 0x301   :  { %v1084_v20 = vpop.permute.xlu1 %1083 }
 0x302   :  { %v1129_v53 = vadd.f32 %v1084_v20, %v1049_v52 }
 0x303   :  { %v1002_v39 = vpop.permute.xlu0 %1001 }
 0x304   :  { %v1048_v55 = vmul.f32 %v3989_v35, %v1002_v39  ;;  %v1145_v58 = vmul.f32 0.70710677, %v1129_v53 }
 0x305   :  { %v1086_v2 = vpop.permute.xlu1 %1085 }
 0x306   :  { %v1128_v23 = vadd.f32 %v1082_v14, %v1048_v55 }
 0x307   :  { %v1006_v21 = vpop.permute.xlu0 %1005 }
 0x308   :  { %v1050_v41 = vmul.f32 %v3993_v49, %v1006_v21  ;;  %v1144_v34 = vmul.f32 0.70710677, %v1128_v23 }
 0x309   :  { %v1008_v40 = vpop.permute.xlu1 %1007 }
 0x30a   :  { %v1051_v17 = vmul.f32 %v3995_v62, %v1008_v40  ;;  %v1130_v45 = vadd.f32 %v1086_v2, %v1050_v41 }
 0x30b   :  { %v1010_v12 = vpop.permute.xlu0 %1009 }
 0x30c   :  { %v1052_v8 = vmul.f32 %v3997_v44, %v1010_v12  ;;  %v1146_v5 = vmul.f32 0.70710677, %v1130_v45 }
 0x30d   :  { %v1088_v13 = vpop.permute.xlu1 %1087 }
 0x30e   :  { %v1131_v32 = vadd.f32 %v1088_v13, %v1051_v17 }
 0x30f   :  { %v1014_v19 = vpop.permute.xlu0 %1013 }
 0x310   :  { %v1147_v37 = vmul.f32 0.70710677, %v1131_v32  ;;  %v1054_v20 = vmul.f32 %v4001_v36, %v1014_v19 }
 0x311   :  { %v1090_v33 = vpop.permute.xlu1 %1089 }
 0x312   :  { %v1132_v31 = vadd.f32 %v1090_v33, %v1052_v8 }
 0x314   :  { %v1148_v21 = vmul.f32 0.70710677, %v1132_v31 }
 0x315   :  { %v1012_v24 = vpop.permute.xlu1 %1011 }
 0x316   :  { %v1053_v15 = vmul.f32 %v3999_v63, %v1012_v24 }
 0x319   :  { %v1092_v16 = vpop.permute.xlu1 %1091 }
 0x31a   :  { %v1133_v6 = vadd.f32 %v1092_v16, %v1053_v15 }
 0x31c   :  { %v1149_v13 = vmul.f32 0.70710677, %v1133_v6 }
 0x31d   :  { %v1094_v10 = vpop.permute.xlu1 %1093 }
 0x31e   :  { %v1134_v40 = vadd.f32 %v1094_v10, %v1054_v20 }
 0x320   :  { %v1150_v19 = vmul.f32 0.70710677, %v1134_v40 }
 0x35a   :  { %v1168_v51 = vpop.permute.xlu0 %1167 }
 0x35b   :  { %v1192_v47 = vsel %vm1191_vm6, %v1143_v46, %v1168_v51  ;;  %v255_v51 = vsub.s32 1, %v4438_v11 }
 0x35c   :  { %3697 = vmatprep.mubr.msk.f32.mxu1 %vm1204_vm7, %v1192_v47 }
 0x35d   :  { %v256_v47 = vrot.slane %v4555_v48, %v255_v51 }
 0x35e   :  { %v1172_v18 = vpop.permute.xlu0 %1171 }
 0x35f   :  { %v1194_v60 = vsel %vm1191_vm6, %v1145_v58, %v1172_v18  ;;  %v374_v35 = vadd.f32 %v4614_v29, %v256_v47  ;;  %v368_v55 = vadd.f32 %v4575_v3, %v256_v47  ;;  %v1507_v47 = vld [vmem:[#allocation3 + $0x20] sm:$0xff] }
 0x362   :  { %v1176_v54 = vpop.permute.xlu0 %1175 }
 0x363   :  { %v1196_v2 = vsel %vm1191_vm6, %v1147_v37, %v1176_v54 }
 0x366   :  { %v1170_v28 = vpop.permute.xlu0 %1169 }
 0x367   :  { %v1193_v7 = vsel %vm1191_vm6, %v1144_v34, %v1170_v28 }
 0x368   :  { %3698 = vmatmul.mubr.msk.f32.vlgmr.msra.gmra.mrb[8].mxu1 %vm1204_vm7, %v1193_v7  ;;  %v1180_v12 = vpop.permute.xlu1 %1179 }
 0x369   :  { %3700 = vmatprep.mubr.msk.f32.mxu1 %vm1204_vm7, %v1194_v60  ;;  %v1198_v27 = vsel %vm1191_vm6, %v1149_v13, %v1180_v12 }
 0x36a   :  { %v1174_v14 = vpop.permute.xlu0 %1173 }
 0x36b   :  { %v1195_v39 = vsel %vm1191_vm6, %v1146_v5, %v1174_v14 }
 0x36c   :  { %3701 = vmatmul.mubr.msk.f32.gmra.mrb[10].mxu1 %vm1204_vm7, %v1195_v39 }
 0x36d   :  { %3703 = vmatprep.mubr.msk.f32.mxu1 %vm1204_vm7, %v1196_v2 }
 0x36e   :  { %v1178_v22 = vpop.permute.xlu0 %1177 }
 0x36f   :  { %v1197_v25 = vsel %vm1191_vm6, %v1148_v21, %v1178_v22 }
 0x370   :  { %3704 = vmatmul.mubr.msk.f32.gmra.mrb[12].mxu1 %vm1204_vm7, %v1197_v25 }
 0x371   :  { %3706 = vmatprep.mubr.msk.f32.mxu1 %vm1204_vm7, %v1198_v27 }
 0x372   :  { %v1182_v33 = vpop.permute.xlu0 %1181 }
 0x373   :  { %v1199_v46 = vsel %vm1191_vm6, %v1150_v19, %v1182_v33 }
 0x374   :  { %3707 = vmatmul.mubr.msk.f32.gmra.mrb[14].mxu1 %vm1204_vm7, %v1199_v46 }
 0x43b   :  { %v3699_v24 = vpop.f32.mrb[8].mxu1 }
 0x43c   :  { %v4798_v18 = vadd.f32 %v3699_v24, %v374_v35  ;;  %v1295_v38 = vpop.f32.mrb[9].mxu1 }
 0x43d   :  { %v4800_v49 = vadd.f32 %v1295_v38, %v368_v55  ;;  %v1509_v38 = vld [vmem:[#allocation3 + $0x30] sm:$0xff] }
 0x43e   :  { %v3521_v28 = vmul.f32 -1.442695, %v4798_v18 }
 0x43f   :  { %v3702_v52 = vpop.f32.mrb[10].mxu1  ;;  %v3520_v63 = vmul.f32 -1.442695, %v4800_v49 }
 0x440   :  { %v4802_v23 = vadd.f32 %v3702_v52, %v374_v35  ;;  %v1305_v41 = vpop.f32.mrb[11].mxu1  ;;  %v1510_v52 = vld [vmem:[#allocation3 + $0x38] sm:$0xff] }
 0x441   :  { %v4804_v53 = vadd.f32 %v1305_v41, %v368_v55 }
 0x442   :  { %v3523_v60 = vmul.f32 -1.442695, %v4802_v23 }
 0x443   :  { %v3705_v54 = vpop.f32.mrb[12].mxu1  ;;  %v3522_v10 = vmul.f32 -1.442695, %v4804_v53 }
 0x444   :  { %v4806_v62 = vadd.f32 %v3705_v54, %v374_v35  ;;  %v1315_v48 = vpop.f32.mrb[13].mxu1  ;;  %v3827_v54 = vpack.c.bf16 %v1510_v52, %v1509_v38 }
 0x445   :  { %v4808_v16 = vadd.f32 %v1315_v48, %v368_v55 }
 0x446   :  { %v3525_v3 = vmul.f32 -1.442695, %v4806_v62  ;;  %1456 = vrot.lane.b32.xlu0 %v4806_v62, %s4334_s22 }
 0x447   :  { %v3524_v29 = vmul.f32 -1.442695, %v4808_v16  ;;  %1454 = vrot.lane.b32.xlu1 %v4808_v16, %s4334_s22  ;;  %v3708_v17 = vpop.f32.mrb[14].mxu1 }
 0x448   :  { %4002 = vpow2.f32 %v3525_v3  ;;  %v4816_v34 = vadd.f32 %v3708_v17, %v374_v35  ;;  %v1325_v45 = vpop.f32.mrb[15].mxu1  ;;  %v1508_v35 = vld [vmem:[#allocation3 + $0x28] sm:$0xff] }
 0x449   :  { %4004 = vpow2.f32 %v3524_v29  ;;  %v4818_v44 = vadd.f32 %v1325_v45, %v368_v55  ;;  %v3823_v55 = vpack.c.bf16 %v1508_v35, %v1507_v47 }
 0x44a   :  { %v3527_v58 = vmul.f32 -1.442695, %v4816_v34 }
 0x44b   :  { %v3526_v32 = vmul.f32 -1.442695, %v4818_v44  ;;  %3824 = vmatprep.subr.bf16.mxu0 %v3823_v55 }
 0x44c   :  { %4006 = vpow2.f32 %v3527_v58  ;;  %3826 = vmatpush3.bf16.msra.mxu0 %v3823_v55 }
 0x44d   :  { %4008 = vpow2.f32 %v3526_v32  ;;  %3828 = vmatprep.subr.bf16.mxu0 %v3827_v54 }
 0x44e   :  { %4010 = vpow2.f32 %v3521_v28 }
 0x44f   :  { %4012 = vpow2.f32 %v3520_v63 }
 0x450   :  { %3830 = vmatpush3.bf16.msra.mxu0 %v3827_v54 }
 0x452   :  { %v4003_v8 = vpop.eup %4002 }
 0x453   :  { %v4005_v7 = vpop.eup %4004  ;;  %v1379_v15 = vadd.f32 1.0, %v4003_v8 }
 0x454   :  { %v1378_v5 = vadd.f32 1.0, %v4005_v7 }
 0x455   :  { %4014 = vrcp.f32 %v1379_v15 }
 0x456   :  { %v4007_v31 = vpop.eup %4006  ;;  %4016 = vrcp.f32 %v1378_v5 }
 0x457   :  { %v1381_v36 = vadd.f32 1.0, %v4007_v31  ;;  %4018 = vpow2.f32 %v3523_v60  ;;  %v4009_v37 = vpop.eup %4008 }
 0x458   :  { %v4011_v6 = vpop.eup %4010  ;;  %v1380_v14 = vadd.f32 1.0, %v4009_v37 }
 0x459   :  { %4020 = vrcp.f32 %v1381_v36  ;;  %v4013_v20 = vpop.eup %4012  ;;  %v1375_v39 = vadd.f32 1.0, %v4011_v6 }
 0x45a   :  { %4022 = vpow2.f32 %v3522_v10  ;;  %v1374_v40 = vadd.f32 1.0, %v4013_v20 }
 0x45b   :  { %4024 = vrcp.f32 %v1380_v14 }
 0x45c   :  { %4026 = vrcp.f32 %v1375_v39 }
 0x45d   :  { %4028 = vrcp.f32 %v1374_v40 }
 0x45f   :  { %v4015_v2 = vpop.eup %4014 }
 0x460   :  { %v4017_v21 = vpop.eup %4016  ;;  %1416 = vrot.lane.b32.xlu0 %v4015_v2, %s4330_s15 }
 0x461   :  { %1414 = vrot.lane.b32.xlu1 %v4017_v21, %s4330_s15  ;;  %v4019_v12 = vpop.eup %4018 }
 0x462   :  { %v1377_v25 = vadd.f32 1.0, %v4019_v12 }
 0x463   :  { %v4021_v13 = vpop.eup %4020 }
 0x464   :  { %1420 = vrot.lane.b32.xlu0 %v4021_v13, %s4330_s15  ;;  %v4023_v22 = vpop.eup %4022  ;;  %4030 = vrcp.f32 %v1377_v25 }
 0x465   :  { %v4025_v27 = vpop.eup %4024  ;;  %v1376_v19 = vadd.f32 1.0, %v4023_v22 }
 0x466   :  { %1418 = vrot.lane.b32.xlu1 %v4025_v27, %s4330_s15  ;;  %v4027_v33 = vpop.eup %4026 }
 0x467   :  { %4032 = vrcp.f32 %v1376_v19  ;;  %v4029_v46 = vpop.eup %4028 }
 0x468   :  { %1460 = vrot.lane.b32.xlu0 %v4816_v34, %s4334_s22  ;;  %4034 = vtanh.f32 %v4806_v62 }
 0x469   :  { %4036 = vtanh.f32 %v4808_v16 }
 0x46a   :  { %1458 = vrot.lane.b32.xlu1 %v4818_v44, %s4334_s22  ;;  %4038 = vtanh.f32 %v4816_v34 }
 0x46b   :  { %4040 = vtanh.f32 %v4818_v44 }
 0x46c   :  { %1408 = vrot.lane.b32.xlu0 %v4027_v33, %s4330_s15  ;;  %4042 = vtanh.f32 %v4800_v49 }
 0x46d   :  { %4044 = vtanh.f32 %v4798_v18 }
 0x46e   :  { %1406 = vrot.lane.b32.xlu1 %v4029_v46, %s4330_s15  ;;  %v4031_v51 = vpop.eup %4030  ;;  %4046 = vtanh.f32 %v4802_v23 }
 0x46f   :  { %4048 = vtanh.f32 %v4804_v53 }
 0x470   :  { %1448 = vrot.lane.b32.xlu0 %v4798_v18, %s4334_s22 }
 0x471   :  { %v4033_v24 = vpop.eup %4032 }
 0x472   :  { %1446 = vrot.lane.b32.xlu1 %v4800_v49, %s4334_s22  ;;  %v4035_v3 = vpop.eup %4034 }
 0x473   :  { %v4037_v17 = vpop.eup %4036 }
 0x474   :  { %1412 = vrot.lane.b32.xlu0 %v4031_v51, %s4330_s15  ;;  %v4039_v8 = vpop.eup %4038 }
 0x475   :  { %v4041_v34 = vpop.eup %4040 }
 0x476   :  { %1410 = vrot.lane.b32.xlu1 %v4033_v24, %s4330_s15  ;;  %v4043_v40 = vpop.eup %4042 }
 0x477   :  { %v4045_v25 = vpop.eup %4044 }
 0x478   :  { %v4047_v33 = vpop.eup %4046 }
 0x479   :  { %v4049_v51 = vpop.eup %4048 }
 0x47a   :  { %1450 = vrot.lane.b32.xlu1 %v4804_v53, %s4334_s22 }
 0x47e   :  { %1452 = vrot.lane.b32.xlu1 %v4802_v23, %s4334_s22 }
 0x4b8   :  { %v1457_v41 = vpop.permute.xlu0 %1456 }
 0x4b9   :  { %v1455_v48 = vpop.permute.xlu1 %1454 }
 0x4d2   :  { %v1417_v29 = vpop.permute.xlu0 %1416 }
 0x4d3   :  { %v1415_v45 = vpop.permute.xlu1 %1414  ;;  %v1435_v58 = vmul.f32 %v4035_v3, %v1417_v29 }
 0x4d4   :  { %v1434_v32 = vmul.f32 %v4037_v17, %v1415_v45 }
 0x4d5   :  { %v1475_v16 = vadd.f32 %v1457_v41, %v1435_v58  ;;  %v259_v58 = vsub.s32 2, %v4438_v11 }
 0x4d6   :  { %v1474_v62 = vadd.f32 %v1455_v48, %v1434_v32  ;;  %v1421_v28 = vpop.permute.xlu0 %1420  ;;  %v4870_v32 = vld [vmem:[%s5335_s6] sm:$0xff] }
 0x4d7   :  { %v1437_v15 = vmul.f32 %v4039_v8, %v1421_v28  ;;  %v1483_v5 = vmul.f32 0.70710677, %v1475_v16 }
 0x4d8   :  { %v1482_v63 = vmul.f32 0.70710677, %v1474_v62  ;;  %v1419_v7 = vpop.permute.xlu1 %1418  ;;  %v260_v62 = vrot.slane %v4870_v32, %v259_v58 }
 0x4d9   :  { %v1436_v44 = vmul.f32 %v4041_v34, %v1419_v7 }
 0x4da   :  { %v1461_v60 = vpop.permute.xlu0 %1460  ;;  %1490 = vrot.lane.b32.xlu0 %v1482_v63, %s4335_s23  ;;  %v449_v28 = vadd.f32 %v4610_v26, %v260_v62  ;;  %v443_v16 = vadd.f32 %v4569_v61, %v260_v62 }
 0x4db   :  { %v1477_v31 = vadd.f32 %v1461_v60, %v1437_v15 }
 0x4dc   :  { %v1459_v10 = vpop.permute.xlu1 %1458 }
 0x4dd   :  { %v1476_v36 = vadd.f32 %v1459_v10, %v1436_v44  ;;  %v1485_v37 = vmul.f32 0.70710677, %v1477_v31 }
 0x4de   :  { %1492 = vrot.lane.b32.xlu0 %v1483_v5, %s4335_s23  ;;  %v1409_v39 = vpop.permute.xlu0 %1408 }
 0x4df   :  { %v1484_v6 = vmul.f32 0.70710677, %v1476_v36  ;;  %v1431_v19 = vmul.f32 %v4045_v25, %v1409_v39  ;;  %v1697_v25 = vld [vmem:[#allocation3 + $0x50] sm:$0xff] }
 0x4e0   :  { %v1407_v14 = vpop.permute.xlu1 %1406 }
 0x4e1   :  { %1494 = vrot.lane.b32.xlu1 %v1484_v6, %s4335_s23  ;;  %v1430_v12 = vmul.f32 %v4043_v40, %v1407_v14 }
 0x4e2   :  { %1496 = vrot.lane.b32.xlu0 %v1485_v37, %s4335_s23  ;;  %v1449_v21 = vpop.permute.xlu0 %1448 }
 0x4e3   :  { %v1471_v46 = vadd.f32 %v1449_v21, %v1431_v19  ;;  %v1698_v19 = vld [vmem:[#allocation3 + $0x58] sm:$0xff] }
 0x4e4   :  { %v1447_v20 = vpop.permute.xlu1 %1446 }
 0x4e5   :  { %v1470_v22 = vadd.f32 %v1447_v20, %v1430_v12  ;;  %v1479_v53 = vmul.f32 0.70710677, %v1471_v46 }
 0x4e6   :  { %v1413_v27 = vpop.permute.xlu0 %1412 }
 0x4e7   :  { %v1478_v49 = vmul.f32 0.70710677, %v1470_v22  ;;  %v1433_v18 = vmul.f32 %v4047_v33, %v1413_v27  ;;  %v1696_v22 = vld [vmem:[#allocation3 + $0x48] sm:$0xff]  ;;  %v3835_v33 = vpack.c.bf16 %v1698_v19, %v1697_v25 }
 0x4e8   :  { %v1411_v2 = vpop.permute.xlu1 %1410 }
 0x4e9   :  { %v1432_v55 = vmul.f32 %v4049_v51, %v1411_v2 }
 0x4ec   :  { %v1451_v13 = vpop.permute.xlu1 %1450 }
 0x4ed   :  { %v1472_v24 = vadd.f32 %v1451_v13, %v1432_v55  ;;  %v1695_v13 = vld [vmem:[#allocation3 + $0x40] sm:$0xff] }
 0x4ee   :  { %v3831_v27 = vpack.c.bf16 %v1696_v22, %v1695_v13  ;;  %v1911_v13 = vld [vmem:[%s5340_s11 + $0x8] sm:$0xff]  ;;  %v1912_v22 = vld [vmem:[%s5340_s11 + $0x10] sm:$0xff] }
 0x4ef   :  { %v1480_v54 = vmul.f32 0.70710677, %v1472_v24 }
 0x4f0   :  { %v1453_v47 = vpop.permute.xlu1 %1452  ;;  %3832 = vmatprep.subr.bf16.mxu0 %v3831_v27 }
 0x4f1   :  { %v1473_v38 = vadd.f32 %v1453_v47, %v1433_v18 }
 0x4f3   :  { %v1481_v48 = vmul.f32 0.70710677, %v1473_v38 }
 0x54c   :  { %v1491_v35 = vpop.permute.xlu0 %1490 }
 0x54d   :  { %v1502_v23 = vsel %vm1191_vm6, %v1478_v49, %v1491_v35 }
 0x54e   :  { %3717 = vmatprep.mubr.msk.f32.mxu0 %vm1204_vm7, %v1502_v23 }
 0x550   :  { %v1493_v52 = vpop.permute.xlu0 %1492 }
 0x551   :  { %v1503_v41 = vsel %vm1191_vm6, %v1479_v53, %v1493_v52 }
 0x552   :  { %3718 = vmatmul.mubr.msk.f32.vlgmr.msra.gmra.mrb[10].mxu0 %vm1204_vm7, %v1503_v41 }
 0x553   :  { %v1495_v3 = vpop.permute.xlu1 %1494  ;;  %3834 = vmatpush3.bf16.msra.mxu0 %v3831_v27  ;;  %v1913_v27 = vld [vmem:[%s5340_s11 + $0x18] sm:$0xff] }
 0x554   :  { %v1497_v29 = vpop.permute.xlu0 %1496  ;;  %v1504_v17 = vsel %vm1191_vm6, %v1480_v54, %v1495_v3  ;;  %3836 = vmatprep.subr.bf16.mxu0 %v3835_v33 }
 0x555   :  { %v1505_v45 = vsel %vm1191_vm6, %v1481_v48, %v1497_v29  ;;  %3720 = vmatprep.mubr.msk.f32.mxu0 %vm1204_vm7, %v1504_v17 }
 0x556   :  { %3721 = vmatmul.mubr.msk.f32.gmra.mrb[12].mxu0 %vm1204_vm7, %v1505_v45 }
 0x557   :  { %3838 = vmatpush3.bf16.msra.mxu0 %v3835_v33  ;;  %v3847_v33 = vpack.c.bf16 %v1913_v27, %v1912_v22  ;;  %v4962_v22 = vld [vmem:[%s5336_s7 + $0x2] ss:$0 sm:$0xff] }
 0x625   :  { %v3719_v63 = vpop.f32.mrb[10].mxu0 }
 0x626   :  { %v4875_v8 = vadd.f32 %v3719_v63, %v449_v28  ;;  %v1589_v7 = vpop.f32.mrb[11].mxu0 }
 0x627   :  { %v1608_v15 = vadd.f32 %v1589_v7, %v443_v16 }
 0x628   :  { %v3533_v36 = vmul.f32 -1.442695, %v4875_v8 }
 0x629   :  { %v3722_v60 = vpop.f32.mrb[12].mxu0  ;;  %v3532_v37 = vmul.f32 -1.442695, %v1608_v15 }
 0x62a   :  { %v1611_v34 = vadd.f32 %v3722_v60, %v449_v28  ;;  %v1599_v5 = vpop.f32.mrb[13].mxu0 }
 0x62b   :  { %v1610_v44 = vadd.f32 %v1599_v5, %v443_v16 }
 0x62c   :  { %v3535_v31 = vmul.f32 -1.442695, %v1611_v34 }
 0x62d   :  { %v3534_v10 = vmul.f32 -1.442695, %v1610_v44 }
 0x62e   :  { %4050 = vpow2.f32 %v3535_v31 }
 0x62f   :  { %4052 = vpow2.f32 %v3534_v10 }
 0x630   :  { %4054 = vpow2.f32 %v3533_v36 }
 0x631   :  { %4056 = vpow2.f32 %v3532_v37 }
 0x638   :  { %v4051_v26 = vpop.eup %4050 }
 0x639   :  { %v4053_v61 = vpop.eup %4052  ;;  %v1631_v6 = vadd.f32 1.0, %v4051_v26 }
 0x63a   :  { %v1630_v14 = vadd.f32 1.0, %v4053_v61  ;;  %v4055_v20 = vpop.eup %4054 }
 0x63b   :  { %4058 = vrcp.f32 %v1631_v6  ;;  %v4057_v39 = vpop.eup %4056  ;;  %v1629_v2 = vadd.f32 1.0, %v4055_v20 }
 0x63c   :  { %4060 = vrcp.f32 %v1630_v14  ;;  %v1628_v21 = vadd.f32 1.0, %v4057_v39 }
 0x63d   :  { %4062 = vrcp.f32 %v1629_v2 }
 0x63e   :  { %4064 = vrcp.f32 %v1628_v21 }
 0x63f   :  { %4066 = vtanh.f32 %v1611_v34 }
 0x640   :  { %4068 = vtanh.f32 %v1610_v44 }
 0x641   :  { %4070 = vtanh.f32 %v1608_v15 }
 0x642   :  { %4072 = vtanh.f32 %v4875_v8 }
 0x645   :  { %v4059_v40 = vpop.eup %4058 }
 0x646   :  { %v4061_v12 = vpop.eup %4060  ;;  %1650 = vrot.lane.b32.xlu0 %v4059_v40, %s4330_s15 }
 0x647   :  { %1648 = vrot.lane.b32.xlu1 %v4061_v12, %s4330_s15  ;;  %v4063_v46 = vpop.eup %4062  ;;  %v1910_v12 = vld [vmem:[%s5340_s11] sm:$0xff] }
 0x648   :  { %v4065_v49 = vpop.eup %4064  ;;  %v3843_v25 = vpack.c.bf16 %v1911_v13, %v1910_v12  ;;  %v4957_v12 = vld [vmem:[%s5336_s7 + $0x3] ss:$0 sm:$0xff] }
 0x649   :  { %v4067_v35 = vpop.eup %4066 }
 0x64a   :  { %1670 = vrot.lane.b32.xlu0 %v1611_v34, %s4334_s22  ;;  %v4069_v18 = vpop.eup %4068  ;;  %3844 = vmatprep.subr.bf16.mxu1 %v3843_v25 }
 0x64b   :  { %1668 = vrot.lane.b32.xlu1 %v1610_v44, %s4334_s22  ;;  %v4071_v29 = vpop.eup %4070  ;;  %3846 = vmatpush3.bf16.msra.mxu1 %v3843_v25 }
 0x64c   :  { %v4073_v45 = vpop.eup %4072  ;;  %3848 = vmatprep.subr.bf16.mxu1 %v3847_v33 }
 0x64e   :  { %1646 = vrot.lane.b32.xlu0 %v4063_v46, %s4330_s15 }
 0x64f   :  { %1644 = vrot.lane.b32.xlu1 %v4065_v49, %s4330_s15  ;;  %3850 = vmatpush3.bf16.msra.mxu1 %v3847_v33 }
 0x652   :  { %1666 = vrot.lane.b32.xlu0 %v4875_v8, %s4334_s22  ;;  %v263_v8 = vsub.s32 3, %v4438_v11 }
 0x653   :  { %1664 = vrot.lane.b32.xlu1 %v1608_v15, %s4334_s22 }
 0x654   :  { %v264_v31 = vrot.slane %v4870_v32, %v263_v8 }
 0x656   :  { %v451_v10 = vadd.f32 %v4616_v30, %v264_v31  ;;  %v445_v36 = vadd.f32 %v4577_v4, %v264_v31  ;;  %v1818_v30 = vld [vmem:[%s5338_s9] sm:$0xff]  ;;  %v1819_v4 = vld [vmem:[%s5338_s9 + $0x8] sm:$0xff] }
 0x657   :  { %v3839_v32 = vpack.c.bf16 %v1819_v4, %v1818_v30  ;;  %v2058_v31 = vld [vmem:[#allocation2 + $0x3] sm:$0xff] }
 0x659   :  { %3840 = vmatprep.subr.bf16.mxu0 %v3839_v32 }
 0x6b8   :  { %v1651_v51 = vpop.permute.xlu0 %1650 }
 0x6b9   :  { %v1649_v47 = vpop.permute.xlu1 %1648  ;;  %v1659_v55 = vmul.f32 %v4067_v35, %v1651_v51 }
 0x6ba   :  { %v1658_v23 = vmul.f32 %v4069_v18, %v1649_v47 }
 0x6bc   :  { %v1671_v53 = vpop.permute.xlu0 %1670 }
 0x6bd   :  { %v1679_v24 = vadd.f32 %v1671_v53, %v1659_v55  ;;  %v1669_v38 = vpop.permute.xlu1 %1668 }
 0x6be   :  { %v1678_v52 = vadd.f32 %v1669_v38, %v1658_v23 }
 0x6bf   :  { %v1683_v41 = vmul.f32 0.70710677, %v1679_v24 }
 0x6c0   :  { %v1682_v54 = vmul.f32 0.70710677, %v1678_v52  ;;  %v1647_v3 = vpop.permute.xlu0 %1646 }
 0x6c1   :  { %1688 = vrot.lane.b32.xlu0 %v1683_v41, %s4335_s23  ;;  %v1645_v48 = vpop.permute.xlu1 %1644  ;;  %v1657_v28 = vmul.f32 %v4073_v45, %v1647_v3 }
 0x6c2   :  { %1686 = vrot.lane.b32.xlu1 %v1682_v54, %s4335_s23  ;;  %v1656_v58 = vmul.f32 %v4071_v29, %v1645_v48  ;;  %v3540_v54 = vld [vmem:[%s5339_s10] ss:$0 sm:$0xff] }
 0x6c4   :  { %v1667_v62 = vpop.permute.xlu0 %1666 }
 0x6c5   :  { %v1665_v17 = vpop.permute.xlu1 %1664  ;;  %v1677_v63 = vadd.f32 %v1667_v62, %v1657_v28  ;;  %v3543_v62 = vld [vmem:[%s5341_s12] ss:$0 sm:$0xff] }
 0x6c6   :  { %v1676_v16 = vadd.f32 %v1665_v17, %v1656_v58 }
 0x6c7   :  { %v1681_v34 = vmul.f32 0.70710677, %v1677_v63 }
 0x6c8   :  { %v1680_v7 = vmul.f32 0.70710677, %v1676_v16 }
 0x733   :  { %v1689_v60 = vpop.permute.xlu0 %1688 }
 0x734   :  { %v1687_v5 = vpop.permute.xlu1 %1686  ;;  %v1693_v15 = vsel %vm1191_vm6, %v1681_v34, %v1689_v60 }
 0x735   :  { %v1692_v44 = vsel %vm1191_vm6, %v1680_v7, %v1687_v5 }
 0x736   :  { %3731 = vmatprep.mubr.msk.f32.mxu0 %vm1204_vm7, %v1692_v44 }
 0x737   :  { %3732 = vmatmul.mubr.msk.f32.vlgmr.msra.gmra.mrb[14].mxu0 %vm1204_vm7, %v1693_v15 }
 0x738   :  { %3842 = vmatpush3.bf16.msra.mxu0 %v3839_v32 }
 0x80a   :  { %v3733_v37 = vpop.f32.mrb[14].mxu0 }
 0x80b   :  { %v1781_v26 = vadd.f32 %v3733_v37, %v451_v10  ;;  %v1771_v61 = vpop.f32.mrb[15].mxu0  ;;  %v2046_v10 = vld [vmem:[#allocation2 + $0x2] sm:$0xff] }
 0x80c   :  { %v1780_v6 = vadd.f32 %v1771_v61, %v445_v36  ;;  %v2061_v36 = vld [vmem:[#allocation2 + $0x7] sm:$0xff] }
 0x80d   :  { %v3539_v14 = vmul.f32 -1.442695, %v1781_v26  ;;  %v2049_v37 = vld [vmem:[#allocation2 + $0x6] sm:$0xff] }
 0x80e   :  { %v3538_v20 = vmul.f32 -1.442695, %v1780_v6  ;;  %v2002_v61 = vld [vmem:[%s5331_s2] sm:$0xff] }
 0x80f   :  { %4074 = vpow2.f32 %v3539_v14 }
 0x810   :  { %4076 = vpow2.f32 %v3538_v20 }
 0x819   :  { %v4075_v39 = vpop.eup %4074 }
 0x81a   :  { %v4077_v2 = vpop.eup %4076  ;;  %v1791_v21 = vadd.f32 1.0, %v4075_v39 }
 0x81b   :  { %v1790_v40 = vadd.f32 1.0, %v4077_v2 }
 0x81c   :  { %4078 = vrcp.f32 %v1791_v21 }
 0x81d   :  { %4080 = vrcp.f32 %v1790_v40 }
 0x81e   :  { %4082 = vtanh.f32 %v1781_v26 }
 0x81f   :  { %4084 = vtanh.f32 %v1780_v6 }
 0x826   :  { %v4079_v19 = vpop.eup %4078 }
 0x827   :  { %v4081_v46 = vpop.eup %4080  ;;  %1800 = vrot.lane.b32.xlu0 %v4079_v19, %s4330_s15 }
 0x828   :  { %1798 = vrot.lane.b32.xlu1 %v4081_v46, %s4330_s15  ;;  %v4083_v47 = vpop.eup %4082 }
 0x829   :  { %v4085_v35 = vpop.eup %4084 }
 0x82b   :  { %1810 = vrot.lane.b32.xlu0 %v1781_v26, %s4334_s22  ;;  %v2003_v26 = vld [vmem:[%s5331_s2 + $0x8] sm:$0xff] }
 0x82c   :  { %1808 = vrot.lane.b32.xlu1 %v1780_v6, %s4334_s22 }
 0x899   :  { %v1801_v49 = vpop.permute.xlu0 %1800 }
 0x89a   :  { %v1799_v51 = vpop.permute.xlu1 %1798  ;;  %v1805_v18 = vmul.f32 %v4083_v47, %v1801_v49 }
 0x89b   :  { %v1804_v55 = vmul.f32 %v4085_v35, %v1799_v51  ;;  %v4968_v35 = vadd.f32 %v4630_v42, %v4653_v59  ;;  %v2055_v42 = vld [vmem:[#allocation2 + $0x5] sm:$0xff] }
 0x89c   :  { %v2041_v59 = vld [vmem:[#allocation2 + $0x8] sm:$0xff] }
 0x89d   :  { %v1811_v23 = vpop.permute.xlu0 %1810 }
 0x89e   :  { %v1815_v53 = vadd.f32 %v1811_v23, %v1805_v18  ;;  %v1809_v24 = vpop.permute.xlu1 %1808 }
 0x89f   :  { %v1814_v38 = vadd.f32 %v1809_v24, %v1804_v55 }
 0x8a0   :  { %v1817_v41 = vmul.f32 0.70710677, %v1815_v53 }
 0x8a1   :  { %v1816_v52 = vmul.f32 0.70710677, %v1814_v38  ;;  %v2052_v38 = vld [vmem:[#allocation2 + $0x1] sm:$0xff] }
 0x8a3   :  { %3738 = vmatprep.mubr.msk.f32.mxu0 %vm1191_vm6, %v1816_v52  ;;  %v2040_v52 = vld [vmem:[#allocation2] sm:$0xff] }
 0x8a4   :  { %3739 = vmatmul.mubr.msk.f32.vlgmr.msra.gmra.mrb[16].mxu0 %vm1191_vm6, %v1817_v41 }
 0x977   :  { %v3740_v48 = vpop.f32.mrb[16].mxu0 }
 0x978   :  { %v1905_v3 = vadd.f32 %v3740_v48, %v3540_v54  ;;  %v1899_v29 = vpop.f32.mrb[17].mxu0 }
 0x979   :  { %v1900_v17 = vadd.f32 %v3540_v54, %v1899_v29 }
 0x97a   :  { %v1909_v58 = vmax.f32 %v1905_v3, 0.0 }
 0x97b   :  { %v1908_v45 = vmax.f32 %v1900_v17, 0.0  ;;  %v2043_v17 = vld [vmem:[#allocation2 + $0x4] sm:$0xff] }
 0x97d   :  { %3749 = vmatprep.mubr.msk.f32.mxu1 %vm1204_vm7, %v1908_v45 }
 0x97e   :  { %3750 = vmatmul.mubr.msk.f32.vlgmr.msra.gmra.mrb[16].mxu1 %vm1204_vm7, %v1909_v58 }
 0xa51   :  { %v3751_v28 = vpop.f32.mrb[16].mxu1 }
 0xa52   :  { %v4930_v16 = vadd.f32 %v3751_v28, %v3543_v62  ;;  %v1993_v63 = vpop.f32.mrb[17].mxu1 }
 0xa53   :  { %v4932_v7 = vadd.f32 %v3543_v62, %v1993_v63 }
 0xa54   :  { %v2005_v60 = vmul.f32 0.5, %v4930_v16 }
 0xa55   :  { %v2004_v34 = vmul.f32 0.5, %v4932_v7 }
 0xa56   :  { %v2008_v5 = vmul.f32 1.442695, %v2005_v60 }
 0xa57   :  { %v2006_v44 = vmul.f32 1.442695, %v2004_v34 }
 0xa58   :  { %4086 = vpow2.f32 %v2008_v5 }
 0xa59   :  { %4088 = vpow2.f32 %v2006_v44 }
 0xa62   :  { %v4087_v15 = vpop.eup %4086 }
 0xa63   :  { %v4089_v8 = vpop.eup %4088  ;;  %2014 = vrot.lane.b32.xlu0 %v4087_v15, %s4336_s24 }
 0xa64   :  { %2012 = vrot.lane.b32.xlu1 %v4089_v8, %s4336_s24 }
 0xa67   :  { %2206 = vperm.xlu0 %3902, %v2058_v31  }
 0xa68   :  { %2106 = vperm.xlu1 %3903, %v2046_v10  }
 0xa6b   :  { %2225 = vperm.xlu0 %3902, %v2061_v36  }
 0xa6c   :  { %2125 = vperm.xlu1 %3903, %v2049_v37  }
 0xad5   :  { %v2015_v6 = vpop.permute.xlu0 %2014 }
 0xad6   :  { %v2019_v14 = vmul.f32 %v2015_v6, %v2003_v26  ;;  %v2013_v20 = vpop.permute.xlu1 %2012 }
 0xad7   :  { %v2018_v39 = vmul.f32 %v2013_v20, %v2002_v61 }
 0xad8   :  { %v4945_v2 = vadd.f32 %v2019_v14, %v4930_v16 }
 0xad9   :  { %v4948_v21 = vadd.f32 %v2018_v39, %v4932_v7 }
 0xada   :  { %2039 = vst.msk [vmem:[#allocation2 + $0x18] sm:$0xff] %vm611_vm2, %v4945_v2 }
 0xadb   :  { %2038 = vst.msk [vmem:[#allocation2 + $0x10] sm:$0xff] %vm611_vm2, %v4948_v21 }
 0xae2   :  { %v2059_v40 = vld [vmem:[#allocation2 + $0xb] sm:$0xff]  ;;  %v2060_v4 = vld [vmem:[#allocation2 + $0x13] sm:$0xff] }
 0xae3   :  { %v2047_v30 = vld [vmem:[#allocation2 + $0xa] sm:$0xff]  ;;  %2211 = vperm.xlu0 %3902, %v2059_v40   ;;  %v2048_v32 = vld [vmem:[#allocation2 + $0x12] sm:$0xff] }
 0xae4   :  { %2111 = vperm.xlu1 %3903, %v2047_v30   ;;  %v2062_v27 = vld [vmem:[#allocation2 + $0xf] sm:$0xff]  ;;  %v2063_v18 = vld [vmem:[#allocation2 + $0x17] sm:$0xff] }
 0xae5   :  { %v2050_v19 = vld [vmem:[#allocation2 + $0xe] sm:$0xff]  ;;  %v2051_v55 = vld [vmem:[#allocation2 + $0x16] sm:$0xff] }
 0xae6   :  { %v2207_v13 = vpop.permute.xlu0 %2206  ;;  %v2053_v3 = vld [vmem:[#allocation2 + $0x9] sm:$0xff]  ;;  %v2054_v58 = vld [vmem:[#allocation2 + $0x11] sm:$0xff] }
 0xae7   :  { %2215 = vperm.xlu0 %3902, %v2059_v40   ;;  %v2107_v25 = vpop.permute.xlu1 %2106  ;;  %v2256_v33 = vmul.f32 %v4957_v12, %v2207_v13  ;;  %v2042_v62 = vld [vmem:[#allocation2 + $0x10] sm:$0xff] }
 0xae8   :  { %2115 = vperm.xlu1 %3903, %v2047_v30   ;;  %v2156_v46 = vmul.f32 %v4962_v22, %v2107_v25  ;;  %v2056_v63 = vld [vmem:[#allocation2 + $0xd] sm:$0xff]  ;;  %v2057_v44 = vld [vmem:[#allocation2 + $0x15] sm:$0xff] }
 0xae9   :  { %v2044_v60 = vld [vmem:[#allocation2 + $0xc] sm:$0xff]  ;;  %v2045_v15 = vld [vmem:[#allocation2 + $0x14] sm:$0xff] }
 0xaea   :  { %v2272_v49 = vadd.f32 %v2256_v33, %v2156_v46  ;;  %v2226_v51 = vpop.permute.xlu0 %2225 }
 0xaeb   :  { %2220 = vperm.xlu0 %3902, %v2060_v4   ;;  %v2126_v47 = vpop.permute.xlu1 %2125  ;;  %v2260_v53 = vmul.f32 %v4957_v12, %v2226_v51 }
 0xaec   :  { %2120 = vperm.xlu1 %3903, %v2048_v32   ;;  %v4971_v23 = vadd.f32 %v2272_v49, %v4968_v35  ;;  %v2160_v24 = vmul.f32 %v4962_v22, %v2126_v47 }
 0xaee   :  { %v3558_v41 = vmul.f32 -1.442695, %v4971_v23  ;;  %v2276_v54 = vadd.f32 %v2260_v53, %v2160_v24 }
 0xaef   :  { %2230 = vperm.xlu0 %3902, %v2062_v27  }
 0xaf0   :  { %2130 = vperm.xlu1 %3903, %v2050_v19   ;;  %4090 = vpow2.f32 %v3558_v41  ;;  %v4977_v48 = vadd.f32 %v2276_v54, %v4968_v35 }
 0xaf2   :  { %v3562_v29 = vmul.f32 -1.442695, %v4977_v48 }
 0xaf3   :  { %2234 = vperm.xlu0 %3902, %v2062_v27  }
 0xaf4   :  { %2134 = vperm.xlu1 %3903, %v2050_v19   ;;  %4092 = vpow2.f32 %v3562_v29 }
 0xaf7   :  { %2239 = vperm.xlu0 %3902, %v2063_v18  }
 0xaf8   :  { %2139 = vperm.xlu1 %3903, %v2051_v55  }
 0xafa   :  { %v4091_v45 = vpop.eup %4090 }
 0xafb   :  { %2168 = vperm.xlu0 %3902, %v2052_v38   ;;  %v2368_v28 = vadd.f32 1.0, %v4091_v45 }
 0xafc   :  { %2068 = vperm.xlu1 %3903, %v2040_v52  }
 0xafd   :  { %4094 = vrcp.f32 %v2368_v28 }
 0xafe   :  { %v4093_v34 = vpop.eup %4092 }
 0xaff   :  { %2187 = vperm.xlu0 %3902, %v2055_v42   ;;  %v2372_v5 = vadd.f32 1.0, %v4093_v34 }
 0xb00   :  { %2073 = vperm.xlu1 %3903, %v2041_v59  }
 0xb01   :  { %4096 = vrcp.f32 %v2372_v5 }
 0xb03   :  { %2173 = vperm.xlu0 %3902, %v2053_v3  }
 0xb04   :  { %2077 = vperm.xlu1 %3903, %v2041_v59  }
 0xb07   :  { %2177 = vperm.xlu0 %3902, %v2053_v3   ;;  %v4095_v8 = vpop.eup %4094 }
 0xb08   :  { %2087 = vperm.xlu1 %3903, %v2043_v17  }
 0xb0b   :  { %2182 = vperm.xlu0 %3902, %v2054_v58   ;;  %v4097_v31 = vpop.eup %4096 }
 0xb0c   :  { %2082 = vperm.xlu1 %3903, %v2042_v62  }
 0xb0f   :  { %2192 = vperm.xlu0 %3902, %v2056_v63  }
 0xb10   :  { %2092 = vperm.xlu1 %3903, %v2044_v60  }
 0xb13   :  { %2196 = vperm.xlu0 %3902, %v2056_v63  }
 0xb14   :  { %2096 = vperm.xlu1 %3903, %v2044_v60  }
 0xb17   :  { %2201 = vperm.xlu0 %3902, %v2057_v44  }
 0xb18   :  { %2101 = vperm.xlu1 %3903, %v2045_v15  }
 0xb1c   :  { %2440 = vrot.lane.b32.xlu1 %v4095_v8, %s4330_s15 }
 0xb20   :  { %2520 = vrot.lane.b32.xlu1 %v4971_v23, %s4334_s22 }
 0xb24   :  { %2448 = vrot.lane.b32.xlu1 %v4097_v31, %s4330_s15 }
 0xb62   :  { %v2212_v10 = vpop.permute.xlu0 %2211 }
 0xb63   :  { %v2112_v36 = vpop.permute.xlu1 %2111  ;;  %v2257_v37 = vmul.f32 %v4957_v12, %v2212_v10 }
 0xb64   :  { %v2157_v26 = vmul.f32 %v4962_v22, %v2112_v36 }
 0xb66   :  { %v2273_v61 = vadd.f32 %v2257_v37, %v2157_v26  ;;  %v2216_v6 = vpop.permute.xlu0 %2215 }
 0xb67   :  { %v2116_v14 = vpop.permute.xlu1 %2115  ;;  %v2258_v39 = vmul.f32 %v4957_v12, %v2216_v6 }
 0xb68   :  { %v4987_v20 = vadd.f32 %v2273_v61, %v4662_v56  ;;  %v2158_v40 = vmul.f32 %v4962_v22, %v2116_v14 }
 0xb6a   :  { %v3559_v30 = vmul.f32 -1.442695, %v4987_v20  ;;  %v2274_v4 = vadd.f32 %v2258_v39, %v2158_v40  ;;  %2522 = vrot.lane.b32.xlu0 %v4987_v20, %s4334_s22  ;;  %v2221_v32 = vpop.permute.xlu0 %2220 }
 0xb6b   :  { %v2121_v13 = vpop.permute.xlu1 %2120  ;;  %v2259_v27 = vmul.f32 %v4957_v12, %v2221_v32 }
 0xb6c   :  { %4098 = vpow2.f32 %v3559_v30  ;;  %v4995_v25 = vadd.f32 %v2274_v4, %v4968_v35  ;;  %v2159_v19 = vmul.f32 %v4962_v22, %v2121_v13 }
 0xb6e   :  { %v3560_v33 = vmul.f32 -1.442695, %v4995_v25  ;;  %v2275_v46 = vadd.f32 %v2259_v27, %v2159_v19  ;;  %2524 = vrot.lane.b32.xlu1 %v4995_v25, %s4334_s22  ;;  %v2231_v49 = vpop.permute.xlu0 %2230 }
 0xb6f   :  { %v2131_v51 = vpop.permute.xlu1 %2130  ;;  %v2261_v18 = vmul.f32 %v4957_v12, %v2231_v49 }
 0xb70   :  { %4100 = vpow2.f32 %v3560_v33  ;;  %v5003_v47 = vadd.f32 %v2275_v46, %v4662_v56  ;;  %v2161_v55 = vmul.f32 %v4962_v22, %v2131_v51 }
 0xb72   :  { %v3561_v53 = vmul.f32 -1.442695, %v5003_v47  ;;  %v2277_v24 = vadd.f32 %v2261_v18, %v2161_v55  ;;  %2526 = vrot.lane.b32.xlu0 %v5003_v47, %s4334_s22  ;;  %v2235_v38 = vpop.permute.xlu0 %2234 }
 0xb73   :  { %v2135_v52 = vpop.permute.xlu1 %2134  ;;  %v2262_v54 = vmul.f32 %v4957_v12, %v2235_v38 }
 0xb74   :  { %4102 = vpow2.f32 %v3561_v53  ;;  %v5011_v41 = vadd.f32 %v2277_v24, %v4662_v56  ;;  %v2162_v42 = vmul.f32 %v4962_v22, %v2135_v52 }
 0xb76   :  { %v4099_v59 = vpop.eup %4098  ;;  %v3563_v3 = vmul.f32 -1.442695, %v5011_v41  ;;  %v2278_v29 = vadd.f32 %v2262_v54, %v2162_v42  ;;  %v2240_v45 = vpop.permute.xlu0 %2239 }
 0xb77   :  { %v2369_v17 = vadd.f32 1.0, %v4099_v59  ;;  %v2140_v58 = vpop.permute.xlu1 %2139  ;;  %v2263_v28 = vmul.f32 %v4957_v12, %v2240_v45 }
 0xb78   :  { %4104 = vpow2.f32 %v3563_v3  ;;  %v5017_v62 = vadd.f32 %v2278_v29, %v4968_v35  ;;  %v2163_v63 = vmul.f32 %v4962_v22, %v2140_v58 }
 0xb79   :  { %4106 = vrcp.f32 %v2369_v17 }
 0xb7a   :  { %v4101_v60 = vpop.eup %4100  ;;  %v3564_v34 = vmul.f32 -1.442695, %v5017_v62  ;;  %v2279_v5 = vadd.f32 %v2263_v28, %v2163_v63  ;;  %v2169_v15 = vpop.permute.xlu0 %2168 }
 0xb7b   :  { %v2370_v44 = vadd.f32 1.0, %v4101_v60  ;;  %v2069_v8 = vpop.permute.xlu1 %2068  ;;  %v2248_v10 = vmul.f32 %v4957_v12, %v2169_v15 }
 0xb7c   :  { %4108 = vpow2.f32 %v3564_v34  ;;  %v5023_v31 = vadd.f32 %v2279_v5, %v4662_v56  ;;  %v2148_v36 = vmul.f32 %v4962_v22, %v2069_v8 }
 0xb7d   :  { %4110 = vrcp.f32 %v2370_v44 }
 0xb7e   :  { %v4103_v37 = vpop.eup %4102  ;;  %v3565_v26 = vmul.f32 -1.442695, %v5023_v31  ;;  %v2264_v61 = vadd.f32 %v2248_v10, %v2148_v36  ;;  %v2188_v14 = vpop.permute.xlu0 %2187 }
 0xb7f   :  { %v2371_v6 = vadd.f32 1.0, %v4103_v37  ;;  %v2074_v39 = vpop.permute.xlu1 %2073  ;;  %v2252_v38 = vmul.f32 %v4957_v12, %v2188_v14 }
 0xb80   :  { %4112 = vpow2.f32 %v3565_v26  ;;  %v5029_v40 = vadd.f32 %v2264_v61, %v4968_v35  ;;  %v2149_v33 = vmul.f32 %v4962_v22, %v2074_v39 }
 0xb81   :  { %4114 = vrcp.f32 %v2371_v6 }
 0xb82   :  { %v4105_v30 = vpop.eup %4104  ;;  %v3550_v4 = vmul.f32 -1.442695, %v5029_v40  ;;  %v2174_v27 = vpop.permute.xlu0 %2173 }
 0xb83   :  { %v4107_v32 = vpop.eup %4106  ;;  %v2373_v13 = vadd.f32 1.0, %v4105_v30  ;;  %v2078_v19 = vpop.permute.xlu1 %2077  ;;  %v2249_v46 = vmul.f32 %v4957_v12, %v2174_v27 }
 0xb84   :  { %4116 = vpow2.f32 %v3550_v4  ;;  %2442 = vrot.lane.b32.xlu0 %v4107_v32, %s4330_s15  ;;  %v2150_v34 = vmul.f32 %v4962_v22, %v2078_v19 }
 0xb85   :  { %4118 = vrcp.f32 %v2373_v13  ;;  %v2265_v51 = vadd.f32 %v2249_v46, %v2149_v33 }
 0xb86   :  { %v4109_v49 = vpop.eup %4108  ;;  %v2178_v53 = vpop.permute.xlu0 %2177 }
 0xb87   :  { %v4111_v18 = vpop.eup %4110  ;;  %v2374_v55 = vadd.f32 1.0, %v4109_v49  ;;  %v2088_v24 = vpop.permute.xlu1 %2087  ;;  %v5037_v52 = vadd.f32 %v2265_v51, %v4662_v56  ;;  %v2250_v28 = vmul.f32 %v4957_v12, %v2178_v53 }
 0xb88   :  { %v2152_v54 = vmul.f32 %v4962_v22, %v2088_v24  ;;  %2444 = vrot.lane.b32.xlu1 %v4111_v18, %s4330_s15  ;;  %2530 = vrot.lane.b32.xlu0 %v5011_v41, %s4334_s22 }
 0xb89   :  { %4120 = vrcp.f32 %v2374_v55  ;;  %v3551_v59 = vmul.f32 -1.442695, %v5037_v52  ;;  %v2266_v36 = vadd.f32 %v2250_v28, %v2150_v34 }
 0xb8a   :  { %v4113_v42 = vpop.eup %4112  ;;  %v2268_v3 = vadd.f32 %v2252_v38, %v2152_v54  ;;  %v2183_v45 = vpop.permute.xlu0 %2182 }
 0xb8b   :  { %v4115_v29 = vpop.eup %4114  ;;  %v2375_v17 = vadd.f32 1.0, %v4113_v42  ;;  %v2083_v58 = vpop.permute.xlu1 %2082  ;;  %4122 = vpow2.f32 %v3551_v59  ;;  %v5056_v6 = vadd.f32 %v2266_v36, %v4968_v35  ;;  %v2251_v55 = vmul.f32 %v4957_v12, %v2183_v45 }
 0xb8c   :  { %v5046_v63 = vadd.f32 %v2268_v3, %v4968_v35  ;;  %2528 = vrot.lane.b32.xlu1 %v4977_v48, %s4334_s22  ;;  %2446 = vrot.lane.b32.xlu0 %v4115_v29, %s4330_s15  ;;  %v2151_v53 = vmul.f32 %v4962_v22, %v2083_v58 }
 0xb8d   :  { %4124 = vrcp.f32 %v2375_v17  ;;  %v3552_v13 = vmul.f32 -1.442695, %v5056_v6 }
 0xb8e   :  { %v4117_v60 = vpop.eup %4116  ;;  %v3554_v5 = vmul.f32 -1.442695, %v5046_v63  ;;  %v2193_v8 = vpop.permute.xlu0 %2192 }
 0xb8f   :  { %v4119_v44 = vpop.eup %4118  ;;  %v2360_v15 = vadd.f32 1.0, %v4117_v60  ;;  %v2093_v10 = vpop.permute.xlu1 %2092  ;;  %v2253_v58 = vmul.f32 %v4957_v12, %v2193_v8 }
 0xb90   :  { %2450 = vrot.lane.b32.xlu0 %v4119_v44, %s4330_s15  ;;  %v2153_v28 = vmul.f32 %v4962_v22, %v2093_v10 }
 0xb91   :  { %4126 = vrcp.f32 %v2360_v15 }
 0xb92   :  { %4128 = vpow2.f32 %v3554_v5  ;;  %v2197_v26 = vpop.permute.xlu0 %2196  ;;  %v2269_v5 = vadd.f32 %v2253_v58, %v2153_v28  ;;  %v2628_v58 = vld [vmem:[#allocation3 + $0x78] sm:$0xff] }
 0xb93   :  { %v4121_v37 = vpop.eup %4120  ;;  %4130 = vtanh.f32 %v4971_v23  ;;  %v2097_v61 = vpop.permute.xlu1 %2096  ;;  %v2254_v14 = vmul.f32 %v4957_v12, %v2197_v26 }
 0xb94   :  { %v2154_v39 = vmul.f32 %v4962_v22, %v2097_v61  ;;  %2452 = vrot.lane.b32.xlu1 %v4121_v37, %s4330_s15  ;;  %4132 = vpow2.f32 %v3552_v13  ;;  %v5093_v15 = vadd.f32 %v2269_v5, %v4662_v56 }
 0xb95   :  { %v4123_v30 = vpop.eup %4122 }
 0xb96   :  { %v2270_v27 = vadd.f32 %v2254_v14, %v2154_v39  ;;  %v2361_v23 = vadd.f32 1.0, %v4123_v30  ;;  %v2202_v36 = vpop.permute.xlu0 %2201 }
 0xb97   :  { %v4125_v4 = vpop.eup %4124  ;;  %v2102_v32 = vpop.permute.xlu1 %2101  ;;  %v2255_v10 = vmul.f32 %v4957_v12, %v2202_v36  ;;  %v3555_v12 = vmul.f32 -1.442695, %v5093_v15 }
 0xb98   :  { %2532 = vrot.lane.b32.xlu1 %v5017_v62, %s4334_s22  ;;  %2454 = vrot.lane.b32.xlu0 %v4125_v4, %s4330_s15  ;;  %v5066_v49 = vadd.f32 %v2270_v27, %v4968_v35  ;;  %4134 = vrcp.f32 %v2361_v23  ;;  %v2267_v35 = vadd.f32 %v2251_v55, %v2151_v53  ;;  %v2155_v37 = vmul.f32 %v4962_v22, %v2102_v32 }
 0xb9a   :  { %v3556_v54 = vmul.f32 -1.442695, %v5066_v49  ;;  %v5082_v29 = vadd.f32 %v2267_v35, %v4662_v56  ;;  %v2271_v26 = vadd.f32 %v2255_v10, %v2155_v37  ;;  %v2625_v35 = vld [vmem:[#allocation3 + $0x60] sm:$0xff] }
 0xb9b   :  { %v4127_v19 = vpop.eup %4126  ;;  %v2441_v33 = vpop.permute.xlu1 %2440 }
 0xb9c   :  { %v4129_v46 = vpop.eup %4128  ;;  %2534 = vrot.lane.b32.xlu0 %v5023_v31, %s4334_s22  ;;  %2424 = vrot.lane.b32.xlu1 %v4127_v19, %s4330_s15  ;;  %v5104_v14 = vadd.f32 %v2271_v26, %v4662_v56  ;;  %v3553_v39 = vmul.f32 -1.442695, %v5082_v29 }
 0xb9d   :  { %v4131_v51 = vpop.eup %4130  ;;  %v2364_v18 = vadd.f32 1.0, %v4129_v46 }
 0xb9e   :  { %v2480_v24 = vmul.f32 %v4131_v51, %v2441_v33  ;;  %v4133_v3 = vpop.eup %4132  ;;  %v3557_v22 = vmul.f32 -1.442695, %v5104_v14 }
 0xb9f   :  { %v2521_v38 = vpop.permute.xlu1 %2520  ;;  %4136 = vrcp.f32 %v2364_v18  ;;  %v2362_v45 = vadd.f32 1.0, %v4133_v3 }
 0xba0   :  { %v2560_v42 = vadd.f32 %v2521_v38, %v2480_v24  ;;  %2504 = vrot.lane.b32.xlu1 %v5029_v40, %s4334_s22  ;;  %2506 = vrot.lane.b32.xlu0 %v5037_v52, %s4334_s22  ;;  %4138 = vpow2.f32 %v3556_v54 }
 0xba1   :  { %4140 = vrcp.f32 %v2362_v45  ;;  %v2627_v45 = vld [vmem:[#allocation3 + $0x70] sm:$0xff] }
 0xba2   :  { %v2576_v59 = vmul.f32 0.70710677, %v2560_v42  ;;  %v4135_v17 = vpop.eup %4134 }
 0xba3   :  { %v2449_v4 = vpop.permute.xlu1 %2448 }
 0xba4   :  { %2508 = vrot.lane.b32.xlu1 %v5056_v6, %s4334_s22  ;;  %2592 = vrot.lane.b32.xlu0 %v2576_v59, %s4335_s23  ;;  %v2626_v59 = vld [vmem:[#allocation3 + $0x68] sm:$0xff] }
 0xba5   :  { %v3851_v3 = vpack.c.bf16 %v2626_v59, %v2625_v35 }
 0xba7   :  { %3852 = vmatprep.subr.bf16.mxu0 %v3851_v3 }
 0xba8   :  { %2510 = vrot.lane.b32.xlu1 %v5082_v29, %s4334_s22  ;;  %2426 = vrot.lane.b32.xlu0 %v4135_v17, %s4330_s15 }
 0xba9   :  { %v4137_v60 = vpop.eup %4136  ;;  %3854 = vmatpush3.bf16.msra.mxu0 %v3851_v3 }
 0xbaa   :  { %v4139_v34 = vpop.eup %4138 }
 0xbab   :  { %v2366_v44 = vadd.f32 1.0, %v4139_v34  ;;  %v4141_v8 = vpop.eup %4140 }
 0xbac   :  { %2432 = vrot.lane.b32.xlu1 %v4137_v60, %s4330_s15 }
 0xbad   :  { %4142 = vrcp.f32 %v2366_v44 }
 0xbae   :  { %4144 = vpow2.f32 %v3553_v39 }
 0xbaf   :  { %4146 = vpow2.f32 %v3555_v12 }
 0xbb0   :  { %2512 = vrot.lane.b32.xlu1 %v5046_v63, %s4334_s22  ;;  %4148 = vtanh.f32 %v4977_v48 }
 0xbb1   :  { %4150 = vpow2.f32 %v3557_v22 }
 0xbb4   :  { %2514 = vrot.lane.b32.xlu1 %v5093_v15, %s4334_s22 }
 0xbb7   :  { %v4143_v61 = vpop.eup %4142 }
 0xbb8   :  { %2428 = vrot.lane.b32.xlu1 %v4141_v8, %s4330_s15  ;;  %v4145_v56 = vpop.eup %4144 }
 0xbb9   :  { %v2363_v23 = vadd.f32 1.0, %v4145_v56  ;;  %v4147_v19 = vpop.eup %4146 }
 0xbba   :  { %v4149_v51 = vpop.eup %4148  ;;  %v2365_v18 = vadd.f32 1.0, %v4147_v19 }
 0xbbb   :  { %4152 = vrcp.f32 %v2363_v23  ;;  %v4151_v55 = vpop.eup %4150  ;;  %v2484_v53 = vmul.f32 %v4149_v51, %v2449_v4 }
 0xbbc   :  { %2516 = vrot.lane.b32.xlu1 %v5066_v49, %s4334_s22  ;;  %4154 = vtanh.f32 %v4987_v20  ;;  %v2367_v38 = vadd.f32 1.0, %v4151_v55 }
 0xbbd   :  { %4156 = vtanh.f32 %v5017_v62 }
 0xbbe   :  { %4158 = vrcp.f32 %v2365_v18 }
 0xbbf   :  { %4160 = vtanh.f32 %v4995_v25  ;;  %v3855_v25 = vpack.c.bf16 %v2628_v58, %v2627_v45 }
 0xbc0   :  { %2436 = vrot.lane.b32.xlu1 %v4143_v61, %s4330_s15  ;;  %4162 = vrcp.f32 %v2367_v38 }
 0xbc1   :  { %4164 = vtanh.f32 %v5003_v47  ;;  %3856 = vmatprep.subr.bf16.mxu0 %v3855_v25 }
 0xbc2   :  { %4166 = vtanh.f32 %v5029_v40  ;;  %3858 = vmatpush3.bf16.msra.mxu0 %v3855_v25 }
 0xbc3   :  { %4168 = vtanh.f32 %v5011_v41 }
 0xbc4   :  { %2518 = vrot.lane.b32.xlu1 %v5104_v14, %s4334_s22  ;;  %4170 = vtanh.f32 %v5023_v31 }
 0xbc5   :  { %v4153_v20 = vpop.eup %4152  ;;  %4172 = vtanh.f32 %v5037_v52 }
 0xbc6   :  { %v4155_v28 = vpop.eup %4154  ;;  %4174 = vtanh.f32 %v5056_v6 }
 0xbc7   :  { %v4157_v60 = vpop.eup %4156  ;;  %4176 = vtanh.f32 %v5082_v29 }
 0xbc8   :  { %v4159_v44 = vpop.eup %4158  ;;  %4178 = vtanh.f32 %v5046_v63 }
 0xbc9   :  { %v4161_v36 = vpop.eup %4160  ;;  %4180 = vtanh.f32 %v5093_v15 }
 0xbca   :  { %v4163_v61 = vpop.eup %4162  ;;  %4182 = vtanh.f32 %v5066_v49 }
 0xbcb   :  { %v4165_v22 = vpop.eup %4164  ;;  %4184 = vtanh.f32 %v5104_v14 }
 0xbcc   :  { %v4167_v41 = vpop.eup %4166 }
 0xbcd   :  { %v4169_v51 = vpop.eup %4168 }
 0xbce   :  { %v4171_v52 = vpop.eup %4170 }
 0xbdc   :  { %v2523_v30 = vpop.permute.xlu0 %2522 }
 0xbe0   :  { %v2525_v13 = vpop.permute.xlu1 %2524 }
 0xbe4   :  { %v5112_v32 = vpop.permute.xlu0 %2526 }
 0xbf6   :  { %v2443_v27 = vpop.permute.xlu0 %2442 }
 0xbf7   :  { %v2481_v34 = vmul.f32 %v4155_v28, %v2443_v27 }
 0xbf9   :  { %v2561_v10 = vadd.f32 %v2523_v30, %v2481_v34 }
 0xbfa   :  { %v5114_v33 = vpop.permute.xlu0 %2530  ;;  %v2445_v46 = vpop.permute.xlu1 %2444 }
 0xbfb   :  { %v2482_v37 = vmul.f32 %v4161_v36, %v2445_v46  ;;  %v2577_v4 = vmul.f32 0.70710677, %v2561_v10 }
 0xbfd   :  { %v2562_v56 = vadd.f32 %v2525_v13, %v2482_v37 }
 0xbfe   :  { %v2529_v48 = vpop.permute.xlu1 %2528  ;;  %v2447_v54 = vpop.permute.xlu0 %2446 }
 0xbff   :  { %v2564_v24 = vadd.f32 %v2529_v48, %v2484_v53  ;;  %v2483_v27 = vmul.f32 %v4165_v22, %v2447_v54  ;;  %v2578_v18 = vmul.f32 0.70710677, %v2562_v56  ;;  %v4173_v54 = vpop.eup %4172 }
 0xc01   :  { %v2580_v42 = vmul.f32 0.70710677, %v2564_v24  ;;  %v2563_v31 = vadd.f32 %v5112_v32, %v2483_v27 }
 0xc02   :  { %v2451_v62 = vpop.permute.xlu0 %2450 }
 0xc03   :  { %2600 = vrot.lane.b32.xlu0 %v2580_v42, %s4335_s23  ;;  %v2485_v55 = vmul.f32 %v4169_v51, %v2451_v62  ;;  %v2579_v13 = vmul.f32 0.70710677, %v2563_v31 }
 0xc05   :  { %v2565_v38 = vadd.f32 %v5114_v33, %v2485_v55 }
 0xc06   :  { %v2453_v17 = vpop.permute.xlu1 %2452 }
 0xc07   :  { %2430 = vrot.lane.b32.xlu0 %v4153_v20, %s4330_s15  ;;  %v2486_v5 = vmul.f32 %v4157_v60, %v2453_v17  ;;  %v2581_v32 = vmul.f32 0.70710677, %v2565_v38 }
 0xc0a   :  { %v2455_v47 = vpop.permute.xlu0 %2454  ;;  %v2533_v8 = vpop.permute.xlu1 %2532 }
 0xc0b   :  { %v2566_v40 = vadd.f32 %v2533_v8, %v2486_v5  ;;  %2434 = vrot.lane.b32.xlu0 %v4159_v44, %s4330_s15  ;;  %v2487_v35 = vmul.f32 %v4171_v52, %v2455_v47  ;;  %v4175_v44 = vpop.eup %4174 }
 0xc0c   :  { %v4177_v36 = vpop.eup %4176 }
 0xc0d   :  { %v2582_v26 = vmul.f32 0.70710677, %v2566_v40 }
 0xc0e   :  { %v2535_v39 = vpop.permute.xlu0 %2534  ;;  %v2425_v12 = vpop.permute.xlu1 %2424 }
 0xc0f   :  { %2438 = vrot.lane.b32.xlu0 %v4163_v61, %s4330_s15  ;;  %2604 = vrot.lane.b32.xlu1 %v2582_v26, %s4335_s23  ;;  %v2472_v23 = vmul.f32 %v4167_v41, %v2425_v12  ;;  %v2567_v3 = vadd.f32 %v2535_v39, %v2487_v35  ;;  %v4179_v26 = vpop.eup %4178 }
 0xc10   :  { %v4181_v39 = vpop.eup %4180 }
 0xc11   :  { %v2583_v62 = vmul.f32 0.70710677, %v2567_v3  ;;  %v4183_v49 = vpop.eup %4182 }
 0xc12   :  { %v2507_v30 = vpop.permute.xlu0 %2506  ;;  %v2505_v19 = vpop.permute.xlu1 %2504 }
 0xc13   :  { %v2552_v46 = vadd.f32 %v2505_v19, %v2472_v23  ;;  %2594 = vrot.lane.b32.xlu0 %v2577_v4, %s4335_s23  ;;  %v4185_v23 = vpop.eup %4184 }
 0xc15   :  { %v2568_v53 = vmul.f32 0.70710677, %v2552_v46 }
 0xc16   :  { %v2593_v48 = vpop.permute.xlu0 %2592  ;;  %v2509_v17 = vpop.permute.xlu1 %2508 }
 0xc17   :  { %v2616_v24 = vsel %vm1191_vm6, %v2568_v53, %v2593_v48  ;;  %2596 = vrot.lane.b32.xlu0 %v2578_v18, %s4335_s23 }
 0xc18   :  { %3760 = vmatprep.mubr.msk.f32.mxu0 %vm1204_vm7, %v2616_v24 }
 0xc1a   :  { %v2427_v42 = vpop.permute.xlu0 %2426  ;;  %v2511_v45 = vpop.permute.xlu1 %2510 }
 0xc1b   :  { %v2473_v59 = vmul.f32 %v4173_v54, %v2427_v42  ;;  %2598 = vrot.lane.b32.xlu0 %v2579_v13, %s4335_s23 }
 0xc1d   :  { %v2553_v20 = vadd.f32 %v2507_v30, %v2473_v59 }
 0xc1e   :  { %v2433_v58 = vpop.permute.xlu1 %2432 }
 0xc1f   :  { %2602 = vrot.lane.b32.xlu0 %v2581_v32, %s4335_s23  ;;  %v2569_v6 = vmul.f32 0.70710677, %v2553_v20  ;;  %v2476_v15 = vmul.f32 %v4179_v26, %v2433_v58  ;;  %v271_v20 = vsub.s32 5, %v4438_v11 }
 0xc22   :  { %v2513_v28 = vpop.permute.xlu1 %2512 }
 0xc23   :  { %2606 = vrot.lane.b32.xlu0 %v2583_v62, %s4335_s23  ;;  %v2556_v4 = vadd.f32 %v2513_v28, %v2476_v15  ;;  %v5162_v62 = vld [vmem:[%s5335_s6] sm:$0xff] }
 0xc25   :  { %v2572_v18 = vmul.f32 0.70710677, %v2556_v4 }
 0xc26   :  { %v2515_v25 = vpop.permute.xlu1 %2514 }
 0xc2a   :  { %v2429_v34 = vpop.permute.xlu1 %2428 }
 0xc2b   :  { %v2474_v47 = vmul.f32 %v4175_v44, %v2429_v34 }
 0xc2d   :  { %v2554_v10 = vadd.f32 %v2509_v17, %v2474_v47  ;;  %v272_v17 = vrot.slane %v5162_v62, %v271_v20 }
 0xc2e   :  { %v2517_v8 = vpop.permute.xlu1 %2516 }
 0xc2f   :  { %v2570_v12 = vmul.f32 0.70710677, %v2554_v10  ;;  %v522_v58 = vadd.f32 %v4637_v0, %v272_v17 }
 0xc32   :  { %v2437_v61 = vpop.permute.xlu1 %2436 }
 0xc33   :  { %v2478_v14 = vmul.f32 %v4183_v49, %v2437_v61 }
 0xc35   :  { %v2558_v31 = vadd.f32 %v2517_v8, %v2478_v14 }
 0xc36   :  { %v2519_v30 = vpop.permute.xlu1 %2518 }
 0xc37   :  { %v2574_v38 = vmul.f32 0.70710677, %v2558_v31 }
 0xc75   :  { %v2601_v33 = vpop.permute.xlu0 %2600 }
 0xc76   :  { %v2620_v48 = vsel %vm1191_vm6, %v2572_v18, %v2601_v33 }
 0xc79   :  { %v2431_v60 = vpop.permute.xlu0 %2430 }
 0xc7a   :  { %v2475_v37 = vmul.f32 %v4177_v36, %v2431_v60 }
 0xc7c   :  { %v2555_v22 = vadd.f32 %v2511_v45, %v2475_v37  ;;  %v528_v45 = vadd.f32 %v4664_v9, %v272_v17 }
 0xc7d   :  { %v2435_v5 = vpop.permute.xlu0 %2434 }
 0xc7e   :  { %v2477_v41 = vmul.f32 %v4181_v39, %v2435_v5  ;;  %v2571_v19 = vmul.f32 0.70710677, %v2555_v22 }
 0xc80   :  { %v2557_v46 = vadd.f32 %v2515_v25, %v2477_v41 }
 0xc81   :  { %v2439_v40 = vpop.permute.xlu0 %2438  ;;  %v2605_v13 = vpop.permute.xlu1 %2604 }
 0xc82   :  { %v2479_v51 = vmul.f32 %v4185_v23, %v2439_v40  ;;  %v2573_v24 = vmul.f32 0.70710677, %v2557_v46  ;;  %v2622_v35 = vsel %vm1191_vm6, %v2574_v38, %v2605_v13 }
 0xc84   :  { %v2559_v52 = vadd.f32 %v2519_v30, %v2479_v51 }
 0xc85   :  { %v2595_v29 = vpop.permute.xlu0 %2594 }
 0xc86   :  { %v2617_v63 = vsel %vm1191_vm6, %v2569_v6, %v2595_v29  ;;  %v2575_v59 = vmul.f32 0.70710677, %v2559_v52 }
 0xc87   :  { %3761 = vmatmul.mubr.msk.f32.vlgmr.msra.gmra.mrb[18].mxu0 %vm1204_vm7, %v2617_v63 }
 0xc89   :  { %v2597_v56 = vpop.permute.xlu0 %2596 }
 0xc8a   :  { %v2618_v27 = vsel %vm1191_vm6, %v2570_v12, %v2597_v56 }
 0xc8b   :  { %3763 = vmatprep.mubr.msk.f32.mxu0 %vm1204_vm7, %v2618_v27 }
 0xc8d   :  { %v2599_v55 = vpop.permute.xlu0 %2598 }
 0xc8e   :  { %v2619_v53 = vsel %vm1191_vm6, %v2571_v19, %v2599_v55 }
 0xc8f   :  { %3764 = vmatmul.mubr.msk.f32.gmra.mrb[20].mxu0 %vm1204_vm7, %v2619_v53 }
 0xc90   :  { %3766 = vmatprep.mubr.msk.f32.mxu0 %vm1204_vm7, %v2620_v48 }
 0xc91   :  { %v2603_v54 = vpop.permute.xlu0 %2602 }
 0xc92   :  { %v2621_v42 = vsel %vm1191_vm6, %v2573_v24, %v2603_v54 }
 0xc93   :  { %3767 = vmatmul.mubr.msk.f32.gmra.mrb[22].mxu0 %vm1204_vm7, %v2621_v42 }
 0xc94   :  { %3769 = vmatprep.mubr.msk.f32.mxu0 %vm1204_vm7, %v2622_v35 }
 0xc95   :  { %v2607_v32 = vpop.permute.xlu0 %2606 }
 0xc96   :  { %v2623_v3 = vsel %vm1191_vm6, %v2575_v59, %v2607_v32  ;;  %v2931_v59 = vld [vmem:[#allocation3 + $0x80] sm:$0xff]  ;;  %v2932_v32 = vld [vmem:[#allocation3 + $0x88] sm:$0xff] }
 0xc97   :  { %3770 = vmatmul.mubr.msk.f32.gmra.mrb[24].mxu0 %vm1204_vm7, %v2623_v3  ;;  %v3859_v3 = vpack.c.bf16 %v2932_v32, %v2931_v59 }
 0xc99   :  { %3860 = vmatprep.subr.bf16.mxu1 %v3859_v3 }
 0xc9a   :  { %3862 = vmatpush3.bf16.msra.mxu1 %v3859_v3 }
 0xd5a   :  { %v3762_v28 = vpop.f32.mrb[18].mxu0 }
 0xd5b   :  { %v5167_v25 = vadd.f32 %v3762_v28, %v528_v45  ;;  %v2719_v33 = vpop.f32.mrb[19].mxu0 }
 0xd5c   :  { %v5169_v60 = vadd.f32 %v2719_v33, %v522_v58 }
 0xd5d   :  { %v3575_v39 = vmul.f32 -1.442695, %v5167_v25 }
 0xd5e   :  { %v3574_v15 = vmul.f32 -1.442695, %v5169_v60 }
 0xd62   :  { %v3765_v34 = vpop.f32.mrb[20].mxu0 }
 0xd63   :  { %v5171_v5 = vadd.f32 %v3765_v34, %v528_v45  ;;  %v2729_v44 = vpop.f32.mrb[21].mxu0 }
 0xd64   :  { %v5173_v47 = vadd.f32 %v2729_v44, %v522_v58 }
 0xd65   :  { %v3577_v41 = vmul.f32 -1.442695, %v5171_v5 }
 0xd66   :  { %v3768_v8 = vpop.f32.mrb[22].mxu0  ;;  %v3576_v56 = vmul.f32 -1.442695, %v5173_v47 }
 0xd67   :  { %v5175_v40 = vadd.f32 %v3768_v8, %v528_v45  ;;  %v2739_v36 = vpop.f32.mrb[23].mxu0 }
 0xd68   :  { %v5177_v6 = vadd.f32 %v2739_v36, %v522_v58 }
 0xd69   :  { %v3579_v0 = vmul.f32 -1.442695, %v5175_v40  ;;  %2880 = vrot.lane.b32.xlu0 %v5175_v40, %s4334_s22 }
 0xd6a   :  { %v3578_v9 = vmul.f32 -1.442695, %v5177_v6  ;;  %2878 = vrot.lane.b32.xlu1 %v5177_v6, %s4334_s22  ;;  %v3771_v10 = vpop.f32.mrb[24].mxu0 }
 0xd6b   :  { %4186 = vpow2.f32 %v3579_v0  ;;  %v5185_v37 = vadd.f32 %v3771_v10, %v528_v45  ;;  %v2749_v29 = vpop.f32.mrb[25].mxu0  ;;  %v2933_v45 = vld [vmem:[#allocation3 + $0x90] sm:$0xff] }
 0xd6c   :  { %v5187_v26 = vadd.f32 %v2749_v29, %v522_v58  ;;  %4188 = vpow2.f32 %v3578_v9  ;;  %v2934_v58 = vld [vmem:[#allocation3 + $0x98] sm:$0xff] }
 0xd6d   :  { %v3581_v61 = vmul.f32 -1.442695, %v5185_v37  ;;  %v3863_v28 = vpack.c.bf16 %v2934_v58, %v2933_v45 }
 0xd6e   :  { %v3580_v63 = vmul.f32 -1.442695, %v5187_v26 }
 0xd6f   :  { %4190 = vpow2.f32 %v3581_v61  ;;  %3864 = vmatprep.subr.bf16.mxu1 %v3863_v28 }
 0xd70   :  { %4192 = vpow2.f32 %v3580_v63  ;;  %3866 = vmatpush3.bf16.msra.mxu1 %v3863_v28 }
 0xd71   :  { %4194 = vpow2.f32 %v3575_v39 }
 0xd72   :  { %4196 = vpow2.f32 %v3574_v15 }
 0xd75   :  { %v4187_v49 = vpop.eup %4186 }
 0xd76   :  { %v2803_v12 = vadd.f32 1.0, %v4187_v49  ;;  %v4189_v22 = vpop.eup %4188 }
 0xd77   :  { %v2802_v4 = vadd.f32 1.0, %v4189_v22 }
 0xd78   :  { %4198 = vrcp.f32 %v2803_v12 }
 0xd79   :  { %v4191_v14 = vpop.eup %4190  ;;  %4200 = vrcp.f32 %v2802_v4 }
 0xd7a   :  { %v2805_v27 = vadd.f32 1.0, %v4191_v14  ;;  %v4193_v23 = vpop.eup %4192  ;;  %4202 = vpow2.f32 %v3577_v41 }
 0xd7b   :  { %v2804_v30 = vadd.f32 1.0, %v4193_v23  ;;  %v4195_v19 = vpop.eup %4194 }
 0xd7c   :  { %4204 = vrcp.f32 %v2805_v27  ;;  %v4197_v46 = vpop.eup %4196  ;;  %v2799_v51 = vadd.f32 1.0, %v4195_v19 }
 0xd7d   :  { %4206 = vpow2.f32 %v3576_v56  ;;  %v2798_v31 = vadd.f32 1.0, %v4197_v46 }
 0xd7e   :  { %4208 = vrcp.f32 %v2804_v30 }
 0xd7f   :  { %4210 = vrcp.f32 %v2799_v51 }
 0xd80   :  { %4212 = vrcp.f32 %v2798_v31 }
 0xd82   :  { %v4199_v18 = vpop.eup %4198 }
 0xd83   :  { %2840 = vrot.lane.b32.xlu0 %v4199_v18, %s4330_s15  ;;  %v4201_v55 = vpop.eup %4200 }
 0xd84   :  { %v4203_v53 = vpop.eup %4202  ;;  %2838 = vrot.lane.b32.xlu1 %v4201_v55, %s4330_s15 }
 0xd85   :  { %v2801_v13 = vadd.f32 1.0, %v4203_v53 }
 0xd86   :  { %v4205_v48 = vpop.eup %4204 }
 0xd87   :  { %v4207_v24 = vpop.eup %4206  ;;  %2844 = vrot.lane.b32.xlu0 %v4205_v48, %s4330_s15  ;;  %4214 = vrcp.f32 %v2801_v13 }
 0xd88   :  { %v4209_v52 = vpop.eup %4208  ;;  %v2800_v38 = vadd.f32 1.0, %v4207_v24 }
 0xd89   :  { %2842 = vrot.lane.b32.xlu1 %v4209_v52, %s4330_s15  ;;  %v4211_v54 = vpop.eup %4210 }
 0xd8a   :  { %4216 = vrcp.f32 %v2800_v38  ;;  %v4213_v42 = vpop.eup %4212 }
 0xd8b   :  { %2884 = vrot.lane.b32.xlu0 %v5185_v37, %s4334_s22  ;;  %4218 = vtanh.f32 %v5175_v40 }
 0xd8c   :  { %4220 = vtanh.f32 %v5177_v6 }
 0xd8d   :  { %2882 = vrot.lane.b32.xlu1 %v5187_v26, %s4334_s22  ;;  %4222 = vtanh.f32 %v5185_v37 }
 0xd8e   :  { %4224 = vtanh.f32 %v5187_v26 }
 0xd8f   :  { %2832 = vrot.lane.b32.xlu0 %v4211_v54, %s4330_s15  ;;  %4226 = vtanh.f32 %v5169_v60 }
 0xd90   :  { %4228 = vtanh.f32 %v5167_v25 }
 0xd91   :  { %2830 = vrot.lane.b32.xlu1 %v4213_v42, %s4330_s15  ;;  %v4215_v35 = vpop.eup %4214  ;;  %4230 = vtanh.f32 %v5173_v47 }
 0xd92   :  { %4232 = vtanh.f32 %v5171_v5 }
 0xd93   :  { %2872 = vrot.lane.b32.xlu0 %v5167_v25, %s4334_s22 }
 0xd94   :  { %v4217_v20 = vpop.eup %4216 }
 0xd95   :  { %2870 = vrot.lane.b32.xlu1 %v5169_v60, %s4334_s22  ;;  %v4219_v44 = vpop.eup %4218 }
 0xd96   :  { %v4221_v8 = vpop.eup %4220 }
 0xd97   :  { %2836 = vrot.lane.b32.xlu0 %v4215_v35, %s4330_s15  ;;  %v4223_v29 = vpop.eup %4222 }
 0xd98   :  { %v4225_v39 = vpop.eup %4224 }
 0xd99   :  { %2834 = vrot.lane.b32.xlu1 %v4217_v20, %s4330_s15  ;;  %v4227_v46 = vpop.eup %4226 }
 0xd9a   :  { %v4229_v55 = vpop.eup %4228 }
 0xd9b   :  { %v4231_v24 = vpop.eup %4230 }
 0xd9c   :  { %v4233_v38 = vpop.eup %4232 }
 0xd9d   :  { %2874 = vrot.lane.b32.xlu1 %v5173_v47, %s4334_s22 }
 0xda1   :  { %2876 = vrot.lane.b32.xlu1 %v5171_v5, %s4334_s22 }
 0xddb   :  { %v2881_v17 = vpop.permute.xlu0 %2880 }
 0xddc   :  { %v2879_v33 = vpop.permute.xlu1 %2878 }
 0xdf5   :  { %v2841_v34 = vpop.permute.xlu0 %2840 }
 0xdf6   :  { %v2839_v36 = vpop.permute.xlu1 %2838  ;;  %v2859_v0 = vmul.f32 %v4219_v44, %v2841_v34  ;;  %v275_v34 = vsub.s32 6, %v4438_v11 }
 0xdf7   :  { %v2858_v9 = vmul.f32 %v4221_v8, %v2839_v36 }
 0xdf8   :  { %v2899_v61 = vadd.f32 %v2881_v17, %v2859_v0  ;;  %v276_v44 = vrot.slane %v5162_v62, %v275_v34 }
 0xdf9   :  { %v2845_v40 = vpop.permute.xlu0 %2844  ;;  %v2898_v10 = vadd.f32 %v2879_v33, %v2858_v9 }
 0xdfa   :  { %v2861_v15 = vmul.f32 %v4223_v29, %v2845_v40  ;;  %v2907_v12 = vmul.f32 0.70710677, %v2899_v61  ;;  %v603_v8 = vadd.f32 %v4655_v1, %v276_v44  ;;  %v597_v36 = vadd.f32 %v4632_v43, %v276_v44 }
 0xdfb   :  { %v2843_v6 = vpop.permute.xlu1 %2842  ;;  %v2906_v63 = vmul.f32 0.70710677, %v2898_v10 }
 0xdfc   :  { %v2860_v49 = vmul.f32 %v4225_v39, %v2843_v6 }
 0xdfd   :  { %v2885_v37 = vpop.permute.xlu0 %2884  ;;  %2914 = vrot.lane.b32.xlu0 %v2906_v63, %s4335_s23 }
 0xdfe   :  { %v2901_v22 = vadd.f32 %v2885_v37, %v2861_v15 }
 0xdff   :  { %v2883_v26 = vpop.permute.xlu1 %2882 }
 0xe00   :  { %v2900_v41 = vadd.f32 %v2883_v26, %v2860_v49  ;;  %v2909_v14 = vmul.f32 0.70710677, %v2901_v22 }
 0xe01   :  { %2916 = vrot.lane.b32.xlu0 %v2907_v12, %s4335_s23  ;;  %v2833_v23 = vpop.permute.xlu0 %2832 }
 0xe02   :  { %v2908_v4 = vmul.f32 0.70710677, %v2900_v41  ;;  %v2855_v48 = vmul.f32 %v4229_v55, %v2833_v23  ;;  %v3119_v23 = vld [vmem:[#allocation3 + $0xa0] sm:$0xff] }
 0xe03   :  { %v2831_v56 = vpop.permute.xlu1 %2830 }
 0xe04   :  { %2918 = vrot.lane.b32.xlu1 %v2908_v4, %s4335_s23  ;;  %v2854_v51 = vmul.f32 %v4227_v46, %v2831_v56 }
 0xe05   :  { %2920 = vrot.lane.b32.xlu0 %v2909_v14, %s4335_s23  ;;  %v2873_v19 = vpop.permute.xlu0 %2872 }
 0xe06   :  { %v2895_v52 = vadd.f32 %v2873_v19, %v2855_v48  ;;  %v3121_v19 = vld [vmem:[#allocation3 + $0xb0] sm:$0xff] }
 0xe07   :  { %v2871_v27 = vpop.permute.xlu1 %2870 }
 0xe08   :  { %v2894_v31 = vadd.f32 %v2871_v27, %v2854_v51  ;;  %v2903_v5 = vmul.f32 0.70710677, %v2895_v52  ;;  %v3122_v51 = vld [vmem:[#allocation3 + $0xb8] sm:$0xff] }
 0xe09   :  { %v2837_v53 = vpop.permute.xlu0 %2836 }
 0xe0a   :  { %v2902_v60 = vmul.f32 0.70710677, %v2894_v31  ;;  %v2857_v42 = vmul.f32 %v4233_v38, %v2837_v53 }
 0xe0b   :  { %v2835_v30 = vpop.permute.xlu1 %2834 }
 0xe0c   :  { %v2856_v13 = vmul.f32 %v4231_v24, %v2835_v30  ;;  %v3120_v30 = vld [vmem:[#allocation3 + $0xa8] sm:$0xff] }
 0xe0d   :  { %v3867_v46 = vpack.c.bf16 %v3120_v30, %v3119_v23 }
 0xe0f   :  { %v2875_v18 = vpop.permute.xlu1 %2874  ;;  %3868 = vmatprep.subr.bf16.mxu1 %v3867_v46 }
 0xe10   :  { %v2896_v47 = vadd.f32 %v2875_v18, %v2856_v13  ;;  %v3871_v18 = vpack.c.bf16 %v3122_v51, %v3121_v19 }
 0xe12   :  { %v2904_v3 = vmul.f32 0.70710677, %v2896_v47 }
 0xe13   :  { %v2877_v54 = vpop.permute.xlu1 %2876 }
 0xe14   :  { %v2897_v59 = vadd.f32 %v2877_v54, %v2857_v42 }
 0xe16   :  { %v2905_v45 = vmul.f32 0.70710677, %v2897_v59 }
 0xe6f   :  { %v2915_v25 = vpop.permute.xlu0 %2914 }
 0xe70   :  { %v2926_v35 = vsel %vm1191_vm6, %v2902_v60, %v2915_v25 }
 0xe71   :  { %3780 = vmatprep.mubr.msk.f32.mxu1 %vm1204_vm7, %v2926_v35 }
 0xe73   :  { %v2917_v32 = vpop.permute.xlu0 %2916 }
 0xe74   :  { %v2927_v20 = vsel %vm1191_vm6, %v2903_v5, %v2917_v32 }
 0xe75   :  { %3781 = vmatmul.mubr.msk.f32.vlgmr.msra.gmra.mrb[18].mxu1 %vm1204_vm7, %v2927_v20 }
 0xe76   :  { %v2919_v17 = vpop.permute.xlu1 %2918  ;;  %3870 = vmatpush3.bf16.msra.mxu1 %v3867_v46 }
 0xe77   :  { %v2928_v58 = vsel %vm1191_vm6, %v2904_v3, %v2919_v17  ;;  %v2921_v28 = vpop.permute.xlu0 %2920  ;;  %3872 = vmatprep.subr.bf16.mxu1 %v3871_v18 }
 0xe78   :  { %3783 = vmatprep.mubr.msk.f32.mxu1 %vm1204_vm7, %v2928_v58  ;;  %v2929_v33 = vsel %vm1191_vm6, %v2905_v45, %v2921_v28 }
 0xe79   :  { %3784 = vmatmul.mubr.msk.f32.gmra.mrb[20].mxu1 %vm1204_vm7, %v2929_v33 }
 0xe7a   :  { %3874 = vmatpush3.bf16.msra.mxu1 %v3871_v18 }
 0xf48   :  { %v3782_v0 = vpop.f32.mrb[18].mxu1 }
 0xf49   :  { %v5239_v9 = vadd.f32 %v3782_v0, %v603_v8  ;;  %v3013_v40 = vpop.f32.mrb[19].mxu1 }
 0xf4a   :  { %v3032_v10 = vadd.f32 %v3013_v40, %v597_v36 }
 0xf4b   :  { %v3587_v15 = vmul.f32 -1.442695, %v5239_v9 }
 0xf4c   :  { %v3785_v6 = vpop.f32.mrb[20].mxu1  ;;  %v3586_v49 = vmul.f32 -1.442695, %v3032_v10 }
 0xf4d   :  { %v3035_v29 = vadd.f32 %v3785_v6, %v603_v8  ;;  %v3023_v61 = vpop.f32.mrb[21].mxu1 }
 0xf4e   :  { %v3034_v63 = vadd.f32 %v3023_v61, %v597_v36 }
 0xf4f   :  { %v3589_v39 = vmul.f32 -1.442695, %v3035_v29 }
 0xf50   :  { %v3588_v37 = vmul.f32 -1.442695, %v3034_v63 }
 0xf51   :  { %4234 = vpow2.f32 %v3589_v39 }
 0xf52   :  { %4236 = vpow2.f32 %v3588_v37 }
 0xf53   :  { %4238 = vpow2.f32 %v3587_v15 }
 0xf54   :  { %4240 = vpow2.f32 %v3586_v49 }
 0xf5b   :  { %v4235_v1 = vpop.eup %4234 }
 0xf5c   :  { %v4237_v43 = vpop.eup %4236  ;;  %v3055_v26 = vadd.f32 1.0, %v4235_v1 }
 0xf5d   :  { %v3054_v12 = vadd.f32 1.0, %v4237_v43  ;;  %v4239_v22 = vpop.eup %4238 }
 0xf5e   :  { %4242 = vrcp.f32 %v3055_v26  ;;  %v4241_v41 = vpop.eup %4240  ;;  %v3053_v4 = vadd.f32 1.0, %v4239_v22  ;;  %v3601_v22 = vld [vmem:[%s5340_s11 + $0x28] sm:$0xff] }
 0xf5f   :  { %4244 = vrcp.f32 %v3054_v12  ;;  %v3052_v14 = vadd.f32 1.0, %v4241_v41  ;;  %v3602_v41 = vld [vmem:[%s5340_s11 + $0x30] sm:$0xff] }
 0xf60   :  { %4246 = vrcp.f32 %v3053_v4 }
 0xf61   :  { %4248 = vrcp.f32 %v3052_v14  ;;  %v3603_v14 = vld [vmem:[%s5340_s11 + $0x38] sm:$0xff] }
 0xf62   :  { %4250 = vtanh.f32 %v3035_v29 }
 0xf63   :  { %4252 = vtanh.f32 %v3034_v63 }
 0xf64   :  { %4254 = vtanh.f32 %v3032_v10 }
 0xf65   :  { %4256 = vtanh.f32 %v5239_v9 }
 0xf68   :  { %v4243_v56 = vpop.eup %4242 }
 0xf69   :  { %v4245_v27 = vpop.eup %4244  ;;  %3074 = vrot.lane.b32.xlu0 %v4243_v56, %s4330_s15 }
 0xf6a   :  { %3072 = vrot.lane.b32.xlu1 %v4245_v27, %s4330_s15  ;;  %v4247_v31 = vpop.eup %4246  ;;  %v3883_v27 = vpack.c.bf16 %v3603_v14, %v3602_v41 }
 0xf6b   :  { %v4249_v55 = vpop.eup %4248 }
 0xf6c   :  { %v4251_v24 = vpop.eup %4250 }
 0xf6d   :  { %3094 = vrot.lane.b32.xlu0 %v3035_v29, %s4334_s22  ;;  %v4253_v52 = vpop.eup %4252 }
 0xf6e   :  { %3092 = vrot.lane.b32.xlu1 %v3034_v63, %s4334_s22  ;;  %v4255_v32 = vpop.eup %4254 }
 0xf6f   :  { %v4257_v20 = vpop.eup %4256 }
 0xf71   :  { %3070 = vrot.lane.b32.xlu0 %v4247_v31, %s4330_s15 }
 0xf72   :  { %3068 = vrot.lane.b32.xlu1 %v4249_v55, %s4330_s15 }
 0xf75   :  { %3090 = vrot.lane.b32.xlu0 %v5239_v9, %s4334_s22  ;;  %v279_v9 = vsub.s32 7, %v4438_v11  ;;  %v3594_v11 = vld [vmem:[%s5338_s9 + $0x10] sm:$0xff] }
 0xf76   :  { %3088 = vrot.lane.b32.xlu1 %v3032_v10, %s4334_s22 }
 0xf77   :  { %v280_v10 = vrot.slane %v5162_v62, %v279_v9  ;;  %v3600_v62 = vld [vmem:[%s5340_s11 + $0x20] sm:$0xff] }
 0xf78   :  { %v3879_v4 = vpack.c.bf16 %v3601_v22, %v3600_v62 }
 0xf79   :  { %v605_v6 = vadd.f32 %v4668_v57, %v280_v10  ;;  %v599_v29 = vadd.f32 %v4642_v50, %v280_v10  ;;  %v3595_v50 = vld [vmem:[%s5338_s9 + $0x18] sm:$0xff] }
 0xf7a   :  { %v3875_v57 = vpack.c.bf16 %v3595_v50, %v3594_v11  ;;  %3880 = vmatprep.subr.bf16.mxu0 %v3879_v4 }
 0xf7b   :  { %3882 = vmatpush3.bf16.msra.mxu0 %v3879_v4 }
 0xf7c   :  { %3876 = vmatprep.subr.bf16.mxu1 %v3875_v57  ;;  %3884 = vmatprep.subr.bf16.mxu0 %v3883_v27 }
 0xf7f   :  { %3886 = vmatpush3.bf16.msra.mxu0 %v3883_v27 }
 0xfdb   :  { %v3075_v53 = vpop.permute.xlu0 %3074 }
 0xfdc   :  { %v3073_v48 = vpop.permute.xlu1 %3072  ;;  %v3083_v60 = vmul.f32 %v4251_v24, %v3075_v53 }
 0xfdd   :  { %v3082_v13 = vmul.f32 %v4253_v52, %v3073_v48 }
 0xfdf   :  { %v3095_v38 = vpop.permute.xlu0 %3094 }
 0xfe0   :  { %v3103_v54 = vadd.f32 %v3095_v38, %v3083_v60  ;;  %v3093_v25 = vpop.permute.xlu1 %3092 }
 0xfe1   :  { %v3102_v42 = vadd.f32 %v3093_v25, %v3082_v13  ;;  %v3597_v13 = vld [vmem:[%s5339_s10 + $0x1] ss:$0 sm:$0xff]  ;;  %s4337_s10 = smov 2  }
 0xfe2   :  { %v3107_v47 = vmul.f32 0.70710677, %v3103_v54 }
 0xfe3   :  { %v3106_v35 = vmul.f32 0.70710677, %v3102_v42  ;;  %v3071_v59 = vpop.permute.xlu0 %3070 }
 0xfe4   :  { %3112 = vrot.lane.b32.xlu0 %v3107_v47, %s4335_s23  ;;  %v3069_v5 = vpop.permute.xlu1 %3068  ;;  %v3081_v58 = vmul.f32 %v4257_v20, %v3071_v59 }
 0xfe5   :  { %3110 = vrot.lane.b32.xlu1 %v3106_v35, %s4335_s23  ;;  %v3080_v17 = vmul.f32 %v4255_v32, %v3069_v5  ;;  %v3605_v5 = vld [vmem:[%s5341_s12 + $0x1] ss:$0 sm:$0xff] }
 0xfe7   :  { %v3091_v45 = vpop.permute.xlu0 %3090 }
 0xfe8   :  { %v3089_v3 = vpop.permute.xlu1 %3088  ;;  %v3101_v33 = vadd.f32 %v3091_v45, %v3081_v58 }
 0xfe9   :  { %v3100_v28 = vadd.f32 %v3089_v3, %v3080_v17 }
 0xfea   :  { %v3105_v8 = vmul.f32 0.70710677, %v3101_v33 }
 0xfeb   :  { %v3104_v34 = vmul.f32 0.70710677, %v3100_v28 }
0x1056   :  { %v3113_v44 = vpop.permute.xlu0 %3112 }
0x1057   :  { %v3111_v36 = vpop.permute.xlu1 %3110  ;;  %v3117_v40 = vsel %vm1191_vm6, %v3105_v8, %v3113_v44  ;;  %v3609_v44 = vld [vmem:[%s5331_s2 + $0x18] sm:$0xff]  ;;  %v3608_v8 = vld [vmem:[%s5331_s2 + $0x10] sm:$0xff]  ;;  %s4338_s2 = smov [#allocation6]  }
0x1058   :  { %v3116_v0 = vsel %vm1191_vm6, %v3104_v34, %v3111_v36 }
0x1059   :  { %3794 = vmatprep.mubr.msk.f32.mxu1 %vm1204_vm7, %v3116_v0 }
0x105a   :  { %3795 = vmatmul.mubr.msk.f32.vlgmr.msra.gmra.mrb[22].mxu1 %vm1204_vm7, %v3117_v40 }
0x105b   :  { %3878 = vmatpush3.bf16.msra.mxu1 %v3875_v57 }
0x112d   :  { %v3796_v61 = vpop.f32.mrb[22].mxu1 }
0x112e   :  { %v3205_v63 = vadd.f32 %v3796_v61, %v605_v6  ;;  %v3195_v39 = vpop.f32.mrb[23].mxu1 }
0x112f   :  { %v3204_v37 = vadd.f32 %v3195_v39, %v599_v29 }
0x1130   :  { %v3593_v15 = vmul.f32 -1.442695, %v3205_v63 }
0x1131   :  { %v3592_v49 = vmul.f32 -1.442695, %v3204_v37 }
0x1132   :  { %4258 = vpow2.f32 %v3593_v15 }
0x1133   :  { %4260 = vpow2.f32 %v3592_v49 }
0x113c   :  { %v4259_v1 = vpop.eup %4258 }
0x113d   :  { %v4261_v43 = vpop.eup %4260  ;;  %v3215_v26 = vadd.f32 1.0, %v4259_v1 }
0x113e   :  { %v3214_v12 = vadd.f32 1.0, %v4261_v43 }
0x113f   :  { %4262 = vrcp.f32 %v3215_v26 }
0x1140   :  { %4264 = vrcp.f32 %v3214_v12 }
0x1141   :  { %4266 = vtanh.f32 %v3205_v63 }
0x1142   :  { %4268 = vtanh.f32 %v3204_v37 }
0x1149   :  { %v4263_v56 = vpop.eup %4262 }
0x114a   :  { %v4265_v23 = vpop.eup %4264  ;;  %3224 = vrot.lane.b32.xlu0 %v4263_v56, %s4330_s15 }
0x114b   :  { %3222 = vrot.lane.b32.xlu1 %v4265_v23, %s4330_s15  ;;  %v4267_v46 = vpop.eup %4266 }
0x114c   :  { %v4269_v51 = vpop.eup %4268 }
0x114e   :  { %3234 = vrot.lane.b32.xlu0 %v3205_v63, %s4334_s22 }
0x114f   :  { %3232 = vrot.lane.b32.xlu1 %v3204_v37, %s4334_s22 }
0x11bc   :  { %v3225_v30 = vpop.permute.xlu0 %3224 }
0x11bd   :  { %v3223_v19 = vpop.permute.xlu1 %3222  ;;  %v3229_v18 = vmul.f32 %v4267_v46, %v3225_v30 }
0x11be   :  { %v3228_v31 = vmul.f32 %v4269_v51, %v3223_v19 }
0x11c0   :  { %v3235_v55 = vpop.permute.xlu0 %3234 }
0x11c1   :  { %v3239_v53 = vadd.f32 %v3235_v55, %v3229_v18  ;;  %v3233_v48 = vpop.permute.xlu1 %3232 }
0x11c2   :  { %v3238_v24 = vadd.f32 %v3233_v48, %v3228_v31 }
0x11c3   :  { %v3241_v60 = vmul.f32 0.70710677, %v3239_v53 }
0x11c4   :  { %v3240_v52 = vmul.f32 0.70710677, %v3238_v24 }
0x11c6   :  { %3801 = vmatprep.mubr.msk.f32.mxu1 %vm1191_vm6, %v3240_v52 }
0x11c7   :  { %3802 = vmatmul.mubr.msk.f32.vlgmr.msra.gmra.mrb[24].mxu1 %vm1191_vm6, %v3241_v60 }
0x129a   :  { %v3803_v38 = vpop.f32.mrb[24].mxu1 }
0x129b   :  { %v3331_v54 = vadd.f32 %v3803_v38, %v3597_v13  ;;  %v3325_v25 = vpop.f32.mrb[25].mxu1 }
0x129c   :  { %v3326_v42 = vadd.f32 %v3597_v13, %v3325_v25 }
0x129d   :  { %v3335_v35 = vmax.f32 %v3331_v54, 0.0 }
0x129e   :  { %v3334_v47 = vmax.f32 %v3326_v42, 0.0 }
0x12a0   :  { %3812 = vmatprep.mubr.msk.f32.mxu0 %vm1204_vm7, %v3334_v47 }
0x12a1   :  { %3813 = vmatmul.mubr.msk.f32.vlgmr.msra.gmra.mrb[26].mxu0 %vm1204_vm7, %v3335_v35 }
0x1374   :  { %v3814_v59 = vpop.f32.mrb[26].mxu0 }
0x1375   :  { %v3427_v32 = vadd.f32 %v3814_v59, %v3605_v5  ;;  %v3421_v3 = vpop.f32.mrb[27].mxu0 }
0x1376   :  { %v3422_v20 = vadd.f32 %v3605_v5, %v3421_v3 }
0x1377   :  { %v3434_v17 = vmul.f32 0.5, %v3427_v32 }
0x1378   :  { %v3433_v45 = vmul.f32 0.5, %v3422_v20 }
0x1379   :  { %v3437_v58 = vmul.f32 1.442695, %v3434_v17 }
0x137a   :  { %v3435_v28 = vmul.f32 1.442695, %v3433_v45 }
0x137b   :  { %4270 = vpow2.f32 %v3437_v58 }
0x137c   :  { %4272 = vpow2.f32 %v3435_v28 }
0x1385   :  { %v4271_v33 = vpop.eup %4270 }
0x1386   :  { %v4273_v34 = vpop.eup %4272  ;;  %3443 = vrot.lane.b32.xlu0 %v4271_v33, %s4336_s24 }
0x1387   :  { %3441 = vrot.lane.b32.xlu1 %v4273_v34, %s4336_s24  ;;  %s3471_s24 = sshll.u32 %s4338_s2, 4  ;;  %s3472_s24 = int_to_ptr.vmem [resolvable:$true] %s3471_s24 }
0x1388   :  { %s4298_s4 = scalar_lea.vmem %s3472_s24, 512  ;;  %p4303_p9 = scmp.lt.s32.totalorder %s3472_s24, %s3472_s24 }
0x1389   :  { %p4299_p8 = scmp.ne.s32.totalorder %s3472_s24, %s4298_s4  ;;  %p4304_p10 = scmp.lt.s32.totalorder %s4298_s4, %s4298_s4 }
0x138a   :  { %2026 = vrot.lane.b32.xlu0 %v4945_v2, %s4337_s10 }
0x138b   :  { %2024 = vrot.lane.b32.xlu1 %v4948_v21, %s4337_s10  ;;  %p4305_p11 = por %p4304_p10, %p4303_p9 }
0x138d   :  { %p4306_p12 = pnand %p4305_p11, %p4299_p8 }
0x13f8   :  { %v3444_v36 = vpop.permute.xlu0 %3443 }
0x13f9   :  { %v3448_v0 = vmul.f32 %v3609_v44, %v3444_v36  ;;  %v3442_v40 = vpop.permute.xlu1 %3441 }
0x13fa   :  { %v3447_v9 = vmul.f32 %v3608_v8, %v3442_v40 }
0x13fb   :  { %v3450_v10 = vadd.f32 %v3448_v0, %v3427_v32 }
0x13fc   :  { %v3449_v6 = vadd.f32 %v3447_v9, %v3422_v20  ;;  %v2027_v29 = vpop.permute.xlu0 %2026 }
0x13fd   :  { %v2032_v2 = vsel %vm2030_vm8, %v4930_v16, %v2027_v29  ;;  %3455 = vrot.lane.b32.xlu0 %v3450_v10, %s4337_s10  ;;  %v2025_v21 = vpop.permute.xlu1 %2024 }
0x13fe   :  { %v2035_v61 = vsel %vm2033_vm9, %v2032_v2, 0.0  ;;  %v2031_v63 = vsel %vm2030_vm8, %v4932_v7, %v2025_v21  ;;  %3453 = vrot.lane.b32.xlu1 %v3449_v6, %s4337_s10 }
0x13ff   :  { %2037 = vst [vmem:[#allocation6 + $0x8] sm:$0xff] %v2035_v61  ;;  %v2034_v39 = vsel %vm2033_vm9, %v2031_v63, 0.0 }
0x1400   :  { %2036 = vst [vmem:[#allocation6] sm:$0xff] %v2034_v39 }
0x146f   :  { %v3456_v37 = vpop.permute.xlu0 %3455 }
0x1470   :  { %v3460_v15 = vsel %vm2030_vm8, %v3427_v32, %v3456_v37  ;;  %v3454_v49 = vpop.permute.xlu1 %3453 }
0x1471   :  { %v3462_v16 = vsel %vm2033_vm9, %v3460_v15, 0.0  ;;  %v3459_v1 = vsel %vm2030_vm8, %v3422_v20, %v3454_v49 }
0x1472   :  { %3465 = vst [vmem:[#allocation6 + $0x18] sm:$0xff] %v3462_v16  ;;  %v3461_v43 = vsel %vm2033_vm9, %v3459_v1, 0.0 }
0x1473   :  { %3464 = vst [vmem:[#allocation6 + $0x10] sm:$0xff] %v3461_v43 }
0x1474   :  { %4309 = shalt.err (!%p4306_p12)
}
0x1475   :  { %s4310_s7 = scalar_lea.hbm %s5342_s13, 512 }
0x1476   :  { %p4311_p13 = scmp.ne.s32.totalorder %s5342_s13, %s4310_s7  ;;  %p4314_p0 = scmp.lt.u32.totalorder %s4310_s7, %s5342_s13 }
0x1478   :  { %p4316_p1 = pnand %p4314_p0, %p4311_p13 }
0x147a   :  { %4319 = shalt.err (!%p4316_p1)
}
0x147b   :  { %3477 = dma.vmem_to_hbm [thread:$0]  %s3472_s24, 512, %s5342_s13, [#allocation5], %s4325_s18, %s4325_s18, %s4326_s19  }
0x147c   :  { %4322 = dma.done.wait [#allocation5], 512  }
0x147d   :  { %4323 = vsyncadd [#allocation5], 4294966784 }
0x147e   :  { %3481 = vsyncpa [#allocation4], 1 }
0x147f   :  { %3482 = vsyncpa [#allocation5], 1 }

</bundles_post_ra>
